<compile_context>
chip_gen: v7x
topology: tpu7x:2x2x1
jax: 0.10.0
libtpu: 0.0.40
codegen_flags: <defaults>
</compile_context>

<pallas_src>
import numpy as np
import jax
import jax.numpy as jnp
from jax.experimental import pallas as pl
from jax.experimental.pallas import tpu as pltpu


def _tap_masks(H, W, K):
    """(K*K, H*W) f32 masks: 1 where the shifted tap reads a valid (non-pad) pixel."""
    pad = (K - 1) // 2
    y = np.arange(H)[:, None]
    x = np.arange(W)[None, :]
    rows = []
    for ky in range(K):
        for kx in range(K):
            dy, dx = ky - pad, kx - pad
            m = ((y + dy >= 0) & (y + dy < H) &
                 (x + dx >= 0) & (x + dx < W)).astype(np.float32)
            rows.append(m.reshape(-1))
    return np.stack(rows, axis=0)


def _make_fused_kernel(H, W, K, Cin, Cout, LB, KKC):
    pad = (K - 1) // 2

    def kernel(x_ref, mask_ref, w1_ref, b1_ref, w2_ref, b2_ref, o_ref, p_ref):
        def build_patches(img):
            # img: (Cin, LB) f32. Fill p_ref (KKC, LB) bf16 with the im2col
            # patch matrix: row (tap*Cin + ci) = channel ci shifted by tap
            # (ky,kx), zeroed where 'same' padding (or another lane-batched
            # image) would have been read.
            for ky in range(K):
                for kx in range(K):
                    tap = ky * K + kx
                    s = (ky - pad) * W + (kx - pad)   # flat-lane shift of this tap
                    if s == 0:
                        shifted = img                 # center tap: mask is all ones
                    else:
                        shifted = pltpu.roll(img, shift=(-s) % LB, axis=1)
                        shifted = shifted * mask_ref[tap:tap + 1, :]
                    p_ref[tap * Cin:(tap + 1) * Cin, :] = shifted.astype(jnp.bfloat16)

        x = x_ref[0]                                           # (Cin, LB) f32

        # ---- conv1 + bias + residual  ->  v2 ----
        build_patches(x)
        v2 = jnp.dot(w1_ref[...], p_ref[...],
                     preferred_element_type=jnp.float32)       # (Cout, LB) f32
        v2 = v2 + b1_ref[...] + x                              # residual (Cin == Cout)
        o_ref[0, 0:Cout, :] = v2.astype(o_ref.dtype)

        # ---- relu ----
        v3 = jnp.maximum(v2, 0.0)

        # ---- conv2 + (bias + 1)  ->  v5 ----
        build_patches(v3)
        v5 = jnp.dot(w2_ref[...], p_ref[...],
                     preferred_element_type=jnp.float32)       # (Cout, LB) f32
        v5 = v5 + b2_ref[...]                                  # "+1" folded into b2
        o_ref[0, Cout:2 * Cout, :] = v5.astype(o_ref.dtype)
        # v6 = relu(v5) is unused by the original model -> skipped.

    return kernel


@jax.jit
def model_forward(x_nchw, w1_oihw, b1, w2_oihw, b2):
    N, Cin, H, W = x_nchw.shape
    Cout, _, K, _ = w1_oihw.shape
    assert Cin == Cout, "residual v1 + x requires Cin == Cout"
    HW = H * W
    KK = K * K
    KKC = KK * Cin                       # 784 = multiple of 8; no padding needed

    # At most 2 grid programs (one per TensorCore on megacore chips); each
    # program handles B images lane-concatenated along the H*W axis.
    G = 2 if N >= 2 else 1
    B = -(-N // G)                       # ceil(N / G)
    Np = G * B
    LB = B * HW

    x_flat = x_nchw.reshape(N, Cin, HW)
    if Np != N:
        x_flat = jnp.concatenate(
            [x_flat, jnp.zeros((Np - N, Cin, HW), x_flat.dtype)], axis=0)
    # (G, B, Cin, HW) -> (G, Cin, B*HW): lane-concatenate the B images.
    x_g = jnp.transpose(x_flat.reshape(G, B, Cin, HW), (0, 2, 1, 3)).reshape(G, Cin, LB)

    def prep_w(w_oihw):
        # (Cout, Cin, K, K) -> (Cout, K, K, Cin) -> (Cout, K*K*Cin), bf16 for the MXU.
        return jnp.transpose(w_oihw, (0, 2, 3, 1)).reshape(Cout, KKC).astype(jnp.bfloat16)

    w1_mat = prep_w(w1_oihw)
    w2_mat = prep_w(w2_oihw)
    b1c = b1.reshape(Cout, 1).astype(jnp.float32)
    b2c = (b2 + 1.0).reshape(Cout, 1).astype(jnp.float32)     # fold "1 + v4"
    masks = jnp.tile(jnp.asarray(_tap_masks(H, W, K)), (1, B))  # (KK, LB) constant

    kernel = _make_fused_kernel(H, W, K, Cin, Cout, LB, KKC)

    out_flat = pl.pallas_call(
        kernel,
        out_shape=jax.ShapeDtypeStruct((G, 2 * Cout, LB), x_nchw.dtype),
        grid=(G,),
        in_specs=[
            pl.BlockSpec((1, Cin, LB), lambda n: (n, 0, 0)),       # x (B images / step)
            pl.BlockSpec((KK, LB), lambda n: (0, 0)),              # boundary masks
            pl.BlockSpec((Cout, KKC), lambda n: (0, 0)),           # w1 (bf16 matmul matrix)
            pl.BlockSpec((Cout, 1), lambda n: (0, 0)),             # b1
            pl.BlockSpec((Cout, KKC), lambda n: (0, 0)),           # w2 (bf16)
            pl.BlockSpec((Cout, 1), lambda n: (0, 0)),             # b2 + 1
        ],
        out_specs=pl.BlockSpec((1, 2 * Cout, LB), lambda n: (n, 0, 0)),
        scratch_shapes=[pltpu.VMEM((KKC, LB), jnp.bfloat16)],      # im2col patch matrix
        compiler_params=pltpu.CompilerParams(
            dimension_semantics=("parallel",)),
    )(x_g, masks, w1_mat, b1c, w2_mat, b2c)

    # (G, 2*Cout, B*HW) -> (N, 2*Cout, H, W): undo the lane-batching.
    out = jnp.transpose(out_flat.reshape(G, 2 * Cout, B, HW), (0, 2, 1, 3))
    return out.reshape(Np, 2 * Cout, H, W)[:N]


def init_conv_params(key, cin, cout, k):
    """Deterministic PyTorch-style Conv2d init; returns OIHW weight + bias."""
    kw, kb = jax.random.split(key)
    fan_in = cin * k * k
    bound = 1.0 / np.sqrt(fan_in)
    w = jax.random.uniform(kw, (cout, cin, k, k), jnp.float32, -bound, bound)
    b = jax.random.uniform(kb, (cout,), jnp.float32, -bound, bound)
    return w, b


def reference_forward(x_nchw, w1, b1, w2, b2):
    """Pure-JAX reference (lax conv, NCHW) for a sanity check."""
    pad = (w1.shape[2] - 1) // 2

    def conv(x, w, b):
        y = jax.lax.conv_general_dilated(
            x, w, window_strides=(1, 1), padding=((pad, pad), (pad, pad)),
            dimension_numbers=("NCHW", "OIHW", "NCHW"),
            precision=jax.lax.Precision.HIGHEST)
        return y + b[None, :, None, None]

    v2 = conv(x_nchw, w1, b1) + x_nchw
    v3 = jnp.maximum(v2, 0.0)
    v5 = 1.0 + conv(v3, w2, b2)
    return jnp.concatenate([v2, v5], axis=1)


if __name__ == "__main__":
    key = jax.random.PRNGKey(0)
    kx, k1, k2 = jax.random.split(key, 3)

    N, C, H, W = 2, 16, 16, 16            # conv layers require 16 input channels
    x = jax.random.normal(kx, (N, C, H, W), jnp.float32)

    w1, b1 = init_conv_params(k1, C, C, 7)
    w2, b2 = init_conv_params(k2, C, C, 7)

    out = jax.block_until_ready(model_forward(x, w1, b1, w2, b2))
    assert out.shape == (N, 2 * C, H, W), out.shape

    ref = reference_forward(x, w1, b1, w2, b2)
    max_err = float(jnp.max(jnp.abs(out - ref)))
    assert jnp.allclose(out, ref, rtol=2e-2, atol=3e-2), max_err

    print("KERNEL_OK")
</pallas_src>

<mosaic_0001>
module attributes {stable_mosaic.version = 11 : i64} {
  func.func @kernel(%arg0: i32, %arg1: memref<1x16x256xf32, #tpu.memory_space<vmem>>, %arg2: memref<49x256xf32, #tpu.memory_space<vmem>>, %arg3: memref<16x784xbf16, #tpu.memory_space<vmem>>, %arg4: memref<16x1xf32, #tpu.memory_space<vmem>>, %arg5: memref<16x784xbf16, #tpu.memory_space<vmem>>, %arg6: memref<16x1xf32, #tpu.memory_space<vmem>>, %arg7: memref<1x32x256xf32, #tpu.memory_space<vmem>>, %arg8: memref<784x256xbf16, #tpu.memory_space<vmem>>) attributes {dimension_semantics = [#tpu.dimension_semantics<parallel>], iteration_bounds = array<i64: 2>, scalar_prefetch = 0 : i64, scratch_operands = 1 : i64, tpu.core_type = #tpu.core_type<tc>, window_params = [{transform_indices = @transform_0, window_bounds = array<i64: 1, 16, 256>}, {pipeline_mode = #tpu.pipeline_mode<synchronous>, transform_indices = @transform_1, window_bounds = array<i64: 49, 256>}, {pipeline_mode = #tpu.pipeline_mode<synchronous>, transform_indices = @transform_2, window_bounds = array<i64: 16, 784>}, {pipeline_mode = #tpu.pipeline_mode<synchronous>, transform_indices = @transform_3, window_bounds = array<i64: 16, 1>}, {pipeline_mode = #tpu.pipeline_mode<synchronous>, transform_indices = @transform_4, window_bounds = array<i64: 16, 784>}, {pipeline_mode = #tpu.pipeline_mode<synchronous>, transform_indices = @transform_5, window_bounds = array<i64: 16, 1>}, {transform_indices = @transform_6, window_bounds = array<i64: 1, 32, 256>}]} {
    %c0 = arith.constant 0 : index
    %c0_0 = arith.constant 0 : index
    %c0_1 = arith.constant 0 : index
    %0 = vector.load %arg1[%c0, %c0_0, %c0_1] : memref<1x16x256xf32, #tpu.memory_space<vmem>>, vector<1x16x256xf32>
    %1 = vector.shape_cast %0 : vector<1x16x256xf32> to vector<16x256xf32>
    %c51_i32 = arith.constant 51 : i32
    %2 = tpu.dynamic_rotate %1 by %c51_i32 dim 1 : vector<16x256xf32>, i32 -> vector<16x256xf32>
    %c0_2 = arith.constant 0 : index
    %c0_3 = arith.constant 0 : index
    %3 = vector.load %arg2[%c0_2, %c0_3] : memref<49x256xf32, #tpu.memory_space<vmem>>, vector<1x256xf32>
    %4 = vector.broadcast %3 : vector<1x256xf32> to vector<16x256xf32>
    %5 = arith.mulf %2, %4 : vector<16x256xf32>
    %6 = arith.truncf %5 : vector<16x256xf32> to vector<16x256xbf16>
    %c0_4 = arith.constant 0 : index
    %c0_5 = arith.constant 0 : index
    %7 = vector.load %arg8[%c0_4, %c0_5] : memref<784x256xbf16, #tpu.memory_space<vmem>>, vector<16x256xbf16>
    tpu.vector_store %arg8[%c0_4, %c0_5], %6 {strides = array<i32>} : memref<784x256xbf16, #tpu.memory_space<vmem>>, vector<16x256xbf16>,
    %c50_i32 = arith.constant 50 : i32
    %8 = tpu.dynamic_rotate %1 by %c50_i32 dim 1 : vector<16x256xf32>, i32 -> vector<16x256xf32>
    %c1 = arith.constant 1 : index
    %c0_6 = arith.constant 0 : index
    %9 = vector.load %arg2[%c1, %c0_6] : memref<49x256xf32, #tpu.memory_space<vmem>>, vector<1x256xf32>
    %10 = vector.broadcast %9 : vector<1x256xf32> to vector<16x256xf32>
    %11 = arith.mulf %8, %10 : vector<16x256xf32>
    %12 = arith.truncf %11 : vector<16x256xf32> to vector<16x256xbf16>
    %c16 = arith.constant 16 : index
    %c0_7 = arith.constant 0 : index
    %13 = vector.load %arg8[%c16, %c0_7] : memref<784x256xbf16, #tpu.memory_space<vmem>>, vector<16x256xbf16>
    tpu.vector_store %arg8[%c16, %c0_7], %12 {strides = array<i32>} : memref<784x256xbf16, #tpu.memory_space<vmem>>, vector<16x256xbf16>,
    %c49_i32 = arith.constant 49 : i32
    %14 = tpu.dynamic_rotate %1 by %c49_i32 dim 1 : vector<16x256xf32>, i32 -> vector<16x256xf32>
    %c2 = arith.constant 2 : index
    %c0_8 = arith.constant 0 : index
    %15 = vector.load %arg2[%c2, %c0_8] : memref<49x256xf32, #tpu.memory_space<vmem>>, vector<1x256xf32>
    %16 = vector.broadcast %15 : vector<1x256xf32> to vector<16x256xf32>
    %17 = arith.mulf %14, %16 : vector<16x256xf32>
    %18 = arith.truncf %17 : vector<16x256xf32> to vector<16x256xbf16>
    %c32 = arith.constant 32 : index
    %c0_9 = arith.constant 0 : index
    %19 = vector.load %arg8[%c32, %c0_9] : memref<784x256xbf16, #tpu.memory_space<vmem>>, vector<16x256xbf16>
    tpu.vector_store %arg8[%c32, %c0_9], %18 {strides = array<i32>} : memref<784x256xbf16, #tpu.memory_space<vmem>>, vector<16x256xbf16>,
    %c48_i32 = arith.constant 48 : i32
    %20 = tpu.dynamic_rotate %1 by %c48_i32 dim 1 : vector<16x256xf32>, i32 -> vector<16x256xf32>
    %c3 = arith.constant 3 : index
    %c0_10 = arith.constant 0 : index
    %21 = vector.load %arg2[%c3, %c0_10] : memref<49x256xf32, #tpu.memory_space<vmem>>, vector<1x256xf32>
    %22 = vector.broadcast %21 : vector<1x256xf32> to vector<16x256xf32>
    %23 = arith.mulf %20, %22 : vector<16x256xf32>
    %24 = arith.truncf %23 : vector<16x256xf32> to vector<16x256xbf16>
    %c48 = arith.constant 48 : index
    %c0_11 = arith.constant 0 : index
    %25 = vector.load %arg8[%c48, %c0_11] : memref<784x256xbf16, #tpu.memory_space<vmem>>, vector<16x256xbf16>
    tpu.vector_store %arg8[%c48, %c0_11], %24 {strides = array<i32>} : memref<784x256xbf16, #tpu.memory_space<vmem>>, vector<16x256xbf16>,
    %c47_i32 = arith.constant 47 : i32
    %26 = tpu.dynamic_rotate %1 by %c47_i32 dim 1 : vector<16x256xf32>, i32 -> vector<16x256xf32>
    %c4 = arith.constant 4 : index
    %c0_12 = arith.constant 0 : index
    %27 = vector.load %arg2[%c4, %c0_12] : memref<49x256xf32, #tpu.memory_space<vmem>>, vector<1x256xf32>
    %28 = vector.broadcast %27 : vector<1x256xf32> to vector<16x256xf32>
    %29 = arith.mulf %26, %28 : vector<16x256xf32>
    %30 = arith.truncf %29 : vector<16x256xf32> to vector<16x256xbf16>
    %c64 = arith.constant 64 : index
    %c0_13 = arith.constant 0 : index
    %31 = vector.load %arg8[%c64, %c0_13] : memref<784x256xbf16, #tpu.memory_space<vmem>>, vector<16x256xbf16>
    tpu.vector_store %arg8[%c64, %c0_13], %30 {strides = array<i32>} : memref<784x256xbf16, #tpu.memory_space<vmem>>, vector<16x256xbf16>,
    %c46_i32 = arith.constant 46 : i32
    %32 = tpu.dynamic_rotate %1 by %c46_i32 dim 1 : vector<16x256xf32>, i32 -> vector<16x256xf32>
    %c5 = arith.constant 5 : index
    %c0_14 = arith.constant 0 : index
    %33 = vector.load %arg2[%c5, %c0_14] : memref<49x256xf32, #tpu.memory_space<vmem>>, vector<1x256xf32>
    %34 = vector.broadcast %33 : vector<1x256xf32> to vector<16x256xf32>
    %35 = arith.mulf %32, %34 : vector<16x256xf32>
    %36 = arith.truncf %35 : vector<16x256xf32> to vector<16x256xbf16>
    %c80 = arith.constant 80 : index
    %c0_15 = arith.constant 0 : index
    %37 = vector.load %arg8[%c80, %c0_15] : memref<784x256xbf16, #tpu.memory_space<vmem>>, vector<16x256xbf16>
    tpu.vector_store %arg8[%c80, %c0_15], %36 {strides = array<i32>} : memref<784x256xbf16, #tpu.memory_space<vmem>>, vector<16x256xbf16>,
    %c45_i32 = arith.constant 45 : i32
    %38 = tpu.dynamic_rotate %1 by %c45_i32 dim 1 : vector<16x256xf32>, i32 -> vector<16x256xf32>
    %c6 = arith.constant 6 : index
    %c0_16 = arith.constant 0 : index
    %39 = vector.load %arg2[%c6, %c0_16] : memref<49x256xf32, #tpu.memory_space<vmem>>, vector<1x256xf32>
    %40 = vector.broadcast %39 : vector<1x256xf32> to vector<16x256xf32>
    %41 = arith.mulf %38, %40 : vector<16x256xf32>
    %42 = arith.truncf %41 : vector<16x256xf32> to vector<16x256xbf16>
    %c96 = arith.constant 96 : index
    %c0_17 = arith.constant 0 : index
    %43 = vector.load %arg8[%c96, %c0_17] : memref<784x256xbf16, #tpu.memory_space<vmem>>, vector<16x256xbf16>
    tpu.vector_store %arg8[%c96, %c0_17], %42 {strides = array<i32>} : memref<784x256xbf16, #tpu.memory_space<vmem>>, vector<16x256xbf16>,
    %c35_i32 = arith.constant 35 : i32
    %44 = tpu.dynamic_rotate %1 by %c35_i32 dim 1 : vector<16x256xf32>, i32 -> vector<16x256xf32>
    %c7 = arith.constant 7 : index
    %c0_18 = arith.constant 0 : index
    %45 = vector.load %arg2[%c7, %c0_18] : memref<49x256xf32, #tpu.memory_space<vmem>>, vector<1x256xf32>
    %46 = vector.broadcast %45 : vector<1x256xf32> to vector<16x256xf32>
    %47 = arith.mulf %44, %46 : vector<16x256xf32>
    %48 = arith.truncf %47 : vector<16x256xf32> to vector<16x256xbf16>
    %c112 = arith.constant 112 : index
    %c0_19 = arith.constant 0 : index
    %49 = vector.load %arg8[%c112, %c0_19] : memref<784x256xbf16, #tpu.memory_space<vmem>>, vector<16x256xbf16>
    tpu.vector_store %arg8[%c112, %c0_19], %48 {strides = array<i32>} : memref<784x256xbf16, #tpu.memory_space<vmem>>, vector<16x256xbf16>,
    %c34_i32 = arith.constant 34 : i32
    %50 = tpu.dynamic_rotate %1 by %c34_i32 dim 1 : vector<16x256xf32>, i32 -> vector<16x256xf32>
    %c8 = arith.constant 8 : index
    %c0_20 = arith.constant 0 : index
    %51 = vector.load %arg2[%c8, %c0_20] : memref<49x256xf32, #tpu.memory_space<vmem>>, vector<1x256xf32>
    %52 = vector.broadcast %51 : vector<1x256xf32> to vector<16x256xf32>
    %53 = arith.mulf %50, %52 : vector<16x256xf32>
    %54 = arith.truncf %53 : vector<16x256xf32> to vector<16x256xbf16>
    %c128 = arith.constant 128 : index
    %c0_21 = arith.constant 0 : index
    %55 = vector.load %arg8[%c128, %c0_21] : memref<784x256xbf16, #tpu.memory_space<vmem>>, vector<16x256xbf16>
    tpu.vector_store %arg8[%c128, %c0_21], %54 {strides = array<i32>} : memref<784x256xbf16, #tpu.memory_space<vmem>>, vector<16x256xbf16>,
    %c33_i32 = arith.constant 33 : i32
    %56 = tpu.dynamic_rotate %1 by %c33_i32 dim 1 : vector<16x256xf32>, i32 -> vector<16x256xf32>
    %c9 = arith.constant 9 : index
    %c0_22 = arith.constant 0 : index
    %57 = vector.load %arg2[%c9, %c0_22] : memref<49x256xf32, #tpu.memory_space<vmem>>, vector<1x256xf32>
    %58 = vector.broadcast %57 : vector<1x256xf32> to vector<16x256xf32>
    %59 = arith.mulf %56, %58 : vector<16x256xf32>
    %60 = arith.truncf %59 : vector<16x256xf32> to vector<16x256xbf16>
    %c144 = arith.constant 144 : index
    %c0_23 = arith.constant 0 : index
    %61 = vector.load %arg8[%c144, %c0_23] : memref<784x256xbf16, #tpu.memory_space<vmem>>, vector<16x256xbf16>
    tpu.vector_store %arg8[%c144, %c0_23], %60 {strides = array<i32>} : memref<784x256xbf16, #tpu.memory_space<vmem>>, vector<16x256xbf16>,
    %c32_i32 = arith.constant 32 : i32
    %62 = tpu.dynamic_rotate %1 by %c32_i32 dim 1 : vector<16x256xf32>, i32 -> vector<16x256xf32>
    %c10 = arith.constant 10 : index
    %c0_24 = arith.constant 0 : index
    %63 = vector.load %arg2[%c10, %c0_24] : memref<49x256xf32, #tpu.memory_space<vmem>>, vector<1x256xf32>
    %64 = vector.broadcast %63 : vector<1x256xf32> to vector<16x256xf32>
    %65 = arith.mulf %62, %64 : vector<16x256xf32>
    %66 = arith.truncf %65 : vector<16x256xf32> to vector<16x256xbf16>
    %c160 = arith.constant 160 : index
    %c0_25 = arith.constant 0 : index
    %67 = vector.load %arg8[%c160, %c0_25] : memref<784x256xbf16, #tpu.memory_space<vmem>>, vector<16x256xbf16>
    tpu.vector_store %arg8[%c160, %c0_25], %66 {strides = array<i32>} : memref<784x256xbf16, #tpu.memory_space<vmem>>, vector<16x256xbf16>,
    %c31_i32 = arith.constant 31 : i32
    %68 = tpu.dynamic_rotate %1 by %c31_i32 dim 1 : vector<16x256xf32>, i32 -> vector<16x256xf32>
    %c11 = arith.constant 11 : index
    %c0_26 = arith.constant 0 : index
    %69 = vector.load %arg2[%c11, %c0_26] : memref<49x256xf32, #tpu.memory_space<vmem>>, vector<1x256xf32>
    %70 = vector.broadcast %69 : vector<1x256xf32> to vector<16x256xf32>
    %71 = arith.mulf %68, %70 : vector<16x256xf32>
    %72 = arith.truncf %71 : vector<16x256xf32> to vector<16x256xbf16>
    %c176 = arith.constant 176 : index
    %c0_27 = arith.constant 0 : index
    %73 = vector.load %arg8[%c176, %c0_27] : memref<784x256xbf16, #tpu.memory_space<vmem>>, vector<16x256xbf16>
    tpu.vector_store %arg8[%c176, %c0_27], %72 {strides = array<i32>} : memref<784x256xbf16, #tpu.memory_space<vmem>>, vector<16x256xbf16>,
    %c30_i32 = arith.constant 30 : i32
    %74 = tpu.dynamic_rotate %1 by %c30_i32 dim 1 : vector<16x256xf32>, i32 -> vector<16x256xf32>
    %c12 = arith.constant 12 : index
    %c0_28 = arith.constant 0 : index
    %75 = vector.load %arg2[%c12, %c0_28] : memref<49x256xf32, #tpu.memory_space<vmem>>, vector<1x256xf32>
    %76 = vector.broadcast %75 : vector<1x256xf32> to vector<16x256xf32>
    %77 = arith.mulf %74, %76 : vector<16x256xf32>
    %78 = arith.truncf %77 : vector<16x256xf32> to vector<16x256xbf16>
    %c192 = arith.constant 192 : index
    %c0_29 = arith.constant 0 : index
    %79 = vector.load %arg8[%c192, %c0_29] : memref<784x256xbf16, #tpu.memory_space<vmem>>, vector<16x256xbf16>
    tpu.vector_store %arg8[%c192, %c0_29], %78 {strides = array<i32>} : memref<784x256xbf16, #tpu.memory_space<vmem>>, vector<16x256xbf16>,
    %c29_i32 = arith.constant 29 : i32
    %80 = tpu.dynamic_rotate %1 by %c29_i32 dim 1 : vector<16x256xf32>, i32 -> vector<16x256xf32>
    %c13 = arith.constant 13 : index
    %c0_30 = arith.constant 0 : index
    %81 = vector.load %arg2[%c13, %c0_30] : memref<49x256xf32, #tpu.memory_space<vmem>>, vector<1x256xf32>
    %82 = vector.broadcast %81 : vector<1x256xf32> to vector<16x256xf32>
    %83 = arith.mulf %80, %82 : vector<16x256xf32>
    %84 = arith.truncf %83 : vector<16x256xf32> to vector<16x256xbf16>
    %c208 = arith.constant 208 : index
    %c0_31 = arith.constant 0 : index
    %85 = vector.load %arg8[%c208, %c0_31] : memref<784x256xbf16, #tpu.memory_space<vmem>>, vector<16x256xbf16>
    tpu.vector_store %arg8[%c208, %c0_31], %84 {strides = array<i32>} : memref<784x256xbf16, #tpu.memory_space<vmem>>, vector<16x256xbf16>,
    %c19_i32 = arith.constant 19 : i32
    %86 = tpu.dynamic_rotate %1 by %c19_i32 dim 1 : vector<16x256xf32>, i32 -> vector<16x256xf32>
    %c14 = arith.constant 14 : index
    %c0_32 = arith.constant 0 : index
    %87 = vector.load %arg2[%c14, %c0_32] : memref<49x256xf32, #tpu.memory_space<vmem>>, vector<1x256xf32>
    %88 = vector.broadcast %87 : vector<1x256xf32> to vector<16x256xf32>
    %89 = arith.mulf %86, %88 : vector<16x256xf32>
    %90 = arith.truncf %89 : vector<16x256xf32> to vector<16x256xbf16>
    %c224 = arith.constant 224 : index
    %c0_33 = arith.constant 0 : index
    %91 = vector.load %arg8[%c224, %c0_33] : memref<784x256xbf16, #tpu.memory_space<vmem>>, vector<16x256xbf16>
    tpu.vector_store %arg8[%c224, %c0_33], %90 {strides = array<i32>} : memref<784x256xbf16, #tpu.memory_space<vmem>>, vector<16x256xbf16>,
    %c18_i32 = arith.constant 18 : i32
    %92 = tpu.dynamic_rotate %1 by %c18_i32 dim 1 : vector<16x256xf32>, i32 -> vector<16x256xf32>
    %c15 = arith.constant 15 : index
    %c0_34 = arith.constant 0 : index
    %93 = vector.load %arg2[%c15, %c0_34] : memref<49x256xf32, #tpu.memory_space<vmem>>, vector<1x256xf32>
    %94 = vector.broadcast %93 : vector<1x256xf32> to vector<16x256xf32>
    %95 = arith.mulf %92, %94 : vector<16x256xf32>
    %96 = arith.truncf %95 : vector<16x256xf32> to vector<16x256xbf16>
    %c240 = arith.constant 240 : index
    %c0_35 = arith.constant 0 : index
    %97 = vector.load %arg8[%c240, %c0_35] : memref<784x256xbf16, #tpu.memory_space<vmem>>, vector<16x256xbf16>
    tpu.vector_store %arg8[%c240, %c0_35], %96 {strides = array<i32>} : memref<784x256xbf16, #tpu.memory_space<vmem>>, vector<16x256xbf16>,
    %c17_i32 = arith.constant 17 : i32
    %98 = tpu.dynamic_rotate %1 by %c17_i32 dim 1 : vector<16x256xf32>, i32 -> vector<16x256xf32>
    %c16_36 = arith.constant 16 : index
    %c0_37 = arith.constant 0 : index
    %99 = vector.load %arg2[%c16_36, %c0_37] : memref<49x256xf32, #tpu.memory_space<vmem>>, vector<1x256xf32>
    %100 = vector.broadcast %99 : vector<1x256xf32> to vector<16x256xf32>
    %101 = arith.mulf %98, %100 : vector<16x256xf32>
    %102 = arith.truncf %101 : vector<16x256xf32> to vector<16x256xbf16>
    %c256 = arith.constant 256 : index
    %c0_38 = arith.constant 0 : index
    %103 = vector.load %arg8[%c256, %c0_38] : memref<784x256xbf16, #tpu.memory_space<vmem>>, vector<16x256xbf16>
    tpu.vector_store %arg8[%c256, %c0_38], %102 {strides = array<i32>} : memref<784x256xbf16, #tpu.memory_space<vmem>>, vector<16x256xbf16>,
    %c16_i32 = arith.constant 16 : i32
    %104 = tpu.dynamic_rotate %1 by %c16_i32 dim 1 : vector<16x256xf32>, i32 -> vector<16x256xf32>
    %c17 = arith.constant 17 : index
    %c0_39 = arith.constant 0 : index
    %105 = vector.load %arg2[%c17, %c0_39] : memref<49x256xf32, #tpu.memory_space<vmem>>, vector<1x256xf32>
    %106 = vector.broadcast %105 : vector<1x256xf32> to vector<16x256xf32>
    %107 = arith.mulf %104, %106 : vector<16x256xf32>
    %108 = arith.truncf %107 : vector<16x256xf32> to vector<16x256xbf16>
    %c272 = arith.constant 272 : index
    %c0_40 = arith.constant 0 : index
    %109 = vector.load %arg8[%c272, %c0_40] : memref<784x256xbf16, #tpu.memory_space<vmem>>, vector<16x256xbf16>
    tpu.vector_store %arg8[%c272, %c0_40], %108 {strides = array<i32>} : memref<784x256xbf16, #tpu.memory_space<vmem>>, vector<16x256xbf16>,
    %c15_i32 = arith.constant 15 : i32
    %110 = tpu.dynamic_rotate %1 by %c15_i32 dim 1 : vector<16x256xf32>, i32 -> vector<16x256xf32>
    %c18 = arith.constant 18 : index
    %c0_41 = arith.constant 0 : index
    %111 = vector.load %arg2[%c18, %c0_41] : memref<49x256xf32, #tpu.memory_space<vmem>>, vector<1x256xf32>
    %112 = vector.broadcast %111 : vector<1x256xf32> to vector<16x256xf32>
    %113 = arith.mulf %110, %112 : vector<16x256xf32>
    %114 = arith.truncf %113 : vector<16x256xf32> to vector<16x256xbf16>
    %c288 = arith.constant 288 : index
    %c0_42 = arith.constant 0 : index
    %115 = vector.load %arg8[%c288, %c0_42] : memref<784x256xbf16, #tpu.memory_space<vmem>>, vector<16x256xbf16>
    tpu.vector_store %arg8[%c288, %c0_42], %114 {strides = array<i32>} : memref<784x256xbf16, #tpu.memory_space<vmem>>, vector<16x256xbf16>,
    %c14_i32 = arith.constant 14 : i32
    %116 = tpu.dynamic_rotate %1 by %c14_i32 dim 1 : vector<16x256xf32>, i32 -> vector<16x256xf32>
    %c19 = arith.constant 19 : index
    %c0_43 = arith.constant 0 : index
    %117 = vector.load %arg2[%c19, %c0_43] : memref<49x256xf32, #tpu.memory_space<vmem>>, vector<1x256xf32>
    %118 = vector.broadcast %117 : vector<1x256xf32> to vector<16x256xf32>
    %119 = arith.mulf %116, %118 : vector<16x256xf32>
    %120 = arith.truncf %119 : vector<16x256xf32> to vector<16x256xbf16>
    %c304 = arith.constant 304 : index
    %c0_44 = arith.constant 0 : index
    %121 = vector.load %arg8[%c304, %c0_44] : memref<784x256xbf16, #tpu.memory_space<vmem>>, vector<16x256xbf16>
    tpu.vector_store %arg8[%c304, %c0_44], %120 {strides = array<i32>} : memref<784x256xbf16, #tpu.memory_space<vmem>>, vector<16x256xbf16>,
    %c13_i32 = arith.constant 13 : i32
    %122 = tpu.dynamic_rotate %1 by %c13_i32 dim 1 : vector<16x256xf32>, i32 -> vector<16x256xf32>
    %c20 = arith.constant 20 : index
    %c0_45 = arith.constant 0 : index
    %123 = vector.load %arg2[%c20, %c0_45] : memref<49x256xf32, #tpu.memory_space<vmem>>, vector<1x256xf32>
    %124 = vector.broadcast %123 : vector<1x256xf32> to vector<16x256xf32>
    %125 = arith.mulf %122, %124 : vector<16x256xf32>
    %126 = arith.truncf %125 : vector<16x256xf32> to vector<16x256xbf16>
    %c320 = arith.constant 320 : index
    %c0_46 = arith.constant 0 : index
    %127 = vector.load %arg8[%c320, %c0_46] : memref<784x256xbf16, #tpu.memory_space<vmem>>, vector<16x256xbf16>
    tpu.vector_store %arg8[%c320, %c0_46], %126 {strides = array<i32>} : memref<784x256xbf16, #tpu.memory_space<vmem>>, vector<16x256xbf16>,
    %c3_i32 = arith.constant 3 : i32
    %128 = tpu.dynamic_rotate %1 by %c3_i32 dim 1 : vector<16x256xf32>, i32 -> vector<16x256xf32>
    %c21 = arith.constant 21 : index
    %c0_47 = arith.constant 0 : index
    %129 = vector.load %arg2[%c21, %c0_47] : memref<49x256xf32, #tpu.memory_space<vmem>>, vector<1x256xf32>
    %130 = vector.broadcast %129 : vector<1x256xf32> to vector<16x256xf32>
    %131 = arith.mulf %128, %130 : vector<16x256xf32>
    %132 = arith.truncf %131 : vector<16x256xf32> to vector<16x256xbf16>
    %c336 = arith.constant 336 : index
    %c0_48 = arith.constant 0 : index
    %133 = vector.load %arg8[%c336, %c0_48] : memref<784x256xbf16, #tpu.memory_space<vmem>>, vector<16x256xbf16>
    tpu.vector_store %arg8[%c336, %c0_48], %132 {strides = array<i32>} : memref<784x256xbf16, #tpu.memory_space<vmem>>, vector<16x256xbf16>,
    %c2_i32 = arith.constant 2 : i32
    %134 = tpu.dynamic_rotate %1 by %c2_i32 dim 1 : vector<16x256xf32>, i32 -> vector<16x256xf32>
    %c22 = arith.constant 22 : index
    %c0_49 = arith.constant 0 : index
    %135 = vector.load %arg2[%c22, %c0_49] : memref<49x256xf32, #tpu.memory_space<vmem>>, vector<1x256xf32>
    %136 = vector.broadcast %135 : vector<1x256xf32> to vector<16x256xf32>
    %137 = arith.mulf %134, %136 : vector<16x256xf32>
    %138 = arith.truncf %137 : vector<16x256xf32> to vector<16x256xbf16>
    %c352 = arith.constant 352 : index
    %c0_50 = arith.constant 0 : index
    %139 = vector.load %arg8[%c352, %c0_50] : memref<784x256xbf16, #tpu.memory_space<vmem>>, vector<16x256xbf16>
    tpu.vector_store %arg8[%c352, %c0_50], %138 {strides = array<i32>} : memref<784x256xbf16, #tpu.memory_space<vmem>>, vector<16x256xbf16>,
    %c1_i32 = arith.constant 1 : i32
    %140 = tpu.dynamic_rotate %1 by %c1_i32 dim 1 : vector<16x256xf32>, i32 -> vector<16x256xf32>
    %c23 = arith.constant 23 : index
    %c0_51 = arith.constant 0 : index
    %141 = vector.load %arg2[%c23, %c0_51] : memref<49x256xf32, #tpu.memory_space<vmem>>, vector<1x256xf32>
    %142 = vector.broadcast %141 : vector<1x256xf32> to vector<16x256xf32>
    %143 = arith.mulf %140, %142 : vector<16x256xf32>
    %144 = arith.truncf %143 : vector<16x256xf32> to vector<16x256xbf16>
    %c368 = arith.constant 368 : index
    %c0_52 = arith.constant 0 : index
    %145 = vector.load %arg8[%c368, %c0_52] : memref<784x256xbf16, #tpu.memory_space<vmem>>, vector<16x256xbf16>
    tpu.vector_store %arg8[%c368, %c0_52], %144 {strides = array<i32>} : memref<784x256xbf16, #tpu.memory_space<vmem>>, vector<16x256xbf16>,
    %146 = arith.truncf %1 : vector<16x256xf32> to vector<16x256xbf16>
    %c384 = arith.constant 384 : index
    %c0_53 = arith.constant 0 : index
    %147 = vector.load %arg8[%c384, %c0_53] : memref<784x256xbf16, #tpu.memory_space<vmem>>, vector<16x256xbf16>
    tpu.vector_store %arg8[%c384, %c0_53], %146 {strides = array<i32>} : memref<784x256xbf16, #tpu.memory_space<vmem>>, vector<16x256xbf16>,
    %c255_i32 = arith.constant 255 : i32
    %148 = tpu.dynamic_rotate %1 by %c255_i32 dim 1 : vector<16x256xf32>, i32 -> vector<16x256xf32>
    %c25 = arith.constant 25 : index
    %c0_54 = arith.constant 0 : index
    %149 = vector.load %arg2[%c25, %c0_54] : memref<49x256xf32, #tpu.memory_space<vmem>>, vector<1x256xf32>
    %150 = vector.broadcast %149 : vector<1x256xf32> to vector<16x256xf32>
    %151 = arith.mulf %148, %150 : vector<16x256xf32>
    %152 = arith.truncf %151 : vector<16x256xf32> to vector<16x256xbf16>
    %c400 = arith.constant 400 : index
    %c0_55 = arith.constant 0 : index
    %153 = vector.load %arg8[%c400, %c0_55] : memref<784x256xbf16, #tpu.memory_space<vmem>>, vector<16x256xbf16>
    tpu.vector_store %arg8[%c400, %c0_55], %152 {strides = array<i32>} : memref<784x256xbf16, #tpu.memory_space<vmem>>, vector<16x256xbf16>,
    %c254_i32 = arith.constant 254 : i32
    %154 = tpu.dynamic_rotate %1 by %c254_i32 dim 1 : vector<16x256xf32>, i32 -> vector<16x256xf32>
    %c26 = arith.constant 26 : index
    %c0_56 = arith.constant 0 : index
    %155 = vector.load %arg2[%c26, %c0_56] : memref<49x256xf32, #tpu.memory_space<vmem>>, vector<1x256xf32>
    %156 = vector.broadcast %155 : vector<1x256xf32> to vector<16x256xf32>
    %157 = arith.mulf %154, %156 : vector<16x256xf32>
    %158 = arith.truncf %157 : vector<16x256xf32> to vector<16x256xbf16>
    %c416 = arith.constant 416 : index
    %c0_57 = arith.constant 0 : index
    %159 = vector.load %arg8[%c416, %c0_57] : memref<784x256xbf16, #tpu.memory_space<vmem>>, vector<16x256xbf16>
    tpu.vector_store %arg8[%c416, %c0_57], %158 {strides = array<i32>} : memref<784x256xbf16, #tpu.memory_space<vmem>>, vector<16x256xbf16>,
    %c253_i32 = arith.constant 253 : i32
    %160 = tpu.dynamic_rotate %1 by %c253_i32 dim 1 : vector<16x256xf32>, i32 -> vector<16x256xf32>
    %c27 = arith.constant 27 : index
    %c0_58 = arith.constant 0 : index
    %161 = vector.load %arg2[%c27, %c0_58] : memref<49x256xf32, #tpu.memory_space<vmem>>, vector<1x256xf32>
    %162 = vector.broadcast %161 : vector<1x256xf32> to vector<16x256xf32>
    %163 = arith.mulf %160, %162 : vector<16x256xf32>
    %164 = arith.truncf %163 : vector<16x256xf32> to vector<16x256xbf16>
    %c432 = arith.constant 432 : index
    %c0_59 = arith.constant 0 : index
    %165 = vector.load %arg8[%c432, %c0_59] : memref<784x256xbf16, #tpu.memory_space<vmem>>, vector<16x256xbf16>
    tpu.vector_store %arg8[%c432, %c0_59], %164 {strides = array<i32>} : memref<784x256xbf16, #tpu.memory_space<vmem>>, vector<16x256xbf16>,
    %c243_i32 = arith.constant 243 : i32
    %166 = tpu.dynamic_rotate %1 by %c243_i32 dim 1 : vector<16x256xf32>, i32 -> vector<16x256xf32>
    %c28 = arith.constant 28 : index
    %c0_60 = arith.constant 0 : index
    %167 = vector.load %arg2[%c28, %c0_60] : memref<49x256xf32, #tpu.memory_space<vmem>>, vector<1x256xf32>
    %168 = vector.broadcast %167 : vector<1x256xf32> to vector<16x256xf32>
    %169 = arith.mulf %166, %168 : vector<16x256xf32>
    %170 = arith.truncf %169 : vector<16x256xf32> to vector<16x256xbf16>
    %c448 = arith.constant 448 : index
    %c0_61 = arith.constant 0 : index
    %171 = vector.load %arg8[%c448, %c0_61] : memref<784x256xbf16, #tpu.memory_space<vmem>>, vector<16x256xbf16>
    tpu.vector_store %arg8[%c448, %c0_61], %170 {strides = array<i32>} : memref<784x256xbf16, #tpu.memory_space<vmem>>, vector<16x256xbf16>,
    %c242_i32 = arith.constant 242 : i32
    %172 = tpu.dynamic_rotate %1 by %c242_i32 dim 1 : vector<16x256xf32>, i32 -> vector<16x256xf32>
    %c29 = arith.constant 29 : index
    %c0_62 = arith.constant 0 : index
    %173 = vector.load %arg2[%c29, %c0_62] : memref<49x256xf32, #tpu.memory_space<vmem>>, vector<1x256xf32>
    %174 = vector.broadcast %173 : vector<1x256xf32> to vector<16x256xf32>
    %175 = arith.mulf %172, %174 : vector<16x256xf32>
    %176 = arith.truncf %175 : vector<16x256xf32> to vector<16x256xbf16>
    %c464 = arith.constant 464 : index
    %c0_63 = arith.constant 0 : index
    %177 = vector.load %arg8[%c464, %c0_63] : memref<784x256xbf16, #tpu.memory_space<vmem>>, vector<16x256xbf16>
    tpu.vector_store %arg8[%c464, %c0_63], %176 {strides = array<i32>} : memref<784x256xbf16, #tpu.memory_space<vmem>>, vector<16x256xbf16>,
    %c241_i32 = arith.constant 241 : i32
    %178 = tpu.dynamic_rotate %1 by %c241_i32 dim 1 : vector<16x256xf32>, i32 -> vector<16x256xf32>
    %c30 = arith.constant 30 : index
    %c0_64 = arith.constant 0 : index
    %179 = vector.load %arg2[%c30, %c0_64] : memref<49x256xf32, #tpu.memory_space<vmem>>, vector<1x256xf32>
    %180 = vector.broadcast %179 : vector<1x256xf32> to vector<16x256xf32>
    %181 = arith.mulf %178, %180 : vector<16x256xf32>
    %182 = arith.truncf %181 : vector<16x256xf32> to vector<16x256xbf16>
    %c480 = arith.constant 480 : index
    %c0_65 = arith.constant 0 : index
    %183 = vector.load %arg8[%c480, %c0_65] : memref<784x256xbf16, #tpu.memory_space<vmem>>, vector<16x256xbf16>
    tpu.vector_store %arg8[%c480, %c0_65], %182 {strides = array<i32>} : memref<784x256xbf16, #tpu.memory_space<vmem>>, vector<16x256xbf16>,
    %c240_i32 = arith.constant 240 : i32
    %184 = tpu.dynamic_rotate %1 by %c240_i32 dim 1 : vector<16x256xf32>, i32 -> vector<16x256xf32>
    %c31 = arith.constant 31 : index
    %c0_66 = arith.constant 0 : index
    %185 = vector.load %arg2[%c31, %c0_66] : memref<49x256xf32, #tpu.memory_space<vmem>>, vector<1x256xf32>
    %186 = vector.broadcast %185 : vector<1x256xf32> to vector<16x256xf32>
    %187 = arith.mulf %184, %186 : vector<16x256xf32>
    %188 = arith.truncf %187 : vector<16x256xf32> to vector<16x256xbf16>
    %c496 = arith.constant 496 : index
    %c0_67 = arith.constant 0 : index
    %189 = vector.load %arg8[%c496, %c0_67] : memref<784x256xbf16, #tpu.memory_space<vmem>>, vector<16x256xbf16>
    tpu.vector_store %arg8[%c496, %c0_67], %188 {strides = array<i32>} : memref<784x256xbf16, #tpu.memory_space<vmem>>, vector<16x256xbf16>,
    %c239_i32 = arith.constant 239 : i32
    %190 = tpu.dynamic_rotate %1 by %c239_i32 dim 1 : vector<16x256xf32>, i32 -> vector<16x256xf32>
    %c32_68 = arith.constant 32 : index
    %c0_69 = arith.constant 0 : index
    %191 = vector.load %arg2[%c32_68, %c0_69] : memref<49x256xf32, #tpu.memory_space<vmem>>, vector<1x256xf32>
    %192 = vector.broadcast %191 : vector<1x256xf32> to vector<16x256xf32>
    %193 = arith.mulf %190, %192 : vector<16x256xf32>
    %194 = arith.truncf %193 : vector<16x256xf32> to vector<16x256xbf16>
    %c512 = arith.constant 512 : index
    %c0_70 = arith.constant 0 : index
    %195 = vector.load %arg8[%c512, %c0_70] : memref<784x256xbf16, #tpu.memory_space<vmem>>, vector<16x256xbf16>
    tpu.vector_store %arg8[%c512, %c0_70], %194 {strides = array<i32>} : memref<784x256xbf16, #tpu.memory_space<vmem>>, vector<16x256xbf16>,
    %c238_i32 = arith.constant 238 : i32
    %196 = tpu.dynamic_rotate %1 by %c238_i32 dim 1 : vector<16x256xf32>, i32 -> vector<16x256xf32>
    %c33 = arith.constant 33 : index
    %c0_71 = arith.constant 0 : index
    %197 = vector.load %arg2[%c33, %c0_71] : memref<49x256xf32, #tpu.memory_space<vmem>>, vector<1x256xf32>
    %198 = vector.broadcast %197 : vector<1x256xf32> to vector<16x256xf32>
    %199 = arith.mulf %196, %198 : vector<16x256xf32>
    %200 = arith.truncf %199 : vector<16x256xf32> to vector<16x256xbf16>
    %c528 = arith.constant 528 : index
    %c0_72 = arith.constant 0 : index
    %201 = vector.load %arg8[%c528, %c0_72] : memref<784x256xbf16, #tpu.memory_space<vmem>>, vector<16x256xbf16>
    tpu.vector_store %arg8[%c528, %c0_72], %200 {strides = array<i32>} : memref<784x256xbf16, #tpu.memory_space<vmem>>, vector<16x256xbf16>,
    %c237_i32 = arith.constant 237 : i32
    %202 = tpu.dynamic_rotate %1 by %c237_i32 dim 1 : vector<16x256xf32>, i32 -> vector<16x256xf32>
    %c34 = arith.constant 34 : index
    %c0_73 = arith.constant 0 : index
    %203 = vector.load %arg2[%c34, %c0_73] : memref<49x256xf32, #tpu.memory_space<vmem>>, vector<1x256xf32>
    %204 = vector.broadcast %203 : vector<1x256xf32> to vector<16x256xf32>
    %205 = arith.mulf %202, %204 : vector<16x256xf32>
    %206 = arith.truncf %205 : vector<16x256xf32> to vector<16x256xbf16>
    %c544 = arith.constant 544 : index
    %c0_74 = arith.constant 0 : index
    %207 = vector.load %arg8[%c544, %c0_74] : memref<784x256xbf16, #tpu.memory_space<vmem>>, vector<16x256xbf16>
    tpu.vector_store %arg8[%c544, %c0_74], %206 {strides = array<i32>} : memref<784x256xbf16, #tpu.memory_space<vmem>>, vector<16x256xbf16>,
    %c227_i32 = arith.constant 227 : i32
    %208 = tpu.dynamic_rotate %1 by %c227_i32 dim 1 : vector<16x256xf32>, i32 -> vector<16x256xf32>
    %c35 = arith.constant 35 : index
    %c0_75 = arith.constant 0 : index
    %209 = vector.load %arg2[%c35, %c0_75] : memref<49x256xf32, #tpu.memory_space<vmem>>, vector<1x256xf32>
    %210 = vector.broadcast %209 : vector<1x256xf32> to vector<16x256xf32>
    %211 = arith.mulf %208, %210 : vector<16x256xf32>
    %212 = arith.truncf %211 : vector<16x256xf32> to vector<16x256xbf16>
    %c560 = arith.constant 560 : index
    %c0_76 = arith.constant 0 : index
    %213 = vector.load %arg8[%c560, %c0_76] : memref<784x256xbf16, #tpu.memory_space<vmem>>, vector<16x256xbf16>
    tpu.vector_store %arg8[%c560, %c0_76], %212 {strides = array<i32>} : memref<784x256xbf16, #tpu.memory_space<vmem>>, vector<16x256xbf16>,
    %c226_i32 = arith.constant 226 : i32
    %214 = tpu.dynamic_rotate %1 by %c226_i32 dim 1 : vector<16x256xf32>, i32 -> vector<16x256xf32>
    %c36 = arith.constant 36 : index
    %c0_77 = arith.constant 0 : index
    %215 = vector.load %arg2[%c36, %c0_77] : memref<49x256xf32, #tpu.memory_space<vmem>>, vector<1x256xf32>
    %216 = vector.broadcast %215 : vector<1x256xf32> to vector<16x256xf32>
    %217 = arith.mulf %214, %216 : vector<16x256xf32>
    %218 = arith.truncf %217 : vector<16x256xf32> to vector<16x256xbf16>
    %c576 = arith.constant 576 : index
    %c0_78 = arith.constant 0 : index
    %219 = vector.load %arg8[%c576, %c0_78] : memref<784x256xbf16, #tpu.memory_space<vmem>>, vector<16x256xbf16>
    tpu.vector_store %arg8[%c576, %c0_78], %218 {strides = array<i32>} : memref<784x256xbf16, #tpu.memory_space<vmem>>, vector<16x256xbf16>,
    %c225_i32 = arith.constant 225 : i32
    %220 = tpu.dynamic_rotate %1 by %c225_i32 dim 1 : vector<16x256xf32>, i32 -> vector<16x256xf32>
    %c37 = arith.constant 37 : index
    %c0_79 = arith.constant 0 : index
    %221 = vector.load %arg2[%c37, %c0_79] : memref<49x256xf32, #tpu.memory_space<vmem>>, vector<1x256xf32>
    %222 = vector.broadcast %221 : vector<1x256xf32> to vector<16x256xf32>
    %223 = arith.mulf %220, %222 : vector<16x256xf32>
    %224 = arith.truncf %223 : vector<16x256xf32> to vector<16x256xbf16>
    %c592 = arith.constant 592 : index
    %c0_80 = arith.constant 0 : index
    %225 = vector.load %arg8[%c592, %c0_80] : memref<784x256xbf16, #tpu.memory_space<vmem>>, vector<16x256xbf16>
    tpu.vector_store %arg8[%c592, %c0_80], %224 {strides = array<i32>} : memref<784x256xbf16, #tpu.memory_space<vmem>>, vector<16x256xbf16>,
    %c224_i32 = arith.constant 224 : i32
    %226 = tpu.dynamic_rotate %1 by %c224_i32 dim 1 : vector<16x256xf32>, i32 -> vector<16x256xf32>
    %c38 = arith.constant 38 : index
    %c0_81 = arith.constant 0 : index
    %227 = vector.load %arg2[%c38, %c0_81] : memref<49x256xf32, #tpu.memory_space<vmem>>, vector<1x256xf32>
    %228 = vector.broadcast %227 : vector<1x256xf32> to vector<16x256xf32>
    %229 = arith.mulf %226, %228 : vector<16x256xf32>
    %230 = arith.truncf %229 : vector<16x256xf32> to vector<16x256xbf16>
    %c608 = arith.constant 608 : index
    %c0_82 = arith.constant 0 : index
    %231 = vector.load %arg8[%c608, %c0_82] : memref<784x256xbf16, #tpu.memory_space<vmem>>, vector<16x256xbf16>
    tpu.vector_store %arg8[%c608, %c0_82], %230 {strides = array<i32>} : memref<784x256xbf16, #tpu.memory_space<vmem>>, vector<16x256xbf16>,
    %c223_i32 = arith.constant 223 : i32
    %232 = tpu.dynamic_rotate %1 by %c223_i32 dim 1 : vector<16x256xf32>, i32 -> vector<16x256xf32>
    %c39 = arith.constant 39 : index
    %c0_83 = arith.constant 0 : index
    %233 = vector.load %arg2[%c39, %c0_83] : memref<49x256xf32, #tpu.memory_space<vmem>>, vector<1x256xf32>
    %234 = vector.broadcast %233 : vector<1x256xf32> to vector<16x256xf32>
    %235 = arith.mulf %232, %234 : vector<16x256xf32>
    %236 = arith.truncf %235 : vector<16x256xf32> to vector<16x256xbf16>
    %c624 = arith.constant 624 : index
    %c0_84 = arith.constant 0 : index
    %237 = vector.load %arg8[%c624, %c0_84] : memref<784x256xbf16, #tpu.memory_space<vmem>>, vector<16x256xbf16>
    tpu.vector_store %arg8[%c624, %c0_84], %236 {strides = array<i32>} : memref<784x256xbf16, #tpu.memory_space<vmem>>, vector<16x256xbf16>,
    %c222_i32 = arith.constant 222 : i32
    %238 = tpu.dynamic_rotate %1 by %c222_i32 dim 1 : vector<16x256xf32>, i32 -> vector<16x256xf32>
    %c40 = arith.constant 40 : index
    %c0_85 = arith.constant 0 : index
    %239 = vector.load %arg2[%c40, %c0_85] : memref<49x256xf32, #tpu.memory_space<vmem>>, vector<1x256xf32>
    %240 = vector.broadcast %239 : vector<1x256xf32> to vector<16x256xf32>
    %241 = arith.mulf %238, %240 : vector<16x256xf32>
    %242 = arith.truncf %241 : vector<16x256xf32> to vector<16x256xbf16>
    %c640 = arith.constant 640 : index
    %c0_86 = arith.constant 0 : index
    %243 = vector.load %arg8[%c640, %c0_86] : memref<784x256xbf16, #tpu.memory_space<vmem>>, vector<16x256xbf16>
    tpu.vector_store %arg8[%c640, %c0_86], %242 {strides = array<i32>} : memref<784x256xbf16, #tpu.memory_space<vmem>>, vector<16x256xbf16>,
    %c221_i32 = arith.constant 221 : i32
    %244 = tpu.dynamic_rotate %1 by %c221_i32 dim 1 : vector<16x256xf32>, i32 -> vector<16x256xf32>
    %c41 = arith.constant 41 : index
    %c0_87 = arith.constant 0 : index
    %245 = vector.load %arg2[%c41, %c0_87] : memref<49x256xf32, #tpu.memory_space<vmem>>, vector<1x256xf32>
    %246 = vector.broadcast %245 : vector<1x256xf32> to vector<16x256xf32>
    %247 = arith.mulf %244, %246 : vector<16x256xf32>
    %248 = arith.truncf %247 : vector<16x256xf32> to vector<16x256xbf16>
    %c656 = arith.constant 656 : index
    %c0_88 = arith.constant 0 : index
    %249 = vector.load %arg8[%c656, %c0_88] : memref<784x256xbf16, #tpu.memory_space<vmem>>, vector<16x256xbf16>
    tpu.vector_store %arg8[%c656, %c0_88], %248 {strides = array<i32>} : memref<784x256xbf16, #tpu.memory_space<vmem>>, vector<16x256xbf16>,
    %c211_i32 = arith.constant 211 : i32
    %250 = tpu.dynamic_rotate %1 by %c211_i32 dim 1 : vector<16x256xf32>, i32 -> vector<16x256xf32>
    %c42 = arith.constant 42 : index
    %c0_89 = arith.constant 0 : index
    %251 = vector.load %arg2[%c42, %c0_89] : memref<49x256xf32, #tpu.memory_space<vmem>>, vector<1x256xf32>
    %252 = vector.broadcast %251 : vector<1x256xf32> to vector<16x256xf32>
    %253 = arith.mulf %250, %252 : vector<16x256xf32>
    %254 = arith.truncf %253 : vector<16x256xf32> to vector<16x256xbf16>
    %c672 = arith.constant 672 : index
    %c0_90 = arith.constant 0 : index
    %255 = vector.load %arg8[%c672, %c0_90] : memref<784x256xbf16, #tpu.memory_space<vmem>>, vector<16x256xbf16>
    tpu.vector_store %arg8[%c672, %c0_90], %254 {strides = array<i32>} : memref<784x256xbf16, #tpu.memory_space<vmem>>, vector<16x256xbf16>,
    %c210_i32 = arith.constant 210 : i32
    %256 = tpu.dynamic_rotate %1 by %c210_i32 dim 1 : vector<16x256xf32>, i32 -> vector<16x256xf32>
    %c43 = arith.constant 43 : index
    %c0_91 = arith.constant 0 : index
    %257 = vector.load %arg2[%c43, %c0_91] : memref<49x256xf32, #tpu.memory_space<vmem>>, vector<1x256xf32>
    %258 = vector.broadcast %257 : vector<1x256xf32> to vector<16x256xf32>
    %259 = arith.mulf %256, %258 : vector<16x256xf32>
    %260 = arith.truncf %259 : vector<16x256xf32> to vector<16x256xbf16>
    %c688 = arith.constant 688 : index
    %c0_92 = arith.constant 0 : index
    %261 = vector.load %arg8[%c688, %c0_92] : memref<784x256xbf16, #tpu.memory_space<vmem>>, vector<16x256xbf16>
    tpu.vector_store %arg8[%c688, %c0_92], %260 {strides = array<i32>} : memref<784x256xbf16, #tpu.memory_space<vmem>>, vector<16x256xbf16>,
    %c209_i32 = arith.constant 209 : i32
    %262 = tpu.dynamic_rotate %1 by %c209_i32 dim 1 : vector<16x256xf32>, i32 -> vector<16x256xf32>
    %c44 = arith.constant 44 : index
    %c0_93 = arith.constant 0 : index
    %263 = vector.load %arg2[%c44, %c0_93] : memref<49x256xf32, #tpu.memory_space<vmem>>, vector<1x256xf32>
    %264 = vector.broadcast %263 : vector<1x256xf32> to vector<16x256xf32>
    %265 = arith.mulf %262, %264 : vector<16x256xf32>
    %266 = arith.truncf %265 : vector<16x256xf32> to vector<16x256xbf16>
    %c704 = arith.constant 704 : index
    %c0_94 = arith.constant 0 : index
    %267 = vector.load %arg8[%c704, %c0_94] : memref<784x256xbf16, #tpu.memory_space<vmem>>, vector<16x256xbf16>
    tpu.vector_store %arg8[%c704, %c0_94], %266 {strides = array<i32>} : memref<784x256xbf16, #tpu.memory_space<vmem>>, vector<16x256xbf16>,
    %c208_i32 = arith.constant 208 : i32
    %268 = tpu.dynamic_rotate %1 by %c208_i32 dim 1 : vector<16x256xf32>, i32 -> vector<16x256xf32>
    %c45 = arith.constant 45 : index
    %c0_95 = arith.constant 0 : index
    %269 = vector.load %arg2[%c45, %c0_95] : memref<49x256xf32, #tpu.memory_space<vmem>>, vector<1x256xf32>
    %270 = vector.broadcast %269 : vector<1x256xf32> to vector<16x256xf32>
    %271 = arith.mulf %268, %270 : vector<16x256xf32>
    %272 = arith.truncf %271 : vector<16x256xf32> to vector<16x256xbf16>
    %c720 = arith.constant 720 : index
    %c0_96 = arith.constant 0 : index
    %273 = vector.load %arg8[%c720, %c0_96] : memref<784x256xbf16, #tpu.memory_space<vmem>>, vector<16x256xbf16>
    tpu.vector_store %arg8[%c720, %c0_96], %272 {strides = array<i32>} : memref<784x256xbf16, #tpu.memory_space<vmem>>, vector<16x256xbf16>,
    %c207_i32 = arith.constant 207 : i32
    %274 = tpu.dynamic_rotate %1 by %c207_i32 dim 1 : vector<16x256xf32>, i32 -> vector<16x256xf32>
    %c46 = arith.constant 46 : index
    %c0_97 = arith.constant 0 : index
    %275 = vector.load %arg2[%c46, %c0_97] : memref<49x256xf32, #tpu.memory_space<vmem>>, vector<1x256xf32>
    %276 = vector.broadcast %275 : vector<1x256xf32> to vector<16x256xf32>
    %277 = arith.mulf %274, %276 : vector<16x256xf32>
    %278 = arith.truncf %277 : vector<16x256xf32> to vector<16x256xbf16>
    %c736 = arith.constant 736 : index
    %c0_98 = arith.constant 0 : index
    %279 = vector.load %arg8[%c736, %c0_98] : memref<784x256xbf16, #tpu.memory_space<vmem>>, vector<16x256xbf16>
    tpu.vector_store %arg8[%c736, %c0_98], %278 {strides = array<i32>} : memref<784x256xbf16, #tpu.memory_space<vmem>>, vector<16x256xbf16>,
    %c206_i32 = arith.constant 206 : i32
    %280 = tpu.dynamic_rotate %1 by %c206_i32 dim 1 : vector<16x256xf32>, i32 -> vector<16x256xf32>
    %c47 = arith.constant 47 : index
    %c0_99 = arith.constant 0 : index
    %281 = vector.load %arg2[%c47, %c0_99] : memref<49x256xf32, #tpu.memory_space<vmem>>, vector<1x256xf32>
    %282 = vector.broadcast %281 : vector<1x256xf32> to vector<16x256xf32>
    %283 = arith.mulf %280, %282 : vector<16x256xf32>
    %284 = arith.truncf %283 : vector<16x256xf32> to vector<16x256xbf16>
    %c752 = arith.constant 752 : index
    %c0_100 = arith.constant 0 : index
    %285 = vector.load %arg8[%c752, %c0_100] : memref<784x256xbf16, #tpu.memory_space<vmem>>, vector<16x256xbf16>
    tpu.vector_store %arg8[%c752, %c0_100], %284 {strides = array<i32>} : memref<784x256xbf16, #tpu.memory_space<vmem>>, vector<16x256xbf16>,
    %c205_i32 = arith.constant 205 : i32
    %286 = tpu.dynamic_rotate %1 by %c205_i32 dim 1 : vector<16x256xf32>, i32 -> vector<16x256xf32>
    %c48_101 = arith.constant 48 : index
    %c0_102 = arith.constant 0 : index
    %287 = vector.load %arg2[%c48_101, %c0_102] : memref<49x256xf32, #tpu.memory_space<vmem>>, vector<1x256xf32>
    %288 = vector.broadcast %287 : vector<1x256xf32> to vector<16x256xf32>
    %289 = arith.mulf %286, %288 : vector<16x256xf32>
    %290 = arith.truncf %289 : vector<16x256xf32> to vector<16x256xbf16>
    %c768 = arith.constant 768 : index
    %c0_103 = arith.constant 0 : index
    %291 = vector.load %arg8[%c768, %c0_103] : memref<784x256xbf16, #tpu.memory_space<vmem>>, vector<16x256xbf16>
    tpu.vector_store %arg8[%c768, %c0_103], %290 {strides = array<i32>} : memref<784x256xbf16, #tpu.memory_space<vmem>>, vector<16x256xbf16>,
    %c0_104 = arith.constant 0 : index
    %c0_105 = arith.constant 0 : index
    %292 = vector.load %arg3[%c0_104, %c0_105] : memref<16x784xbf16, #tpu.memory_space<vmem>>, vector<16x784xbf16>
    %c0_106 = arith.constant 0 : index
    %c0_107 = arith.constant 0 : index
    %293 = vector.load %arg8[%c0_106, %c0_107] : memref<784x256xbf16, #tpu.memory_space<vmem>>, vector<784x256xbf16>
    %cst = arith.constant dense<0.000000e+00> : vector<16x256xf32>
    %294 = tpu.matmul %292, %293, %cst {dimension_numbers = #tpu.dot_dimension_numbers<[1], [0], [0], [1], [0, 0, 1, 1], [], []>} : vector<16x784xbf16>, vector<784x256xbf16>, vector<16x256xf32> -> vector<16x256xf32>
    %c0_108 = arith.constant 0 : index
    %c0_109 = arith.constant 0 : index
    %295 = vector.load %arg4[%c0_108, %c0_109] : memref<16x1xf32, #tpu.memory_space<vmem>>, vector<16x1xf32>
    %296 = vector.broadcast %295 : vector<16x1xf32> to vector<16x256xf32>
    %297 = arith.addf %294, %296 : vector<16x256xf32>
    %298 = arith.addf %297, %1 : vector<16x256xf32>
    %c0_110 = arith.constant 0 : index
    %c0_111 = arith.constant 0 : index
    %c0_112 = arith.constant 0 : index
    %299 = vector.load %arg7[%c0_110, %c0_111, %c0_112] : memref<1x32x256xf32, #tpu.memory_space<vmem>>, vector<1x16x256xf32>
    %300 = vector.shape_cast %299 : vector<1x16x256xf32> to vector<16x256xf32>
    %301 = vector.shape_cast %298 : vector<16x256xf32> to vector<1x16x256xf32>
    tpu.vector_store %arg7[%c0_110, %c0_111, %c0_112], %301 {strides = array<i32>} : memref<1x32x256xf32, #tpu.memory_space<vmem>>, vector<1x16x256xf32>,
    %cst_113 = arith.constant 0.000000e+00 : f32
    %302 = vector.broadcast %cst_113 : f32 to vector<16x256xf32>
    %303 = arith.maximumf %298, %302 : vector<16x256xf32>
    %c51_i32_114 = arith.constant 51 : i32
    %304 = tpu.dynamic_rotate %303 by %c51_i32_114 dim 1 : vector<16x256xf32>, i32 -> vector<16x256xf32>
    %c0_115 = arith.constant 0 : index
    %c0_116 = arith.constant 0 : index
    %305 = vector.load %arg2[%c0_115, %c0_116] : memref<49x256xf32, #tpu.memory_space<vmem>>, vector<1x256xf32>
    %306 = vector.broadcast %305 : vector<1x256xf32> to vector<16x256xf32>
    %307 = arith.mulf %304, %306 : vector<16x256xf32>
    %308 = arith.truncf %307 : vector<16x256xf32> to vector<16x256xbf16>
    %c0_117 = arith.constant 0 : index
    %c0_118 = arith.constant 0 : index
    %309 = vector.load %arg8[%c0_117, %c0_118] : memref<784x256xbf16, #tpu.memory_space<vmem>>, vector<16x256xbf16>
    tpu.vector_store %arg8[%c0_117, %c0_118], %308 {strides = array<i32>} : memref<784x256xbf16, #tpu.memory_space<vmem>>, vector<16x256xbf16>,
    %c50_i32_119 = arith.constant 50 : i32
    %310 = tpu.dynamic_rotate %303 by %c50_i32_119 dim 1 : vector<16x256xf32>, i32 -> vector<16x256xf32>
    %c1_120 = arith.constant 1 : index
    %c0_121 = arith.constant 0 : index
    %311 = vector.load %arg2[%c1_120, %c0_121] : memref<49x256xf32, #tpu.memory_space<vmem>>, vector<1x256xf32>
    %312 = vector.broadcast %311 : vector<1x256xf32> to vector<16x256xf32>
    %313 = arith.mulf %310, %312 : vector<16x256xf32>
    %314 = arith.truncf %313 : vector<16x256xf32> to vector<16x256xbf16>
    %c16_122 = arith.constant 16 : index
    %c0_123 = arith.constant 0 : index
    %315 = vector.load %arg8[%c16_122, %c0_123] : memref<784x256xbf16, #tpu.memory_space<vmem>>, vector<16x256xbf16>
    tpu.vector_store %arg8[%c16_122, %c0_123], %314 {strides = array<i32>} : memref<784x256xbf16, #tpu.memory_space<vmem>>, vector<16x256xbf16>,
    %c49_i32_124 = arith.constant 49 : i32
    %316 = tpu.dynamic_rotate %303 by %c49_i32_124 dim 1 : vector<16x256xf32>, i32 -> vector<16x256xf32>
    %c2_125 = arith.constant 2 : index
    %c0_126 = arith.constant 0 : index
    %317 = vector.load %arg2[%c2_125, %c0_126] : memref<49x256xf32, #tpu.memory_space<vmem>>, vector<1x256xf32>
    %318 = vector.broadcast %317 : vector<1x256xf32> to vector<16x256xf32>
    %319 = arith.mulf %316, %318 : vector<16x256xf32>
    %320 = arith.truncf %319 : vector<16x256xf32> to vector<16x256xbf16>
    %c32_127 = arith.constant 32 : index
    %c0_128 = arith.constant 0 : index
    %321 = vector.load %arg8[%c32_127, %c0_128] : memref<784x256xbf16, #tpu.memory_space<vmem>>, vector<16x256xbf16>
    tpu.vector_store %arg8[%c32_127, %c0_128], %320 {strides = array<i32>} : memref<784x256xbf16, #tpu.memory_space<vmem>>, vector<16x256xbf16>,
    %c48_i32_129 = arith.constant 48 : i32
    %322 = tpu.dynamic_rotate %303 by %c48_i32_129 dim 1 : vector<16x256xf32>, i32 -> vector<16x256xf32>
    %c3_130 = arith.constant 3 : index
    %c0_131 = arith.constant 0 : index
    %323 = vector.load %arg2[%c3_130, %c0_131] : memref<49x256xf32, #tpu.memory_space<vmem>>, vector<1x256xf32>
    %324 = vector.broadcast %323 : vector<1x256xf32> to vector<16x256xf32>
    %325 = arith.mulf %322, %324 : vector<16x256xf32>
    %326 = arith.truncf %325 : vector<16x256xf32> to vector<16x256xbf16>
    %c48_132 = arith.constant 48 : index
    %c0_133 = arith.constant 0 : index
    %327 = vector.load %arg8[%c48_132, %c0_133] : memref<784x256xbf16, #tpu.memory_space<vmem>>, vector<16x256xbf16>
    tpu.vector_store %arg8[%c48_132, %c0_133], %326 {strides = array<i32>} : memref<784x256xbf16, #tpu.memory_space<vmem>>, vector<16x256xbf16>,
    %c47_i32_134 = arith.constant 47 : i32
    %328 = tpu.dynamic_rotate %303 by %c47_i32_134 dim 1 : vector<16x256xf32>, i32 -> vector<16x256xf32>
    %c4_135 = arith.constant 4 : index
    %c0_136 = arith.constant 0 : index
    %329 = vector.load %arg2[%c4_135, %c0_136] : memref<49x256xf32, #tpu.memory_space<vmem>>, vector<1x256xf32>
    %330 = vector.broadcast %329 : vector<1x256xf32> to vector<16x256xf32>
    %331 = arith.mulf %328, %330 : vector<16x256xf32>
    %332 = arith.truncf %331 : vector<16x256xf32> to vector<16x256xbf16>
    %c64_137 = arith.constant 64 : index
    %c0_138 = arith.constant 0 : index
    %333 = vector.load %arg8[%c64_137, %c0_138] : memref<784x256xbf16, #tpu.memory_space<vmem>>, vector<16x256xbf16>
    tpu.vector_store %arg8[%c64_137, %c0_138], %332 {strides = array<i32>} : memref<784x256xbf16, #tpu.memory_space<vmem>>, vector<16x256xbf16>,
    %c46_i32_139 = arith.constant 46 : i32
    %334 = tpu.dynamic_rotate %303 by %c46_i32_139 dim 1 : vector<16x256xf32>, i32 -> vector<16x256xf32>
    %c5_140 = arith.constant 5 : index
    %c0_141 = arith.constant 0 : index
    %335 = vector.load %arg2[%c5_140, %c0_141] : memref<49x256xf32, #tpu.memory_space<vmem>>, vector<1x256xf32>
    %336 = vector.broadcast %335 : vector<1x256xf32> to vector<16x256xf32>
    %337 = arith.mulf %334, %336 : vector<16x256xf32>
    %338 = arith.truncf %337 : vector<16x256xf32> to vector<16x256xbf16>
    %c80_142 = arith.constant 80 : index
    %c0_143 = arith.constant 0 : index
    %339 = vector.load %arg8[%c80_142, %c0_143] : memref<784x256xbf16, #tpu.memory_space<vmem>>, vector<16x256xbf16>
    tpu.vector_store %arg8[%c80_142, %c0_143], %338 {strides = array<i32>} : memref<784x256xbf16, #tpu.memory_space<vmem>>, vector<16x256xbf16>,
    %c45_i32_144 = arith.constant 45 : i32
    %340 = tpu.dynamic_rotate %303 by %c45_i32_144 dim 1 : vector<16x256xf32>, i32 -> vector<16x256xf32>
    %c6_145 = arith.constant 6 : index
    %c0_146 = arith.constant 0 : index
    %341 = vector.load %arg2[%c6_145, %c0_146] : memref<49x256xf32, #tpu.memory_space<vmem>>, vector<1x256xf32>
    %342 = vector.broadcast %341 : vector<1x256xf32> to vector<16x256xf32>
    %343 = arith.mulf %340, %342 : vector<16x256xf32>
    %344 = arith.truncf %343 : vector<16x256xf32> to vector<16x256xbf16>
    %c96_147 = arith.constant 96 : index
    %c0_148 = arith.constant 0 : index
    %345 = vector.load %arg8[%c96_147, %c0_148] : memref<784x256xbf16, #tpu.memory_space<vmem>>, vector<16x256xbf16>
    tpu.vector_store %arg8[%c96_147, %c0_148], %344 {strides = array<i32>} : memref<784x256xbf16, #tpu.memory_space<vmem>>, vector<16x256xbf16>,
    %c35_i32_149 = arith.constant 35 : i32
    %346 = tpu.dynamic_rotate %303 by %c35_i32_149 dim 1 : vector<16x256xf32>, i32 -> vector<16x256xf32>
    %c7_150 = arith.constant 7 : index
    %c0_151 = arith.constant 0 : index
    %347 = vector.load %arg2[%c7_150, %c0_151] : memref<49x256xf32, #tpu.memory_space<vmem>>, vector<1x256xf32>
    %348 = vector.broadcast %347 : vector<1x256xf32> to vector<16x256xf32>
    %349 = arith.mulf %346, %348 : vector<16x256xf32>
    %350 = arith.truncf %349 : vector<16x256xf32> to vector<16x256xbf16>
    %c112_152 = arith.constant 112 : index
    %c0_153 = arith.constant 0 : index
    %351 = vector.load %arg8[%c112_152, %c0_153] : memref<784x256xbf16, #tpu.memory_space<vmem>>, vector<16x256xbf16>
    tpu.vector_store %arg8[%c112_152, %c0_153], %350 {strides = array<i32>} : memref<784x256xbf16, #tpu.memory_space<vmem>>, vector<16x256xbf16>,
    %c34_i32_154 = arith.constant 34 : i32
    %352 = tpu.dynamic_rotate %303 by %c34_i32_154 dim 1 : vector<16x256xf32>, i32 -> vector<16x256xf32>
    %c8_155 = arith.constant 8 : index
    %c0_156 = arith.constant 0 : index
    %353 = vector.load %arg2[%c8_155, %c0_156] : memref<49x256xf32, #tpu.memory_space<vmem>>, vector<1x256xf32>
    %354 = vector.broadcast %353 : vector<1x256xf32> to vector<16x256xf32>
    %355 = arith.mulf %352, %354 : vector<16x256xf32>
    %356 = arith.truncf %355 : vector<16x256xf32> to vector<16x256xbf16>
    %c128_157 = arith.constant 128 : index
    %c0_158 = arith.constant 0 : index
    %357 = vector.load %arg8[%c128_157, %c0_158] : memref<784x256xbf16, #tpu.memory_space<vmem>>, vector<16x256xbf16>
    tpu.vector_store %arg8[%c128_157, %c0_158], %356 {strides = array<i32>} : memref<784x256xbf16, #tpu.memory_space<vmem>>, vector<16x256xbf16>,
    %c33_i32_159 = arith.constant 33 : i32
    %358 = tpu.dynamic_rotate %303 by %c33_i32_159 dim 1 : vector<16x256xf32>, i32 -> vector<16x256xf32>
    %c9_160 = arith.constant 9 : index
    %c0_161 = arith.constant 0 : index
    %359 = vector.load %arg2[%c9_160, %c0_161] : memref<49x256xf32, #tpu.memory_space<vmem>>, vector<1x256xf32>
    %360 = vector.broadcast %359 : vector<1x256xf32> to vector<16x256xf32>
    %361 = arith.mulf %358, %360 : vector<16x256xf32>
    %362 = arith.truncf %361 : vector<16x256xf32> to vector<16x256xbf16>
    %c144_162 = arith.constant 144 : index
    %c0_163 = arith.constant 0 : index
    %363 = vector.load %arg8[%c144_162, %c0_163] : memref<784x256xbf16, #tpu.memory_space<vmem>>, vector<16x256xbf16>
    tpu.vector_store %arg8[%c144_162, %c0_163], %362 {strides = array<i32>} : memref<784x256xbf16, #tpu.memory_space<vmem>>, vector<16x256xbf16>,
    %c32_i32_164 = arith.constant 32 : i32
    %364 = tpu.dynamic_rotate %303 by %c32_i32_164 dim 1 : vector<16x256xf32>, i32 -> vector<16x256xf32>
    %c10_165 = arith.constant 10 : index
    %c0_166 = arith.constant 0 : index
    %365 = vector.load %arg2[%c10_165, %c0_166] : memref<49x256xf32, #tpu.memory_space<vmem>>, vector<1x256xf32>
    %366 = vector.broadcast %365 : vector<1x256xf32> to vector<16x256xf32>
    %367 = arith.mulf %364, %366 : vector<16x256xf32>
    %368 = arith.truncf %367 : vector<16x256xf32> to vector<16x256xbf16>
    %c160_167 = arith.constant 160 : index
    %c0_168 = arith.constant 0 : index
    %369 = vector.load %arg8[%c160_167, %c0_168] : memref<784x256xbf16, #tpu.memory_space<vmem>>, vector<16x256xbf16>
    tpu.vector_store %arg8[%c160_167, %c0_168], %368 {strides = array<i32>} : memref<784x256xbf16, #tpu.memory_space<vmem>>, vector<16x256xbf16>,
    %c31_i32_169 = arith.constant 31 : i32
    %370 = tpu.dynamic_rotate %303 by %c31_i32_169 dim 1 : vector<16x256xf32>, i32 -> vector<16x256xf32>
    %c11_170 = arith.constant 11 : index
    %c0_171 = arith.constant 0 : index
    %371 = vector.load %arg2[%c11_170, %c0_171] : memref<49x256xf32, #tpu.memory_space<vmem>>, vector<1x256xf32>
    %372 = vector.broadcast %371 : vector<1x256xf32> to vector<16x256xf32>
    %373 = arith.mulf %370, %372 : vector<16x256xf32>
    %374 = arith.truncf %373 : vector<16x256xf32> to vector<16x256xbf16>
    %c176_172 = arith.constant 176 : index
    %c0_173 = arith.constant 0 : index
    %375 = vector.load %arg8[%c176_172, %c0_173] : memref<784x256xbf16, #tpu.memory_space<vmem>>, vector<16x256xbf16>
    tpu.vector_store %arg8[%c176_172, %c0_173], %374 {strides = array<i32>} : memref<784x256xbf16, #tpu.memory_space<vmem>>, vector<16x256xbf16>,
    %c30_i32_174 = arith.constant 30 : i32
    %376 = tpu.dynamic_rotate %303 by %c30_i32_174 dim 1 : vector<16x256xf32>, i32 -> vector<16x256xf32>
    %c12_175 = arith.constant 12 : index
    %c0_176 = arith.constant 0 : index
    %377 = vector.load %arg2[%c12_175, %c0_176] : memref<49x256xf32, #tpu.memory_space<vmem>>, vector<1x256xf32>
    %378 = vector.broadcast %377 : vector<1x256xf32> to vector<16x256xf32>
    %379 = arith.mulf %376, %378 : vector<16x256xf32>
    %380 = arith.truncf %379 : vector<16x256xf32> to vector<16x256xbf16>
    %c192_177 = arith.constant 192 : index
    %c0_178 = arith.constant 0 : index
    %381 = vector.load %arg8[%c192_177, %c0_178] : memref<784x256xbf16, #tpu.memory_space<vmem>>, vector<16x256xbf16>
    tpu.vector_store %arg8[%c192_177, %c0_178], %380 {strides = array<i32>} : memref<784x256xbf16, #tpu.memory_space<vmem>>, vector<16x256xbf16>,
    %c29_i32_179 = arith.constant 29 : i32
    %382 = tpu.dynamic_rotate %303 by %c29_i32_179 dim 1 : vector<16x256xf32>, i32 -> vector<16x256xf32>
    %c13_180 = arith.constant 13 : index
    %c0_181 = arith.constant 0 : index
    %383 = vector.load %arg2[%c13_180, %c0_181] : memref<49x256xf32, #tpu.memory_space<vmem>>, vector<1x256xf32>
    %384 = vector.broadcast %383 : vector<1x256xf32> to vector<16x256xf32>
    %385 = arith.mulf %382, %384 : vector<16x256xf32>
    %386 = arith.truncf %385 : vector<16x256xf32> to vector<16x256xbf16>
    %c208_182 = arith.constant 208 : index
    %c0_183 = arith.constant 0 : index
    %387 = vector.load %arg8[%c208_182, %c0_183] : memref<784x256xbf16, #tpu.memory_space<vmem>>, vector<16x256xbf16>
    tpu.vector_store %arg8[%c208_182, %c0_183], %386 {strides = array<i32>} : memref<784x256xbf16, #tpu.memory_space<vmem>>, vector<16x256xbf16>,
    %c19_i32_184 = arith.constant 19 : i32
    %388 = tpu.dynamic_rotate %303 by %c19_i32_184 dim 1 : vector<16x256xf32>, i32 -> vector<16x256xf32>
    %c14_185 = arith.constant 14 : index
    %c0_186 = arith.constant 0 : index
    %389 = vector.load %arg2[%c14_185, %c0_186] : memref<49x256xf32, #tpu.memory_space<vmem>>, vector<1x256xf32>
    %390 = vector.broadcast %389 : vector<1x256xf32> to vector<16x256xf32>
    %391 = arith.mulf %388, %390 : vector<16x256xf32>
    %392 = arith.truncf %391 : vector<16x256xf32> to vector<16x256xbf16>
    %c224_187 = arith.constant 224 : index
    %c0_188 = arith.constant 0 : index
    %393 = vector.load %arg8[%c224_187, %c0_188] : memref<784x256xbf16, #tpu.memory_space<vmem>>, vector<16x256xbf16>
    tpu.vector_store %arg8[%c224_187, %c0_188], %392 {strides = array<i32>} : memref<784x256xbf16, #tpu.memory_space<vmem>>, vector<16x256xbf16>,
    %c18_i32_189 = arith.constant 18 : i32
    %394 = tpu.dynamic_rotate %303 by %c18_i32_189 dim 1 : vector<16x256xf32>, i32 -> vector<16x256xf32>
    %c15_190 = arith.constant 15 : index
    %c0_191 = arith.constant 0 : index
    %395 = vector.load %arg2[%c15_190, %c0_191] : memref<49x256xf32, #tpu.memory_space<vmem>>, vector<1x256xf32>
    %396 = vector.broadcast %395 : vector<1x256xf32> to vector<16x256xf32>
    %397 = arith.mulf %394, %396 : vector<16x256xf32>
    %398 = arith.truncf %397 : vector<16x256xf32> to vector<16x256xbf16>
    %c240_192 = arith.constant 240 : index
    %c0_193 = arith.constant 0 : index
    %399 = vector.load %arg8[%c240_192, %c0_193] : memref<784x256xbf16, #tpu.memory_space<vmem>>, vector<16x256xbf16>
    tpu.vector_store %arg8[%c240_192, %c0_193], %398 {strides = array<i32>} : memref<784x256xbf16, #tpu.memory_space<vmem>>, vector<16x256xbf16>,
    %c17_i32_194 = arith.constant 17 : i32
    %400 = tpu.dynamic_rotate %303 by %c17_i32_194 dim 1 : vector<16x256xf32>, i32 -> vector<16x256xf32>
    %c16_195 = arith.constant 16 : index
    %c0_196 = arith.constant 0 : index
    %401 = vector.load %arg2[%c16_195, %c0_196] : memref<49x256xf32, #tpu.memory_space<vmem>>, vector<1x256xf32>
    %402 = vector.broadcast %401 : vector<1x256xf32> to vector<16x256xf32>
    %403 = arith.mulf %400, %402 : vector<16x256xf32>
    %404 = arith.truncf %403 : vector<16x256xf32> to vector<16x256xbf16>
    %c256_197 = arith.constant 256 : index
    %c0_198 = arith.constant 0 : index
    %405 = vector.load %arg8[%c256_197, %c0_198] : memref<784x256xbf16, #tpu.memory_space<vmem>>, vector<16x256xbf16>
    tpu.vector_store %arg8[%c256_197, %c0_198], %404 {strides = array<i32>} : memref<784x256xbf16, #tpu.memory_space<vmem>>, vector<16x256xbf16>,
    %c16_i32_199 = arith.constant 16 : i32
    %406 = tpu.dynamic_rotate %303 by %c16_i32_199 dim 1 : vector<16x256xf32>, i32 -> vector<16x256xf32>
    %c17_200 = arith.constant 17 : index
    %c0_201 = arith.constant 0 : index
    %407 = vector.load %arg2[%c17_200, %c0_201] : memref<49x256xf32, #tpu.memory_space<vmem>>, vector<1x256xf32>
    %408 = vector.broadcast %407 : vector<1x256xf32> to vector<16x256xf32>
    %409 = arith.mulf %406, %408 : vector<16x256xf32>
    %410 = arith.truncf %409 : vector<16x256xf32> to vector<16x256xbf16>
    %c272_202 = arith.constant 272 : index
    %c0_203 = arith.constant 0 : index
    %411 = vector.load %arg8[%c272_202, %c0_203] : memref<784x256xbf16, #tpu.memory_space<vmem>>, vector<16x256xbf16>
    tpu.vector_store %arg8[%c272_202, %c0_203], %410 {strides = array<i32>} : memref<784x256xbf16, #tpu.memory_space<vmem>>, vector<16x256xbf16>,
    %c15_i32_204 = arith.constant 15 : i32
    %412 = tpu.dynamic_rotate %303 by %c15_i32_204 dim 1 : vector<16x256xf32>, i32 -> vector<16x256xf32>
    %c18_205 = arith.constant 18 : index
    %c0_206 = arith.constant 0 : index
    %413 = vector.load %arg2[%c18_205, %c0_206] : memref<49x256xf32, #tpu.memory_space<vmem>>, vector<1x256xf32>
    %414 = vector.broadcast %413 : vector<1x256xf32> to vector<16x256xf32>
    %415 = arith.mulf %412, %414 : vector<16x256xf32>
    %416 = arith.truncf %415 : vector<16x256xf32> to vector<16x256xbf16>
    %c288_207 = arith.constant 288 : index
    %c0_208 = arith.constant 0 : index
    %417 = vector.load %arg8[%c288_207, %c0_208] : memref<784x256xbf16, #tpu.memory_space<vmem>>, vector<16x256xbf16>
    tpu.vector_store %arg8[%c288_207, %c0_208], %416 {strides = array<i32>} : memref<784x256xbf16, #tpu.memory_space<vmem>>, vector<16x256xbf16>,
    %c14_i32_209 = arith.constant 14 : i32
    %418 = tpu.dynamic_rotate %303 by %c14_i32_209 dim 1 : vector<16x256xf32>, i32 -> vector<16x256xf32>
    %c19_210 = arith.constant 19 : index
    %c0_211 = arith.constant 0 : index
    %419 = vector.load %arg2[%c19_210, %c0_211] : memref<49x256xf32, #tpu.memory_space<vmem>>, vector<1x256xf32>
    %420 = vector.broadcast %419 : vector<1x256xf32> to vector<16x256xf32>
    %421 = arith.mulf %418, %420 : vector<16x256xf32>
    %422 = arith.truncf %421 : vector<16x256xf32> to vector<16x256xbf16>
    %c304_212 = arith.constant 304 : index
    %c0_213 = arith.constant 0 : index
    %423 = vector.load %arg8[%c304_212, %c0_213] : memref<784x256xbf16, #tpu.memory_space<vmem>>, vector<16x256xbf16>
    tpu.vector_store %arg8[%c304_212, %c0_213], %422 {strides = array<i32>} : memref<784x256xbf16, #tpu.memory_space<vmem>>, vector<16x256xbf16>,
    %c13_i32_214 = arith.constant 13 : i32
    %424 = tpu.dynamic_rotate %303 by %c13_i32_214 dim 1 : vector<16x256xf32>, i32 -> vector<16x256xf32>
    %c20_215 = arith.constant 20 : index
    %c0_216 = arith.constant 0 : index
    %425 = vector.load %arg2[%c20_215, %c0_216] : memref<49x256xf32, #tpu.memory_space<vmem>>, vector<1x256xf32>
    %426 = vector.broadcast %425 : vector<1x256xf32> to vector<16x256xf32>
    %427 = arith.mulf %424, %426 : vector<16x256xf32>
    %428 = arith.truncf %427 : vector<16x256xf32> to vector<16x256xbf16>
    %c320_217 = arith.constant 320 : index
    %c0_218 = arith.constant 0 : index
    %429 = vector.load %arg8[%c320_217, %c0_218] : memref<784x256xbf16, #tpu.memory_space<vmem>>, vector<16x256xbf16>
    tpu.vector_store %arg8[%c320_217, %c0_218], %428 {strides = array<i32>} : memref<784x256xbf16, #tpu.memory_space<vmem>>, vector<16x256xbf16>,
    %c3_i32_219 = arith.constant 3 : i32
    %430 = tpu.dynamic_rotate %303 by %c3_i32_219 dim 1 : vector<16x256xf32>, i32 -> vector<16x256xf32>
    %c21_220 = arith.constant 21 : index
    %c0_221 = arith.constant 0 : index
    %431 = vector.load %arg2[%c21_220, %c0_221] : memref<49x256xf32, #tpu.memory_space<vmem>>, vector<1x256xf32>
    %432 = vector.broadcast %431 : vector<1x256xf32> to vector<16x256xf32>
    %433 = arith.mulf %430, %432 : vector<16x256xf32>
    %434 = arith.truncf %433 : vector<16x256xf32> to vector<16x256xbf16>
    %c336_222 = arith.constant 336 : index
    %c0_223 = arith.constant 0 : index
    %435 = vector.load %arg8[%c336_222, %c0_223] : memref<784x256xbf16, #tpu.memory_space<vmem>>, vector<16x256xbf16>
    tpu.vector_store %arg8[%c336_222, %c0_223], %434 {strides = array<i32>} : memref<784x256xbf16, #tpu.memory_space<vmem>>, vector<16x256xbf16>,
    %c2_i32_224 = arith.constant 2 : i32
    %436 = tpu.dynamic_rotate %303 by %c2_i32_224 dim 1 : vector<16x256xf32>, i32 -> vector<16x256xf32>
    %c22_225 = arith.constant 22 : index
    %c0_226 = arith.constant 0 : index
    %437 = vector.load %arg2[%c22_225, %c0_226] : memref<49x256xf32, #tpu.memory_space<vmem>>, vector<1x256xf32>
    %438 = vector.broadcast %437 : vector<1x256xf32> to vector<16x256xf32>
    %439 = arith.mulf %436, %438 : vector<16x256xf32>
    %440 = arith.truncf %439 : vector<16x256xf32> to vector<16x256xbf16>
    %c352_227 = arith.constant 352 : index
    %c0_228 = arith.constant 0 : index
    %441 = vector.load %arg8[%c352_227, %c0_228] : memref<784x256xbf16, #tpu.memory_space<vmem>>, vector<16x256xbf16>
    tpu.vector_store %arg8[%c352_227, %c0_228], %440 {strides = array<i32>} : memref<784x256xbf16, #tpu.memory_space<vmem>>, vector<16x256xbf16>,
    %c1_i32_229 = arith.constant 1 : i32
    %442 = tpu.dynamic_rotate %303 by %c1_i32_229 dim 1 : vector<16x256xf32>, i32 -> vector<16x256xf32>
    %c23_230 = arith.constant 23 : index
    %c0_231 = arith.constant 0 : index
    %443 = vector.load %arg2[%c23_230, %c0_231] : memref<49x256xf32, #tpu.memory_space<vmem>>, vector<1x256xf32>
    %444 = vector.broadcast %443 : vector<1x256xf32> to vector<16x256xf32>
    %445 = arith.mulf %442, %444 : vector<16x256xf32>
    %446 = arith.truncf %445 : vector<16x256xf32> to vector<16x256xbf16>
    %c368_232 = arith.constant 368 : index
    %c0_233 = arith.constant 0 : index
    %447 = vector.load %arg8[%c368_232, %c0_233] : memref<784x256xbf16, #tpu.memory_space<vmem>>, vector<16x256xbf16>
    tpu.vector_store %arg8[%c368_232, %c0_233], %446 {strides = array<i32>} : memref<784x256xbf16, #tpu.memory_space<vmem>>, vector<16x256xbf16>,
    %448 = arith.truncf %303 : vector<16x256xf32> to vector<16x256xbf16>
    %c384_234 = arith.constant 384 : index
    %c0_235 = arith.constant 0 : index
    %449 = vector.load %arg8[%c384_234, %c0_235] : memref<784x256xbf16, #tpu.memory_space<vmem>>, vector<16x256xbf16>
    tpu.vector_store %arg8[%c384_234, %c0_235], %448 {strides = array<i32>} : memref<784x256xbf16, #tpu.memory_space<vmem>>, vector<16x256xbf16>,
    %c255_i32_236 = arith.constant 255 : i32
    %450 = tpu.dynamic_rotate %303 by %c255_i32_236 dim 1 : vector<16x256xf32>, i32 -> vector<16x256xf32>
    %c25_237 = arith.constant 25 : index
    %c0_238 = arith.constant 0 : index
    %451 = vector.load %arg2[%c25_237, %c0_238] : memref<49x256xf32, #tpu.memory_space<vmem>>, vector<1x256xf32>
    %452 = vector.broadcast %451 : vector<1x256xf32> to vector<16x256xf32>
    %453 = arith.mulf %450, %452 : vector<16x256xf32>
    %454 = arith.truncf %453 : vector<16x256xf32> to vector<16x256xbf16>
    %c400_239 = arith.constant 400 : index
    %c0_240 = arith.constant 0 : index
    %455 = vector.load %arg8[%c400_239, %c0_240] : memref<784x256xbf16, #tpu.memory_space<vmem>>, vector<16x256xbf16>
    tpu.vector_store %arg8[%c400_239, %c0_240], %454 {strides = array<i32>} : memref<784x256xbf16, #tpu.memory_space<vmem>>, vector<16x256xbf16>,
    %c254_i32_241 = arith.constant 254 : i32
    %456 = tpu.dynamic_rotate %303 by %c254_i32_241 dim 1 : vector<16x256xf32>, i32 -> vector<16x256xf32>
    %c26_242 = arith.constant 26 : index
    %c0_243 = arith.constant 0 : index
    %457 = vector.load %arg2[%c26_242, %c0_243] : memref<49x256xf32, #tpu.memory_space<vmem>>, vector<1x256xf32>
    %458 = vector.broadcast %457 : vector<1x256xf32> to vector<16x256xf32>
    %459 = arith.mulf %456, %458 : vector<16x256xf32>
    %460 = arith.truncf %459 : vector<16x256xf32> to vector<16x256xbf16>
    %c416_244 = arith.constant 416 : index
    %c0_245 = arith.constant 0 : index
    %461 = vector.load %arg8[%c416_244, %c0_245] : memref<784x256xbf16, #tpu.memory_space<vmem>>, vector<16x256xbf16>
    tpu.vector_store %arg8[%c416_244, %c0_245], %460 {strides = array<i32>} : memref<784x256xbf16, #tpu.memory_space<vmem>>, vector<16x256xbf16>,
    %c253_i32_246 = arith.constant 253 : i32
    %462 = tpu.dynamic_rotate %303 by %c253_i32_246 dim 1 : vector<16x256xf32>, i32 -> vector<16x256xf32>
    %c27_247 = arith.constant 27 : index
    %c0_248 = arith.constant 0 : index
    %463 = vector.load %arg2[%c27_247, %c0_248] : memref<49x256xf32, #tpu.memory_space<vmem>>, vector<1x256xf32>
    %464 = vector.broadcast %463 : vector<1x256xf32> to vector<16x256xf32>
    %465 = arith.mulf %462, %464 : vector<16x256xf32>
    %466 = arith.truncf %465 : vector<16x256xf32> to vector<16x256xbf16>
    %c432_249 = arith.constant 432 : index
    %c0_250 = arith.constant 0 : index
    %467 = vector.load %arg8[%c432_249, %c0_250] : memref<784x256xbf16, #tpu.memory_space<vmem>>, vector<16x256xbf16>
    tpu.vector_store %arg8[%c432_249, %c0_250], %466 {strides = array<i32>} : memref<784x256xbf16, #tpu.memory_space<vmem>>, vector<16x256xbf16>,
    %c243_i32_251 = arith.constant 243 : i32
    %468 = tpu.dynamic_rotate %303 by %c243_i32_251 dim 1 : vector<16x256xf32>, i32 -> vector<16x256xf32>
    %c28_252 = arith.constant 28 : index
    %c0_253 = arith.constant 0 : index
    %469 = vector.load %arg2[%c28_252, %c0_253] : memref<49x256xf32, #tpu.memory_space<vmem>>, vector<1x256xf32>
    %470 = vector.broadcast %469 : vector<1x256xf32> to vector<16x256xf32>
    %471 = arith.mulf %468, %470 : vector<16x256xf32>
    %472 = arith.truncf %471 : vector<16x256xf32> to vector<16x256xbf16>
    %c448_254 = arith.constant 448 : index
    %c0_255 = arith.constant 0 : index
    %473 = vector.load %arg8[%c448_254, %c0_255] : memref<784x256xbf16, #tpu.memory_space<vmem>>, vector<16x256xbf16>
    tpu.vector_store %arg8[%c448_254, %c0_255], %472 {strides = array<i32>} : memref<784x256xbf16, #tpu.memory_space<vmem>>, vector<16x256xbf16>,
    %c242_i32_256 = arith.constant 242 : i32
    %474 = tpu.dynamic_rotate %303 by %c242_i32_256 dim 1 : vector<16x256xf32>, i32 -> vector<16x256xf32>
    %c29_257 = arith.constant 29 : index
    %c0_258 = arith.constant 0 : index
    %475 = vector.load %arg2[%c29_257, %c0_258] : memref<49x256xf32, #tpu.memory_space<vmem>>, vector<1x256xf32>
    %476 = vector.broadcast %475 : vector<1x256xf32> to vector<16x256xf32>
    %477 = arith.mulf %474, %476 : vector<16x256xf32>
    %478 = arith.truncf %477 : vector<16x256xf32> to vector<16x256xbf16>
    %c464_259 = arith.constant 464 : index
    %c0_260 = arith.constant 0 : index
    %479 = vector.load %arg8[%c464_259, %c0_260] : memref<784x256xbf16, #tpu.memory_space<vmem>>, vector<16x256xbf16>
    tpu.vector_store %arg8[%c464_259, %c0_260], %478 {strides = array<i32>} : memref<784x256xbf16, #tpu.memory_space<vmem>>, vector<16x256xbf16>,
    %c241_i32_261 = arith.constant 241 : i32
    %480 = tpu.dynamic_rotate %303 by %c241_i32_261 dim 1 : vector<16x256xf32>, i32 -> vector<16x256xf32>
    %c30_262 = arith.constant 30 : index
    %c0_263 = arith.constant 0 : index
    %481 = vector.load %arg2[%c30_262, %c0_263] : memref<49x256xf32, #tpu.memory_space<vmem>>, vector<1x256xf32>
    %482 = vector.broadcast %481 : vector<1x256xf32> to vector<16x256xf32>
    %483 = arith.mulf %480, %482 : vector<16x256xf32>
    %484 = arith.truncf %483 : vector<16x256xf32> to vector<16x256xbf16>
    %c480_264 = arith.constant 480 : index
    %c0_265 = arith.constant 0 : index
    %485 = vector.load %arg8[%c480_264, %c0_265] : memref<784x256xbf16, #tpu.memory_space<vmem>>, vector<16x256xbf16>
    tpu.vector_store %arg8[%c480_264, %c0_265], %484 {strides = array<i32>} : memref<784x256xbf16, #tpu.memory_space<vmem>>, vector<16x256xbf16>,
    %c240_i32_266 = arith.constant 240 : i32
    %486 = tpu.dynamic_rotate %303 by %c240_i32_266 dim 1 : vector<16x256xf32>, i32 -> vector<16x256xf32>
    %c31_267 = arith.constant 31 : index
    %c0_268 = arith.constant 0 : index
    %487 = vector.load %arg2[%c31_267, %c0_268] : memref<49x256xf32, #tpu.memory_space<vmem>>, vector<1x256xf32>
    %488 = vector.broadcast %487 : vector<1x256xf32> to vector<16x256xf32>
    %489 = arith.mulf %486, %488 : vector<16x256xf32>
    %490 = arith.truncf %489 : vector<16x256xf32> to vector<16x256xbf16>
    %c496_269 = arith.constant 496 : index
    %c0_270 = arith.constant 0 : index
    %491 = vector.load %arg8[%c496_269, %c0_270] : memref<784x256xbf16, #tpu.memory_space<vmem>>, vector<16x256xbf16>
    tpu.vector_store %arg8[%c496_269, %c0_270], %490 {strides = array<i32>} : memref<784x256xbf16, #tpu.memory_space<vmem>>, vector<16x256xbf16>,
    %c239_i32_271 = arith.constant 239 : i32
    %492 = tpu.dynamic_rotate %303 by %c239_i32_271 dim 1 : vector<16x256xf32>, i32 -> vector<16x256xf32>
    %c32_272 = arith.constant 32 : index
    %c0_273 = arith.constant 0 : index
    %493 = vector.load %arg2[%c32_272, %c0_273] : memref<49x256xf32, #tpu.memory_space<vmem>>, vector<1x256xf32>
    %494 = vector.broadcast %493 : vector<1x256xf32> to vector<16x256xf32>
    %495 = arith.mulf %492, %494 : vector<16x256xf32>
    %496 = arith.truncf %495 : vector<16x256xf32> to vector<16x256xbf16>
    %c512_274 = arith.constant 512 : index
    %c0_275 = arith.constant 0 : index
    %497 = vector.load %arg8[%c512_274, %c0_275] : memref<784x256xbf16, #tpu.memory_space<vmem>>, vector<16x256xbf16>
    tpu.vector_store %arg8[%c512_274, %c0_275], %496 {strides = array<i32>} : memref<784x256xbf16, #tpu.memory_space<vmem>>, vector<16x256xbf16>,
    %c238_i32_276 = arith.constant 238 : i32
    %498 = tpu.dynamic_rotate %303 by %c238_i32_276 dim 1 : vector<16x256xf32>, i32 -> vector<16x256xf32>
    %c33_277 = arith.constant 33 : index
    %c0_278 = arith.constant 0 : index
    %499 = vector.load %arg2[%c33_277, %c0_278] : memref<49x256xf32, #tpu.memory_space<vmem>>, vector<1x256xf32>
    %500 = vector.broadcast %499 : vector<1x256xf32> to vector<16x256xf32>
    %501 = arith.mulf %498, %500 : vector<16x256xf32>
    %502 = arith.truncf %501 : vector<16x256xf32> to vector<16x256xbf16>
    %c528_279 = arith.constant 528 : index
    %c0_280 = arith.constant 0 : index
    %503 = vector.load %arg8[%c528_279, %c0_280] : memref<784x256xbf16, #tpu.memory_space<vmem>>, vector<16x256xbf16>
    tpu.vector_store %arg8[%c528_279, %c0_280], %502 {strides = array<i32>} : memref<784x256xbf16, #tpu.memory_space<vmem>>, vector<16x256xbf16>,
    %c237_i32_281 = arith.constant 237 : i32
    %504 = tpu.dynamic_rotate %303 by %c237_i32_281 dim 1 : vector<16x256xf32>, i32 -> vector<16x256xf32>
    %c34_282 = arith.constant 34 : index
    %c0_283 = arith.constant 0 : index
    %505 = vector.load %arg2[%c34_282, %c0_283] : memref<49x256xf32, #tpu.memory_space<vmem>>, vector<1x256xf32>
    %506 = vector.broadcast %505 : vector<1x256xf32> to vector<16x256xf32>
    %507 = arith.mulf %504, %506 : vector<16x256xf32>
    %508 = arith.truncf %507 : vector<16x256xf32> to vector<16x256xbf16>
    %c544_284 = arith.constant 544 : index
    %c0_285 = arith.constant 0 : index
    %509 = vector.load %arg8[%c544_284, %c0_285] : memref<784x256xbf16, #tpu.memory_space<vmem>>, vector<16x256xbf16>
    tpu.vector_store %arg8[%c544_284, %c0_285], %508 {strides = array<i32>} : memref<784x256xbf16, #tpu.memory_space<vmem>>, vector<16x256xbf16>,
    %c227_i32_286 = arith.constant 227 : i32
    %510 = tpu.dynamic_rotate %303 by %c227_i32_286 dim 1 : vector<16x256xf32>, i32 -> vector<16x256xf32>
    %c35_287 = arith.constant 35 : index
    %c0_288 = arith.constant 0 : index
    %511 = vector.load %arg2[%c35_287, %c0_288] : memref<49x256xf32, #tpu.memory_space<vmem>>, vector<1x256xf32>
    %512 = vector.broadcast %511 : vector<1x256xf32> to vector<16x256xf32>
    %513 = arith.mulf %510, %512 : vector<16x256xf32>
    %514 = arith.truncf %513 : vector<16x256xf32> to vector<16x256xbf16>
    %c560_289 = arith.constant 560 : index
    %c0_290 = arith.constant 0 : index
    %515 = vector.load %arg8[%c560_289, %c0_290] : memref<784x256xbf16, #tpu.memory_space<vmem>>, vector<16x256xbf16>
    tpu.vector_store %arg8[%c560_289, %c0_290], %514 {strides = array<i32>} : memref<784x256xbf16, #tpu.memory_space<vmem>>, vector<16x256xbf16>,
    %c226_i32_291 = arith.constant 226 : i32
    %516 = tpu.dynamic_rotate %303 by %c226_i32_291 dim 1 : vector<16x256xf32>, i32 -> vector<16x256xf32>
    %c36_292 = arith.constant 36 : index
    %c0_293 = arith.constant 0 : index
    %517 = vector.load %arg2[%c36_292, %c0_293] : memref<49x256xf32, #tpu.memory_space<vmem>>, vector<1x256xf32>
    %518 = vector.broadcast %517 : vector<1x256xf32> to vector<16x256xf32>
    %519 = arith.mulf %516, %518 : vector<16x256xf32>
    %520 = arith.truncf %519 : vector<16x256xf32> to vector<16x256xbf16>
    %c576_294 = arith.constant 576 : index
    %c0_295 = arith.constant 0 : index
    %521 = vector.load %arg8[%c576_294, %c0_295] : memref<784x256xbf16, #tpu.memory_space<vmem>>, vector<16x256xbf16>
    tpu.vector_store %arg8[%c576_294, %c0_295], %520 {strides = array<i32>} : memref<784x256xbf16, #tpu.memory_space<vmem>>, vector<16x256xbf16>,
    %c225_i32_296 = arith.constant 225 : i32
    %522 = tpu.dynamic_rotate %303 by %c225_i32_296 dim 1 : vector<16x256xf32>, i32 -> vector<16x256xf32>
    %c37_297 = arith.constant 37 : index
    %c0_298 = arith.constant 0 : index
    %523 = vector.load %arg2[%c37_297, %c0_298] : memref<49x256xf32, #tpu.memory_space<vmem>>, vector<1x256xf32>
    %524 = vector.broadcast %523 : vector<1x256xf32> to vector<16x256xf32>
    %525 = arith.mulf %522, %524 : vector<16x256xf32>
    %526 = arith.truncf %525 : vector<16x256xf32> to vector<16x256xbf16>
    %c592_299 = arith.constant 592 : index
    %c0_300 = arith.constant 0 : index
    %527 = vector.load %arg8[%c592_299, %c0_300] : memref<784x256xbf16, #tpu.memory_space<vmem>>, vector<16x256xbf16>
    tpu.vector_store %arg8[%c592_299, %c0_300], %526 {strides = array<i32>} : memref<784x256xbf16, #tpu.memory_space<vmem>>, vector<16x256xbf16>,
    %c224_i32_301 = arith.constant 224 : i32
    %528 = tpu.dynamic_rotate %303 by %c224_i32_301 dim 1 : vector<16x256xf32>, i32 -> vector<16x256xf32>
    %c38_302 = arith.constant 38 : index
    %c0_303 = arith.constant 0 : index
    %529 = vector.load %arg2[%c38_302, %c0_303] : memref<49x256xf32, #tpu.memory_space<vmem>>, vector<1x256xf32>
    %530 = vector.broadcast %529 : vector<1x256xf32> to vector<16x256xf32>
    %531 = arith.mulf %528, %530 : vector<16x256xf32>
    %532 = arith.truncf %531 : vector<16x256xf32> to vector<16x256xbf16>
    %c608_304 = arith.constant 608 : index
    %c0_305 = arith.constant 0 : index
    %533 = vector.load %arg8[%c608_304, %c0_305] : memref<784x256xbf16, #tpu.memory_space<vmem>>, vector<16x256xbf16>
    tpu.vector_store %arg8[%c608_304, %c0_305], %532 {strides = array<i32>} : memref<784x256xbf16, #tpu.memory_space<vmem>>, vector<16x256xbf16>,
    %c223_i32_306 = arith.constant 223 : i32
    %534 = tpu.dynamic_rotate %303 by %c223_i32_306 dim 1 : vector<16x256xf32>, i32 -> vector<16x256xf32>
    %c39_307 = arith.constant 39 : index
    %c0_308 = arith.constant 0 : index
    %535 = vector.load %arg2[%c39_307, %c0_308] : memref<49x256xf32, #tpu.memory_space<vmem>>, vector<1x256xf32>
    %536 = vector.broadcast %535 : vector<1x256xf32> to vector<16x256xf32>
    %537 = arith.mulf %534, %536 : vector<16x256xf32>
    %538 = arith.truncf %537 : vector<16x256xf32> to vector<16x256xbf16>
    %c624_309 = arith.constant 624 : index
    %c0_310 = arith.constant 0 : index
    %539 = vector.load %arg8[%c624_309, %c0_310] : memref<784x256xbf16, #tpu.memory_space<vmem>>, vector<16x256xbf16>
    tpu.vector_store %arg8[%c624_309, %c0_310], %538 {strides = array<i32>} : memref<784x256xbf16, #tpu.memory_space<vmem>>, vector<16x256xbf16>,
    %c222_i32_311 = arith.constant 222 : i32
    %540 = tpu.dynamic_rotate %303 by %c222_i32_311 dim 1 : vector<16x256xf32>, i32 -> vector<16x256xf32>
    %c40_312 = arith.constant 40 : index
    %c0_313 = arith.constant 0 : index
    %541 = vector.load %arg2[%c40_312, %c0_313] : memref<49x256xf32, #tpu.memory_space<vmem>>, vector<1x256xf32>
    %542 = vector.broadcast %541 : vector<1x256xf32> to vector<16x256xf32>
    %543 = arith.mulf %540, %542 : vector<16x256xf32>
    %544 = arith.truncf %543 : vector<16x256xf32> to vector<16x256xbf16>
    %c640_314 = arith.constant 640 : index
    %c0_315 = arith.constant 0 : index
    %545 = vector.load %arg8[%c640_314, %c0_315] : memref<784x256xbf16, #tpu.memory_space<vmem>>, vector<16x256xbf16>
    tpu.vector_store %arg8[%c640_314, %c0_315], %544 {strides = array<i32>} : memref<784x256xbf16, #tpu.memory_space<vmem>>, vector<16x256xbf16>,
    %c221_i32_316 = arith.constant 221 : i32
    %546 = tpu.dynamic_rotate %303 by %c221_i32_316 dim 1 : vector<16x256xf32>, i32 -> vector<16x256xf32>
    %c41_317 = arith.constant 41 : index
    %c0_318 = arith.constant 0 : index
    %547 = vector.load %arg2[%c41_317, %c0_318] : memref<49x256xf32, #tpu.memory_space<vmem>>, vector<1x256xf32>
    %548 = vector.broadcast %547 : vector<1x256xf32> to vector<16x256xf32>
    %549 = arith.mulf %546, %548 : vector<16x256xf32>
    %550 = arith.truncf %549 : vector<16x256xf32> to vector<16x256xbf16>
    %c656_319 = arith.constant 656 : index
    %c0_320 = arith.constant 0 : index
    %551 = vector.load %arg8[%c656_319, %c0_320] : memref<784x256xbf16, #tpu.memory_space<vmem>>, vector<16x256xbf16>
    tpu.vector_store %arg8[%c656_319, %c0_320], %550 {strides = array<i32>} : memref<784x256xbf16, #tpu.memory_space<vmem>>, vector<16x256xbf16>,
    %c211_i32_321 = arith.constant 211 : i32
    %552 = tpu.dynamic_rotate %303 by %c211_i32_321 dim 1 : vector<16x256xf32>, i32 -> vector<16x256xf32>
    %c42_322 = arith.constant 42 : index
    %c0_323 = arith.constant 0 : index
    %553 = vector.load %arg2[%c42_322, %c0_323] : memref<49x256xf32, #tpu.memory_space<vmem>>, vector<1x256xf32>
    %554 = vector.broadcast %553 : vector<1x256xf32> to vector<16x256xf32>
    %555 = arith.mulf %552, %554 : vector<16x256xf32>
    %556 = arith.truncf %555 : vector<16x256xf32> to vector<16x256xbf16>
    %c672_324 = arith.constant 672 : index
    %c0_325 = arith.constant 0 : index
    %557 = vector.load %arg8[%c672_324, %c0_325] : memref<784x256xbf16, #tpu.memory_space<vmem>>, vector<16x256xbf16>
    tpu.vector_store %arg8[%c672_324, %c0_325], %556 {strides = array<i32>} : memref<784x256xbf16, #tpu.memory_space<vmem>>, vector<16x256xbf16>,
    %c210_i32_326 = arith.constant 210 : i32
    %558 = tpu.dynamic_rotate %303 by %c210_i32_326 dim 1 : vector<16x256xf32>, i32 -> vector<16x256xf32>
    %c43_327 = arith.constant 43 : index
    %c0_328 = arith.constant 0 : index
    %559 = vector.load %arg2[%c43_327, %c0_328] : memref<49x256xf32, #tpu.memory_space<vmem>>, vector<1x256xf32>
    %560 = vector.broadcast %559 : vector<1x256xf32> to vector<16x256xf32>
    %561 = arith.mulf %558, %560 : vector<16x256xf32>
    %562 = arith.truncf %561 : vector<16x256xf32> to vector<16x256xbf16>
    %c688_329 = arith.constant 688 : index
    %c0_330 = arith.constant 0 : index
    %563 = vector.load %arg8[%c688_329, %c0_330] : memref<784x256xbf16, #tpu.memory_space<vmem>>, vector<16x256xbf16>
    tpu.vector_store %arg8[%c688_329, %c0_330], %562 {strides = array<i32>} : memref<784x256xbf16, #tpu.memory_space<vmem>>, vector<16x256xbf16>,
    %c209_i32_331 = arith.constant 209 : i32
    %564 = tpu.dynamic_rotate %303 by %c209_i32_331 dim 1 : vector<16x256xf32>, i32 -> vector<16x256xf32>
    %c44_332 = arith.constant 44 : index
    %c0_333 = arith.constant 0 : index
    %565 = vector.load %arg2[%c44_332, %c0_333] : memref<49x256xf32, #tpu.memory_space<vmem>>, vector<1x256xf32>
    %566 = vector.broadcast %565 : vector<1x256xf32> to vector<16x256xf32>
    %567 = arith.mulf %564, %566 : vector<16x256xf32>
    %568 = arith.truncf %567 : vector<16x256xf32> to vector<16x256xbf16>
    %c704_334 = arith.constant 704 : index
    %c0_335 = arith.constant 0 : index
    %569 = vector.load %arg8[%c704_334, %c0_335] : memref<784x256xbf16, #tpu.memory_space<vmem>>, vector<16x256xbf16>
    tpu.vector_store %arg8[%c704_334, %c0_335], %568 {strides = array<i32>} : memref<784x256xbf16, #tpu.memory_space<vmem>>, vector<16x256xbf16>,
    %c208_i32_336 = arith.constant 208 : i32
    %570 = tpu.dynamic_rotate %303 by %c208_i32_336 dim 1 : vector<16x256xf32>, i32 -> vector<16x256xf32>
    %c45_337 = arith.constant 45 : index
    %c0_338 = arith.constant 0 : index
    %571 = vector.load %arg2[%c45_337, %c0_338] : memref<49x256xf32, #tpu.memory_space<vmem>>, vector<1x256xf32>
    %572 = vector.broadcast %571 : vector<1x256xf32> to vector<16x256xf32>
    %573 = arith.mulf %570, %572 : vector<16x256xf32>
    %574 = arith.truncf %573 : vector<16x256xf32> to vector<16x256xbf16>
    %c720_339 = arith.constant 720 : index
    %c0_340 = arith.constant 0 : index
    %575 = vector.load %arg8[%c720_339, %c0_340] : memref<784x256xbf16, #tpu.memory_space<vmem>>, vector<16x256xbf16>
    tpu.vector_store %arg8[%c720_339, %c0_340], %574 {strides = array<i32>} : memref<784x256xbf16, #tpu.memory_space<vmem>>, vector<16x256xbf16>,
    %c207_i32_341 = arith.constant 207 : i32
    %576 = tpu.dynamic_rotate %303 by %c207_i32_341 dim 1 : vector<16x256xf32>, i32 -> vector<16x256xf32>
    %c46_342 = arith.constant 46 : index
    %c0_343 = arith.constant 0 : index
    %577 = vector.load %arg2[%c46_342, %c0_343] : memref<49x256xf32, #tpu.memory_space<vmem>>, vector<1x256xf32>
    %578 = vector.broadcast %577 : vector<1x256xf32> to vector<16x256xf32>
    %579 = arith.mulf %576, %578 : vector<16x256xf32>
    %580 = arith.truncf %579 : vector<16x256xf32> to vector<16x256xbf16>
    %c736_344 = arith.constant 736 : index
    %c0_345 = arith.constant 0 : index
    %581 = vector.load %arg8[%c736_344, %c0_345] : memref<784x256xbf16, #tpu.memory_space<vmem>>, vector<16x256xbf16>
    tpu.vector_store %arg8[%c736_344, %c0_345], %580 {strides = array<i32>} : memref<784x256xbf16, #tpu.memory_space<vmem>>, vector<16x256xbf16>,
    %c206_i32_346 = arith.constant 206 : i32
    %582 = tpu.dynamic_rotate %303 by %c206_i32_346 dim 1 : vector<16x256xf32>, i32 -> vector<16x256xf32>
    %c47_347 = arith.constant 47 : index
    %c0_348 = arith.constant 0 : index
    %583 = vector.load %arg2[%c47_347, %c0_348] : memref<49x256xf32, #tpu.memory_space<vmem>>, vector<1x256xf32>
    %584 = vector.broadcast %583 : vector<1x256xf32> to vector<16x256xf32>
    %585 = arith.mulf %582, %584 : vector<16x256xf32>
    %586 = arith.truncf %585 : vector<16x256xf32> to vector<16x256xbf16>
    %c752_349 = arith.constant 752 : index
    %c0_350 = arith.constant 0 : index
    %587 = vector.load %arg8[%c752_349, %c0_350] : memref<784x256xbf16, #tpu.memory_space<vmem>>, vector<16x256xbf16>
    tpu.vector_store %arg8[%c752_349, %c0_350], %586 {strides = array<i32>} : memref<784x256xbf16, #tpu.memory_space<vmem>>, vector<16x256xbf16>,
    %c205_i32_351 = arith.constant 205 : i32
    %588 = tpu.dynamic_rotate %303 by %c205_i32_351 dim 1 : vector<16x256xf32>, i32 -> vector<16x256xf32>
    %c48_352 = arith.constant 48 : index
    %c0_353 = arith.constant 0 : index
    %589 = vector.load %arg2[%c48_352, %c0_353] : memref<49x256xf32, #tpu.memory_space<vmem>>, vector<1x256xf32>
    %590 = vector.broadcast %589 : vector<1x256xf32> to vector<16x256xf32>
    %591 = arith.mulf %588, %590 : vector<16x256xf32>
    %592 = arith.truncf %591 : vector<16x256xf32> to vector<16x256xbf16>
    %c768_354 = arith.constant 768 : index
    %c0_355 = arith.constant 0 : index
    %593 = vector.load %arg8[%c768_354, %c0_355] : memref<784x256xbf16, #tpu.memory_space<vmem>>, vector<16x256xbf16>
    tpu.vector_store %arg8[%c768_354, %c0_355], %592 {strides = array<i32>} : memref<784x256xbf16, #tpu.memory_space<vmem>>, vector<16x256xbf16>,
    %c0_356 = arith.constant 0 : index
    %c0_357 = arith.constant 0 : index
    %594 = vector.load %arg5[%c0_356, %c0_357] : memref<16x784xbf16, #tpu.memory_space<vmem>>, vector<16x784xbf16>
    %c0_358 = arith.constant 0 : index
    %c0_359 = arith.constant 0 : index
    %595 = vector.load %arg8[%c0_358, %c0_359] : memref<784x256xbf16, #tpu.memory_space<vmem>>, vector<784x256xbf16>
    %cst_360 = arith.constant dense<0.000000e+00> : vector<16x256xf32>
    %596 = tpu.matmul %594, %595, %cst_360 {dimension_numbers = #tpu.dot_dimension_numbers<[1], [0], [0], [1], [0, 0, 1, 1], [], []>} : vector<16x784xbf16>, vector<784x256xbf16>, vector<16x256xf32> -> vector<16x256xf32>
    %c0_361 = arith.constant 0 : index
    %c0_362 = arith.constant 0 : index
    %597 = vector.load %arg6[%c0_361, %c0_362] : memref<16x1xf32, #tpu.memory_space<vmem>>, vector<16x1xf32>
    %598 = vector.broadcast %597 : vector<16x1xf32> to vector<16x256xf32>
    %599 = arith.addf %596, %598 : vector<16x256xf32>
    %c0_363 = arith.constant 0 : index
    %c16_364 = arith.constant 16 : index
    %c0_365 = arith.constant 0 : index
    %600 = vector.load %arg7[%c0_363, %c16_364, %c0_365] : memref<1x32x256xf32, #tpu.memory_space<vmem>>, vector<1x16x256xf32>
    %601 = vector.shape_cast %600 : vector<1x16x256xf32> to vector<16x256xf32>
    %602 = vector.shape_cast %599 : vector<16x256xf32> to vector<1x16x256xf32>
    tpu.vector_store %arg7[%c0_363, %c16_364, %c0_365], %602 {strides = array<i32>} : memref<1x32x256xf32, #tpu.memory_space<vmem>>, vector<1x16x256xf32>,
    return
  }
  func.func @transform_0(%arg0: i32) -> (i32, i32, i32) {
    %c0_i32 = arith.constant 0 : i32
    %c0_i32_0 = arith.constant 0 : i32
    %c0_i32_1 = arith.constant 0 : i32
    return %arg0, %c0_i32, %c0_i32_0 : i32, i32, i32
  }
  func.func @transform_1(%arg0: i32) -> (i32, i32) {
    %c0_i32 = arith.constant 0 : i32
    %c0_i32_0 = arith.constant 0 : i32
    %c0_i32_1 = arith.constant 0 : i32
    return %c0_i32, %c0_i32_0 : i32, i32
  }
  func.func @transform_2(%arg0: i32) -> (i32, i32) {
    %c0_i32 = arith.constant 0 : i32
    %c0_i32_0 = arith.constant 0 : i32
    %c0_i32_1 = arith.constant 0 : i32
    return %c0_i32, %c0_i32_0 : i32, i32
  }
  func.func @transform_3(%arg0: i32) -> (i32, i32) {
    %c0_i32 = arith.constant 0 : i32
    %c0_i32_0 = arith.constant 0 : i32
    %c0_i32_1 = arith.constant 0 : i32
    return %c0_i32, %c0_i32_0 : i32, i32
  }
  func.func @transform_4(%arg0: i32) -> (i32, i32) {
    %c0_i32 = arith.constant 0 : i32
    %c0_i32_0 = arith.constant 0 : i32
    %c0_i32_1 = arith.constant 0 : i32
    return %c0_i32, %c0_i32_0 : i32, i32
  }
  func.func @transform_5(%arg0: i32) -> (i32, i32) {
    %c0_i32 = arith.constant 0 : i32
    %c0_i32_0 = arith.constant 0 : i32
    %c0_i32_1 = arith.constant 0 : i32
    return %c0_i32, %c0_i32_0 : i32, i32
  }
  func.func @transform_6(%arg0: i32) -> (i32, i32, i32) {
    %c0_i32 = arith.constant 0 : i32
    %c0_i32_0 = arith.constant 0 : i32
    %c0_i32_1 = arith.constant 0 : i32
    return %arg0, %c0_i32, %c0_i32_0 : i32, i32, i32
  }
}

</mosaic_0001>

<bundles_post_ra>
// kernel: model_forward.1
= control target key start
LH: loop header
LB: loop body
LE: loop exit
PB: predicated region body
PF: predicated region fallthrough
CT: control target
= control target key end

     0   :  { %s4496_s21 = smov 0   ;;  %s6871_s0 = inlined_call_operand.vmem [shape: f32[2,16,256], index: 0, kind: input, shape index: {}]   ;;  %s6872_s1 = inlined_call_operand.vmem [shape: f32[49,256], index: 1, kind: input, shape index: {}]   ;;  %s6873_s2 = inlined_call_operand.vmem [shape: bf16[16,784], index: 2, kind: input, shape index: {}]   ;;  %s6874_s3 = inlined_call_operand.vmem [shape: f32[16,1], index: 3, kind: input, shape index: {}]   ;;  %s6875_s4 = inlined_call_operand.vmem [shape: bf16[16,784], index: 4, kind: input, shape index: {}]   ;;  %s6876_s5 = inlined_call_operand.vmem [shape: f32[16,1], index: 5, kind: input, shape index: {}]   ;;  %s6877_s6 = inlined_call_operand.vmem [shape: f32[2,32,256], index: 6, kind: output, shape index: {}]  }
   0x1 LB: > { %s4162_s22 = sadd.s32 4294967295, %s4410_s21   ;;  %p4166_p0 = scmp.ge.s32.totalorder %s4410_s21, 1  ;;  %s4410_s21 = sphi %s4496_s21, %s16_s21  }
   0x2   : > { %p212_p1 = scmp.lt.s32.totalorder %s4410_s21, 3 }
   0x4   : > { %p213_p2 = pnand %p4166_p0, %p212_p1 }
   0x6   : > { %216 = sbr.rel (%p213_p2) target bundleno = 1474 (0x5c2), region = 44 }
   0xd   : > { %p242_p3 = scmp.lt.s32.totalorder %s4162_s22, 1  ;;  %s4412_s27 = smov 51   ;;  %v265_v4 = vlaneseq  ;;  %v272_v8 = vld [vmem:[%s6872_s1] ss:$8 sm:$0x3] }
   0xe   : > { %s4413_s28 = smov 50   ;;  %s4414_s29 = smov 49   ;;  %v4171_v24 = vld [vmem:[%s6872_s1 + $0x1] ss:$8 sm:$0x3] }
   0xf   : > { %s7154_s22 = smov (!%p242_p3, %s4162_s22), 1  ;;  %s4415_s30 = smov 48   ;;  %v275_v5 = vshrl.u32 %v265_v4, 7  ;;  %v4636_v6 = vand.u32 127, %v265_v4  ;;  %v4378_v29 = vld [vmem:[%s6873_s2 + $0x4] ss:$28 sps:$4 sm:$0xff]  }
  0x10   : > { %s4283_s23 = sshll.u32 %s7154_s22, 5  ;;  %s4416_s7 = smov 47   ;;  %2083 = vmatprep.mubr.bf16.mxu0 %v4378_v29  ;;  %v4172_v42 = vld [vmem:[%s6872_s1 + $0x2] ss:$8 sm:$0x3] }
  0x11   : > { %s4510_s26 = scalar_lea.vmem %s6871_s0, %s4283_s23  ;;  %s4417_s8 = smov 46   ;;  %v4638_v7 = vsub.s32 1, %v275_v5  ;;  %v4647_v9 = vsub.s32 0, %v275_v5  ;;  %vm267_vm0 = vcmp.lt.s32.totalorder %v4636_v6, 51  ;;  %vm300_vm1 = vcmp.lt.s32.totalorder %v4636_v6, 50 }
  0x12   : > { %v4513_v0 = vld [vmem:[%s4510_s26 + $0x8] sm:$0xff]  ;;  %v4516_v1 = vld [vmem:[%s4510_s26] sm:$0xff]  ;;  %v4519_v2 = vld [vmem:[%s4510_s26 + $0x18] sm:$0xff]  ;;  %s4418_s9 = smov 45   ;;  %s4419_s10 = smov 35   ;;  %vm334_vm2 = vcmp.lt.s32.totalorder %v4636_v6, 49 }
  0x13   : > { %261 = vrot.lane.b32.xlu1 %v4513_v0, %s4412_s27  ;;  %257 = vrot.lane.b32.xlu0 %v4516_v1, %s4412_s27  ;;  %v4526_v3 = vld [vmem:[%s4510_s26 + $0x10] sm:$0xff]  ;;  %s4420_s11 = smov 34   ;;  %s4421_s12 = smov 33   ;;  %v281_v12 = vrot.slane %v272_v8, %v4638_v7  ;;  %v277_v14 = vrot.slane %v272_v8, %v4647_v9  ;;  %v311_v30 = vrot.slane %v4171_v24, %v4647_v9  ;;  %v4173_v59 = vld [vmem:[%s6872_s1 + $0x3] ss:$8 sm:$0x3] }
  0x14   : > { %s4422_s13 = smov 32   ;;  %s4423_s14 = smov 31   ;;  %v315_v31 = vrot.slane %v4171_v24, %v4638_v7  ;;  %v345_v47 = vrot.slane %v4172_v42, %v4647_v9  ;;  %v349_v48 = vrot.slane %v4172_v42, %v4638_v7  ;;  %vm368_vm3 = vcmp.lt.s32.totalorder %v4636_v6, 48 }
  0x15   : > { %s4424_s15 = smov 30   ;;  %s4425_s16 = smov 29   ;;  %v379_v4 = vrot.slane %v4173_v59, %v4647_v9  ;;  %v383_v5 = vrot.slane %v4173_v59, %v4638_v7  ;;  %vm402_vm4 = vcmp.lt.s32.totalorder %v4636_v6, 47  ;;  %vm436_vm5 = vcmp.lt.s32.totalorder %v4636_v6, 46 }
  0x16   : > { %s4426_s17 = smov 19   ;;  %s6975_s20 = smov 18   ;;  %vm470_vm6 = vcmp.lt.s32.totalorder %v4636_v6, 45  ;;  %vm504_vm7 = vcmp.lt.s32.totalorder %v4636_v6, 35  ;;  %vm538_vm8 = vcmp.lt.s32.totalorder %v4636_v6, 34  ;;  %vm572_vm9 = vcmp.lt.s32.totalorder %v4636_v6, 33 }
  0x17   : > { %263 = vrot.lane.b32.xlu1 %v4519_v2, %s4412_s27  ;;  %259 = vrot.lane.b32.xlu0 %v4526_v3, %s4412_s27  ;;  %s6905_s19 = smov 17   ;;  %s6903_s25 = smov 16   ;;  %vm606_vm10 = vcmp.lt.s32.totalorder %v4636_v6, 32  ;;  %vm640_vm11 = vcmp.lt.s32.totalorder %v4636_v6, 31  ;;  %vm674_vm12 = vcmp.lt.s32.totalorder %v4636_v6, 30  ;;  %vm708_vm13 = vcmp.lt.s32.totalorder %v4636_v6, 29 }
  0x18   : > { %s6878_s24 = smov 15   ;;  %s6880_s18 = smov 14   ;;  %vm6958_vm14 = vcmp.lt.s32.totalorder %v4636_v6, 19  ;;  %vm6902_vm15 = vcmp.lt.s32.totalorder %v4636_v6, 18 }
  0x19   : > { %s6909_s23 = smov 110  }
  0x1b   : > { %294 = vrot.lane.b32.xlu1 %v4526_v3, %s4413_s28  ;;  %292 = vrot.lane.b32.xlu0 %v4516_v1, %s4413_s28 }
  0x1f   : > { %298 = vrot.lane.b32.xlu1 %v4519_v2, %s4413_s28  ;;  %296 = vrot.lane.b32.xlu0 %v4513_v0, %s4413_s28 }
  0x23   : > { %328 = vrot.lane.b32.xlu1 %v4526_v3, %s4414_s29  ;;  %326 = vrot.lane.b32.xlu0 %v4516_v1, %s4414_s29 }
  0x27   : > { %332 = vrot.lane.b32.xlu1 %v4519_v2, %s4414_s29  ;;  %330 = vrot.lane.b32.xlu0 %v4513_v0, %s4414_s29 }
  0x2b   : > { %362 = vrot.lane.b32.xlu1 %v4526_v3, %s4415_s30  ;;  %360 = vrot.lane.b32.xlu0 %v4516_v1, %s4415_s30 }
  0x2f   : > { %366 = vrot.lane.b32.xlu1 %v4519_v2, %s4415_s30  ;;  %364 = vrot.lane.b32.xlu0 %v4513_v0, %s4415_s30 }
  0x33   : > { %396 = vrot.lane.b32.xlu1 %v4526_v3, %s4416_s7  ;;  %394 = vrot.lane.b32.xlu0 %v4516_v1, %s4416_s7 }
  0x37   : > { %400 = vrot.lane.b32.xlu1 %v4519_v2, %s4416_s7  ;;  %398 = vrot.lane.b32.xlu0 %v4513_v0, %s4416_s7 }
  0x3b   : > { %430 = vrot.lane.b32.xlu1 %v4526_v3, %s4417_s8  ;;  %428 = vrot.lane.b32.xlu0 %v4516_v1, %s4417_s8 }
  0x3f   : > { %434 = vrot.lane.b32.xlu1 %v4519_v2, %s4417_s8  ;;  %432 = vrot.lane.b32.xlu0 %v4513_v0, %s4417_s8 }
  0x43   : > { %464 = vrot.lane.b32.xlu1 %v4526_v3, %s4418_s9  ;;  %462 = vrot.lane.b32.xlu0 %v4516_v1, %s4418_s9 }
  0x47   : > { %468 = vrot.lane.b32.xlu1 %v4519_v2, %s4418_s9  ;;  %466 = vrot.lane.b32.xlu0 %v4513_v0, %s4418_s9 }
  0x4b   : > { %498 = vrot.lane.b32.xlu1 %v4526_v3, %s4419_s10  ;;  %496 = vrot.lane.b32.xlu0 %v4516_v1, %s4419_s10 }
  0x4f   : > { %502 = vrot.lane.b32.xlu1 %v4519_v2, %s4419_s10  ;;  %500 = vrot.lane.b32.xlu0 %v4513_v0, %s4419_s10 }
  0x53   : > { %532 = vrot.lane.b32.xlu1 %v4526_v3, %s4420_s11  ;;  %530 = vrot.lane.b32.xlu0 %v4516_v1, %s4420_s11 }
  0x57   : > { %536 = vrot.lane.b32.xlu1 %v4519_v2, %s4420_s11  ;;  %534 = vrot.lane.b32.xlu0 %v4513_v0, %s4420_s11 }
  0x5b   : > { %566 = vrot.lane.b32.xlu1 %v4526_v3, %s4421_s12  ;;  %564 = vrot.lane.b32.xlu0 %v4516_v1, %s4421_s12 }
  0x5f   : > { %570 = vrot.lane.b32.xlu1 %v4519_v2, %s4421_s12  ;;  %568 = vrot.lane.b32.xlu0 %v4513_v0, %s4421_s12 }
  0x63   : > { %600 = vrot.lane.b32.xlu1 %v4526_v3, %s4422_s13  ;;  %598 = vrot.lane.b32.xlu0 %v4516_v1, %s4422_s13 }
  0x67   : > { %604 = vrot.lane.b32.xlu1 %v4519_v2, %s4422_s13  ;;  %602 = vrot.lane.b32.xlu0 %v4513_v0, %s4422_s13 }
  0x6b   : > { %634 = vrot.lane.b32.xlu1 %v4526_v3, %s4423_s14  ;;  %632 = vrot.lane.b32.xlu0 %v4516_v1, %s4423_s14 }
  0x6f   : > { %638 = vrot.lane.b32.xlu1 %v4519_v2, %s4423_s14  ;;  %636 = vrot.lane.b32.xlu0 %v4513_v0, %s4423_s14 }
  0x73   : > { %668 = vrot.lane.b32.xlu1 %v4526_v3, %s4424_s15  ;;  %666 = vrot.lane.b32.xlu0 %v4516_v1, %s4424_s15 }
  0x77   : > { %672 = vrot.lane.b32.xlu1 %v4519_v2, %s4424_s15  ;;  %670 = vrot.lane.b32.xlu0 %v4513_v0, %s4424_s15 }
  0x7b   : > { %702 = vrot.lane.b32.xlu1 %v4526_v3, %s4425_s16  ;;  %700 = vrot.lane.b32.xlu0 %v4516_v1, %s4425_s16 }
  0x7f   : > { %706 = vrot.lane.b32.xlu1 %v4519_v2, %s4425_s16  ;;  %704 = vrot.lane.b32.xlu0 %v4513_v0, %s4425_s16 }
  0x83   : > { %736 = vrot.lane.b32.xlu1 %v4526_v3, %s4426_s17  ;;  %734 = vrot.lane.b32.xlu0 %v4516_v1, %s4426_s17 }
  0x85   : > { %v262_v10 = vpop.permute.xlu1 %261  ;;  %v258_v11 = vpop.permute.xlu0 %257 }
  0x86   : > { %v268_v13 = vsel %vm267_vm0, %v258_v11, %v262_v10  ;;  %v270_v15 = vsel %vm267_vm0, %v262_v10, %v258_v11 }
  0x87   : > { %740 = vrot.lane.b32.xlu1 %v4519_v2, %s4426_s17  ;;  %738 = vrot.lane.b32.xlu0 %v4513_v0, %s4426_s17  ;;  %v285_v20 = vmul.f32 %v281_v12, %v268_v13  ;;  %v284_v22 = vmul.f32 %v277_v14, %v270_v15 }
  0x89   : > { %v264_v16 = vpop.permute.xlu1 %263  ;;  %v260_v17 = vpop.permute.xlu0 %259 }
  0x8a   : > { %v271_v18 = vsel %vm267_vm0, %v264_v16, %v260_v17  ;;  %v269_v19 = vsel %vm267_vm0, %v260_v17, %v264_v16 }
  0x8b   : > { %770 = vrot.lane.b32.xlu1 %v4526_v3, %s6975_s20  ;;  %768 = vrot.lane.b32.xlu0 %v4516_v1, %s6975_s20  ;;  %v287_v21 = vmul.f32 %v281_v12, %v269_v19  ;;  %v286_v23 = vmul.f32 %v277_v14, %v271_v18  ;;  %v4174_v19 = vld [vmem:[%s6872_s1 + $0x4] ss:$8 sm:$0x3] }
  0x8c   : > { %v413_v24 = vrot.slane %v4174_v19, %v4647_v9 }
  0x8d   : > { %v295_v25 = vpop.permute.xlu1 %294  ;;  %v293_v26 = vpop.permute.xlu0 %292  ;;  %v289_v27 = vpack.c.bf16 %v287_v21, %v285_v20  ;;  %v288_v28 = vpack.c.bf16 %v286_v23, %v284_v22 }
  0x8f   : > { %774 = vrot.lane.b32.xlu1 %v4519_v2, %s6975_s20  ;;  %772 = vrot.lane.b32.xlu0 %v4513_v0, %s6975_s20 }
  0x90   : > { %2051 = vmatprep.subr.bf16.mxu0 %v289_v27 }
  0x91   : > { %2052 = vmatpush1.bf16.msra.mxu0 %v288_v28  ;;  %v299_v32 = vpop.permute.xlu1 %298  ;;  %v297_v33 = vpop.permute.xlu0 %296 }
  0x92   : > { %v302_v34 = vsel %vm300_vm1, %v295_v25, %v299_v32  ;;  %v304_v35 = vsel %vm300_vm1, %v299_v32, %v295_v25  ;;  %v301_v36 = vsel %vm300_vm1, %v293_v26, %v297_v33  ;;  %v303_v37 = vsel %vm300_vm1, %v297_v33, %v293_v26 }
  0x93   : > { %v320_v38 = vmul.f32 %v311_v30, %v304_v35  ;;  %v321_v39 = vmul.f32 %v315_v31, %v302_v34  ;;  %v318_v40 = vmul.f32 %v311_v30, %v303_v37  ;;  %v319_v41 = vmul.f32 %v315_v31, %v301_v36  ;;  %804 = vrot.lane.b32.xlu1 %v4526_v3, %s6905_s19  ;;  %v4175_v36 = vld [vmem:[%s6872_s1 + $0x5] ss:$8 sm:$0x3] }
  0x94   : > { %802 = vrot.lane.b32.xlu0 %v4516_v1, %s6905_s19  ;;  %v417_v25 = vrot.slane %v4174_v19, %v4638_v7  ;;  %v451_v42 = vrot.slane %v4175_v36, %v4638_v7 }
  0x95   : > { %v329_v43 = vpop.permute.xlu1 %328  ;;  %v327_v44 = vpop.permute.xlu0 %326  ;;  %v323_v45 = vpack.c.bf16 %v321_v39, %v319_v41  ;;  %v322_v46 = vpack.c.bf16 %v320_v38, %v318_v40  ;;  %v447_v41 = vrot.slane %v4175_v36, %v4647_v9 }
  0x97   : > { %808 = vrot.lane.b32.xlu1 %v4519_v2, %s6905_s19  ;;  %2053 = vmatprep.subr.bf16.mxu0 %v323_v45 }
  0x98   : > { %806 = vrot.lane.b32.xlu0 %v4513_v0, %s6905_s19  ;;  %2054 = vmatpush1.bf16.msra.mxu0 %v322_v46  ;;  %s6912_s19 = smov 109  }
  0x99   : > { %v333_v49 = vpop.permute.xlu1 %332  ;;  %v331_v50 = vpop.permute.xlu0 %330 }
  0x9a   : > { %v336_v51 = vsel %vm334_vm2, %v329_v43, %v333_v49  ;;  %v338_v52 = vsel %vm334_vm2, %v333_v49, %v329_v43  ;;  %v335_v53 = vsel %vm334_vm2, %v327_v44, %v331_v50  ;;  %v337_v54 = vsel %vm334_vm2, %v331_v50, %v327_v44 }
  0x9b   : > { %v354_v55 = vmul.f32 %v345_v47, %v338_v52  ;;  %v355_v56 = vmul.f32 %v349_v48, %v336_v51  ;;  %v352_v57 = vmul.f32 %v345_v47, %v337_v54  ;;  %v353_v58 = vmul.f32 %v349_v48, %v335_v53  ;;  %838 = vrot.lane.b32.xlu1 %v4526_v3, %s6903_s25  ;;  %v4176_v53 = vld [vmem:[%s6872_s1 + $0x6] ss:$8 sm:$0x3] }
  0x9c   : > { %836 = vrot.lane.b32.xlu0 %v4516_v1, %s6903_s25  ;;  %v485_v59 = vrot.slane %v4176_v53, %v4638_v7 }
  0x9d   : > { %v363_v60 = vpop.permute.xlu1 %362  ;;  %v361_v61 = vpop.permute.xlu0 %360  ;;  %v357_v62 = vpack.c.bf16 %v355_v56, %v353_v58  ;;  %v356_v63 = vpack.c.bf16 %v354_v55, %v352_v57  ;;  %v481_v58 = vrot.slane %v4176_v53, %v4647_v9 }
  0x9f   : > { %842 = vrot.lane.b32.xlu1 %v4519_v2, %s6903_s25  ;;  %2055 = vmatprep.subr.bf16.mxu0 %v357_v62 }
  0xa0   : > { %840 = vrot.lane.b32.xlu0 %v4513_v0, %s6903_s25  ;;  %2056 = vmatpush1.bf16.msra.mxu0 %v356_v63  ;;  %s6973_s25 = smov 77  }
  0xa1   : > { %v367_v8 = vpop.permute.xlu1 %366  ;;  %v365_v10 = vpop.permute.xlu0 %364 }
  0xa2   : > { %v370_v11 = vsel %vm368_vm3, %v363_v60, %v367_v8  ;;  %v372_v12 = vsel %vm368_vm3, %v367_v8, %v363_v60  ;;  %v369_v13 = vsel %vm368_vm3, %v361_v61, %v365_v10  ;;  %v371_v14 = vsel %vm368_vm3, %v365_v10, %v361_v61 }
  0xa3   : > { %v388_v15 = vmul.f32 %v379_v4, %v372_v12  ;;  %v389_v16 = vmul.f32 %v383_v5, %v370_v11  ;;  %v386_v17 = vmul.f32 %v379_v4, %v371_v14  ;;  %v387_v18 = vmul.f32 %v383_v5, %v369_v13  ;;  %872 = vrot.lane.b32.xlu1 %v4526_v3, %s6878_s24  ;;  %v4177_v13 = vld [vmem:[%s6872_s1 + $0x7] ss:$8 sm:$0x3] }
  0xa4   : > { %870 = vrot.lane.b32.xlu0 %v4516_v1, %s6878_s24  ;;  %v519_v19 = vrot.slane %v4177_v13, %v4638_v7 }
  0xa5   : > { %v397_v20 = vpop.permute.xlu1 %396  ;;  %v395_v21 = vpop.permute.xlu0 %394  ;;  %v391_v22 = vpack.c.bf16 %v389_v16, %v387_v18  ;;  %v390_v23 = vpack.c.bf16 %v388_v15, %v386_v17  ;;  %v515_v18 = vrot.slane %v4177_v13, %v4647_v9 }
  0xa7   : > { %876 = vrot.lane.b32.xlu1 %v4519_v2, %s6878_s24  ;;  %2057 = vmatprep.subr.bf16.mxu0 %v391_v22 }
  0xa8   : > { %874 = vrot.lane.b32.xlu0 %v4513_v0, %s6878_s24  ;;  %2058 = vmatpush1.bf16.msra.mxu0 %v390_v23  ;;  %s6882_s24 = smov 13  }
  0xa9   : > { %v401_v26 = vpop.permute.xlu1 %400  ;;  %v399_v27 = vpop.permute.xlu0 %398 }
  0xaa   : > { %v404_v28 = vsel %vm402_vm4, %v397_v20, %v401_v26  ;;  %v406_v29 = vsel %vm402_vm4, %v401_v26, %v397_v20  ;;  %v403_v30 = vsel %vm402_vm4, %v395_v21, %v399_v27  ;;  %v405_v31 = vsel %vm402_vm4, %v399_v27, %v395_v21 }
  0xab   : > { %v422_v32 = vmul.f32 %v413_v24, %v406_v29  ;;  %v423_v33 = vmul.f32 %v417_v25, %v404_v28  ;;  %v420_v34 = vmul.f32 %v413_v24, %v405_v31  ;;  %v421_v35 = vmul.f32 %v417_v25, %v403_v30  ;;  %906 = vrot.lane.b32.xlu1 %v4526_v3, %s6880_s18  ;;  %v4178_v30 = vld [vmem:[%s6872_s1 + $0x10] ss:$8 sm:$0x3] }
  0xac   : > { %904 = vrot.lane.b32.xlu0 %v4516_v1, %s6880_s18  ;;  %v553_v36 = vrot.slane %v4178_v30, %v4638_v7 }
  0xad   : > { %v431_v37 = vpop.permute.xlu1 %430  ;;  %v429_v38 = vpop.permute.xlu0 %428  ;;  %v425_v39 = vpack.c.bf16 %v423_v33, %v421_v35  ;;  %v424_v40 = vpack.c.bf16 %v422_v32, %v420_v34  ;;  %v549_v35 = vrot.slane %v4178_v30, %v4647_v9 }
  0xaf   : > { %910 = vrot.lane.b32.xlu1 %v4519_v2, %s6880_s18  ;;  %2059 = vmatprep.subr.bf16.mxu0 %v425_v39 }
  0xb0   : > { %908 = vrot.lane.b32.xlu0 %v4513_v0, %s6880_s18  ;;  %2060 = vmatpush1.bf16.msra.mxu0 %v424_v40  ;;  %s6884_s18 = smov 3  }
  0xb1   : > { %v435_v43 = vpop.permute.xlu1 %434  ;;  %v433_v44 = vpop.permute.xlu0 %432 }
  0xb2   : > { %v438_v45 = vsel %vm436_vm5, %v431_v37, %v435_v43  ;;  %v440_v46 = vsel %vm436_vm5, %v435_v43, %v431_v37  ;;  %v437_v47 = vsel %vm436_vm5, %v429_v38, %v433_v44  ;;  %v439_v48 = vsel %vm436_vm5, %v433_v44, %v429_v38 }
  0xb3   : > { %v456_v49 = vmul.f32 %v447_v41, %v440_v46  ;;  %v457_v50 = vmul.f32 %v451_v42, %v438_v45  ;;  %v454_v51 = vmul.f32 %v447_v41, %v439_v48  ;;  %v455_v52 = vmul.f32 %v451_v42, %v437_v47  ;;  %940 = vrot.lane.b32.xlu1 %v4526_v3, %s6882_s24  ;;  %v4179_v47 = vld [vmem:[%s6872_s1 + $0x11] ss:$8 sm:$0x3] }
  0xb4   : > { %938 = vrot.lane.b32.xlu0 %v4516_v1, %s6882_s24  ;;  %v587_v53 = vrot.slane %v4179_v47, %v4638_v7 }
  0xb5   : > { %v465_v54 = vpop.permute.xlu1 %464  ;;  %v463_v55 = vpop.permute.xlu0 %462  ;;  %v459_v56 = vpack.c.bf16 %v457_v50, %v455_v52  ;;  %v458_v57 = vpack.c.bf16 %v456_v49, %v454_v51  ;;  %v583_v52 = vrot.slane %v4179_v47, %v4647_v9 }
  0xb7   : > { %944 = vrot.lane.b32.xlu1 %v4519_v2, %s6882_s24  ;;  %2061 = vmatprep.subr.bf16.mxu0 %v459_v56 }
  0xb8   : > { %942 = vrot.lane.b32.xlu0 %v4513_v0, %s6882_s24  ;;  %2062 = vmatpush1.bf16.msra.mxu0 %v458_v57  ;;  %s6886_s24 = smov 2  }
  0xb9   : > { %v469_v60 = vpop.permute.xlu1 %468  ;;  %v467_v61 = vpop.permute.xlu0 %466 }
  0xba   : > { %v472_v62 = vsel %vm470_vm6, %v465_v54, %v469_v60  ;;  %v474_v63 = vsel %vm470_vm6, %v469_v60, %v465_v54  ;;  %v471_v4 = vsel %vm470_vm6, %v463_v55, %v467_v61  ;;  %v473_v5 = vsel %vm470_vm6, %v467_v61, %v463_v55 }
  0xbb   : > { %v490_v8 = vmul.f32 %v481_v58, %v474_v63  ;;  %v491_v10 = vmul.f32 %v485_v59, %v472_v62  ;;  %v488_v11 = vmul.f32 %v481_v58, %v473_v5  ;;  %v489_v12 = vmul.f32 %v485_v59, %v471_v4  ;;  %974 = vrot.lane.b32.xlu1 %v4526_v3, %s6884_s18  ;;  %v4180_v4 = vld [vmem:[%s6872_s1 + $0x12] ss:$8 sm:$0x3] }
  0xbc   : > { %972 = vrot.lane.b32.xlu0 %v4516_v1, %s6884_s18  ;;  %v621_v13 = vrot.slane %v4180_v4, %v4638_v7 }
  0xbd   : > { %v499_v14 = vpop.permute.xlu1 %498  ;;  %v497_v15 = vpop.permute.xlu0 %496  ;;  %v493_v16 = vpack.c.bf16 %v491_v10, %v489_v12  ;;  %v492_v17 = vpack.c.bf16 %v490_v8, %v488_v11  ;;  %v617_v12 = vrot.slane %v4180_v4, %v4647_v9 }
  0xbf   : > { %978 = vrot.lane.b32.xlu1 %v4519_v2, %s6884_s18  ;;  %2063 = vmatprep.subr.bf16.mxu0 %v493_v16 }
  0xc0   : > { %976 = vrot.lane.b32.xlu0 %v4513_v0, %s6884_s18  ;;  %2064 = vmatpush1.bf16.msra.mxu0 %v492_v17  ;;  %s6888_s18 = smov 1  }
  0xc1   : > { %v503_v20 = vpop.permute.xlu1 %502  ;;  %v501_v21 = vpop.permute.xlu0 %500 }
  0xc2   : > { %v506_v22 = vsel %vm504_vm7, %v499_v14, %v503_v20  ;;  %v508_v23 = vsel %vm504_vm7, %v503_v20, %v499_v14  ;;  %v505_v24 = vsel %vm504_vm7, %v497_v15, %v501_v21  ;;  %v507_v25 = vsel %vm504_vm7, %v501_v21, %v497_v15 }
  0xc3   : > { %v524_v26 = vmul.f32 %v515_v18, %v508_v23  ;;  %v525_v27 = vmul.f32 %v519_v19, %v506_v22  ;;  %v522_v28 = vmul.f32 %v515_v18, %v507_v25  ;;  %v523_v29 = vmul.f32 %v519_v19, %v505_v24  ;;  %1008 = vrot.lane.b32.xlu1 %v4526_v3, %s6886_s24  ;;  %v4181_v24 = vld [vmem:[%s6872_s1 + $0x13] ss:$8 sm:$0x3] }
  0xc4   : > { %1006 = vrot.lane.b32.xlu0 %v4516_v1, %s6886_s24  ;;  %v655_v30 = vrot.slane %v4181_v24, %v4638_v7 }
  0xc5   : > { %v533_v31 = vpop.permute.xlu1 %532  ;;  %v531_v32 = vpop.permute.xlu0 %530  ;;  %v527_v33 = vpack.c.bf16 %v525_v27, %v523_v29  ;;  %v526_v34 = vpack.c.bf16 %v524_v26, %v522_v28  ;;  %v651_v29 = vrot.slane %v4181_v24, %v4647_v9 }
  0xc7   : > { %1012 = vrot.lane.b32.xlu1 %v4519_v2, %s6886_s24  ;;  %2065 = vmatprep.subr.bf16.mxu0 %v527_v33 }
  0xc8   : > { %1010 = vrot.lane.b32.xlu0 %v4513_v0, %s6886_s24  ;;  %2066 = vmatpush1.bf16.msra.mxu0 %v526_v34  ;;  %s6890_s24 = smov 127  }
  0xc9   : > { %v537_v37 = vpop.permute.xlu1 %536  ;;  %v535_v38 = vpop.permute.xlu0 %534 }
  0xca   : > { %v540_v39 = vsel %vm538_vm8, %v533_v31, %v537_v37  ;;  %v542_v40 = vsel %vm538_vm8, %v537_v37, %v533_v31  ;;  %v539_v41 = vsel %vm538_vm8, %v531_v32, %v535_v38  ;;  %v541_v42 = vsel %vm538_vm8, %v535_v38, %v531_v32 }
  0xcb   : > { %v558_v43 = vmul.f32 %v549_v35, %v542_v40  ;;  %v559_v44 = vmul.f32 %v553_v36, %v540_v39  ;;  %v556_v45 = vmul.f32 %v549_v35, %v541_v42  ;;  %v557_v46 = vmul.f32 %v553_v36, %v539_v41  ;;  %1042 = vrot.lane.b32.xlu1 %v4526_v3, %s6888_s18  ;;  %v4182_v41 = vld [vmem:[%s6872_s1 + $0x14] ss:$8 sm:$0x3] }
  0xcc   : > { %1040 = vrot.lane.b32.xlu0 %v4516_v1, %s6888_s18  ;;  %v689_v47 = vrot.slane %v4182_v41, %v4638_v7 }
  0xcd   : > { %v567_v48 = vpop.permute.xlu1 %566  ;;  %v565_v49 = vpop.permute.xlu0 %564  ;;  %v561_v50 = vpack.c.bf16 %v559_v44, %v557_v46  ;;  %v560_v51 = vpack.c.bf16 %v558_v43, %v556_v45  ;;  %v685_v46 = vrot.slane %v4182_v41, %v4647_v9 }
  0xcf   : > { %1046 = vrot.lane.b32.xlu1 %v4519_v2, %s6888_s18  ;;  %2067 = vmatprep.subr.bf16.mxu0 %v561_v50 }
  0xd0   : > { %1044 = vrot.lane.b32.xlu0 %v4513_v0, %s6888_s18  ;;  %2068 = vmatpush1.bf16.msra.mxu0 %v560_v51  ;;  %s6892_s18 = smov 126  }
  0xd1   : > { %v571_v54 = vpop.permute.xlu1 %570  ;;  %v569_v55 = vpop.permute.xlu0 %568 }
  0xd2   : > { %v574_v56 = vsel %vm572_vm9, %v567_v48, %v571_v54  ;;  %v576_v57 = vsel %vm572_vm9, %v571_v54, %v567_v48  ;;  %v573_v58 = vsel %vm572_vm9, %v565_v49, %v569_v55  ;;  %v575_v59 = vsel %vm572_vm9, %v569_v55, %v565_v49 }
  0xd3   : > { %v592_v60 = vmul.f32 %v583_v52, %v576_v57  ;;  %v593_v61 = vmul.f32 %v587_v53, %v574_v56  ;;  %v590_v62 = vmul.f32 %v583_v52, %v575_v59  ;;  %v591_v63 = vmul.f32 %v587_v53, %v573_v58  ;;  %1080 = vrot.lane.b32.xlu1 %v4526_v3, %s6890_s24  ;;  %v4183_v58 = vld [vmem:[%s6872_s1 + $0x15] ss:$8 sm:$0x3] }
  0xd4   : > { %1078 = vrot.lane.b32.xlu0 %v4516_v1, %s6890_s24  ;;  %v723_v4 = vrot.slane %v4183_v58, %v4638_v7 }
  0xd5   : > { %v601_v5 = vpop.permute.xlu1 %600  ;;  %v599_v8 = vpop.permute.xlu0 %598  ;;  %v595_v10 = vpack.c.bf16 %v593_v61, %v591_v63  ;;  %v594_v11 = vpack.c.bf16 %v592_v60, %v590_v62  ;;  %v719_v63 = vrot.slane %v4183_v58, %v4647_v9 }
  0xd7   : > { %1084 = vrot.lane.b32.xlu1 %v4519_v2, %s6890_s24  ;;  %2069 = vmatprep.subr.bf16.mxu0 %v595_v10 }
  0xd8   : > { %1082 = vrot.lane.b32.xlu0 %v4513_v0, %s6890_s24  ;;  %2070 = vmatpush1.bf16.msra.mxu0 %v594_v11  ;;  %s6894_s24 = smov 125  }
  0xd9   : > { %v605_v14 = vpop.permute.xlu1 %604  ;;  %v603_v15 = vpop.permute.xlu0 %602 }
  0xda   : > { %v608_v16 = vsel %vm606_vm10, %v601_v5, %v605_v14  ;;  %v610_v17 = vsel %vm606_vm10, %v605_v14, %v601_v5  ;;  %v607_v18 = vsel %vm606_vm10, %v599_v8, %v603_v15  ;;  %v609_v19 = vsel %vm606_vm10, %v603_v15, %v599_v8 }
  0xdb   : > { %v626_v20 = vmul.f32 %v617_v12, %v610_v17  ;;  %v627_v21 = vmul.f32 %v621_v13, %v608_v16  ;;  %v624_v22 = vmul.f32 %v617_v12, %v609_v19  ;;  %v625_v23 = vmul.f32 %v621_v13, %v607_v18  ;;  %1114 = vrot.lane.b32.xlu1 %v4526_v3, %s6892_s18  ;;  %v4184_v18 = vld [vmem:[%s6872_s1 + $0x16] ss:$8 sm:$0x3] }
  0xdc   : > { %1112 = vrot.lane.b32.xlu0 %v4516_v1, %s6892_s18  ;;  %v757_v24 = vrot.slane %v4184_v18, %v4638_v7 }
  0xdd   : > { %v635_v25 = vpop.permute.xlu1 %634  ;;  %v633_v26 = vpop.permute.xlu0 %632  ;;  %v629_v27 = vpack.c.bf16 %v627_v21, %v625_v23  ;;  %v628_v28 = vpack.c.bf16 %v626_v20, %v624_v22  ;;  %v753_v23 = vrot.slane %v4184_v18, %v4647_v9  ;;  %v5041_v18 = vld [vmem:[%s4510_s26 + $0x8] sm:$0xff] }
  0xdf   : > { %1118 = vrot.lane.b32.xlu1 %v4519_v2, %s6892_s18  ;;  %2071 = vmatprep.subr.bf16.mxu0 %v629_v27 }
  0xe0   : > { %1116 = vrot.lane.b32.xlu0 %v4513_v0, %s6892_s18  ;;  %2072 = vmatpush1.bf16.msra.mxu0 %v628_v28  ;;  %s6896_s18 = smov 115  }
  0xe1   : > { %v639_v31 = vpop.permute.xlu1 %638  ;;  %v637_v32 = vpop.permute.xlu0 %636 }
  0xe2   : > { %v642_v33 = vsel %vm640_vm11, %v635_v25, %v639_v31  ;;  %v644_v34 = vsel %vm640_vm11, %v639_v31, %v635_v25  ;;  %v641_v35 = vsel %vm640_vm11, %v633_v26, %v637_v32  ;;  %v643_v36 = vsel %vm640_vm11, %v637_v32, %v633_v26 }
  0xe3   : > { %v660_v37 = vmul.f32 %v651_v29, %v644_v34  ;;  %v661_v38 = vmul.f32 %v655_v30, %v642_v33  ;;  %v658_v39 = vmul.f32 %v651_v29, %v643_v36  ;;  %v659_v40 = vmul.f32 %v655_v30, %v641_v35  ;;  %1148 = vrot.lane.b32.xlu1 %v4526_v3, %s6894_s24  ;;  %v4185_v35 = vld [vmem:[%s6872_s1 + $0x17] ss:$8 sm:$0x3] }
  0xe4   : > { %1146 = vrot.lane.b32.xlu0 %v4516_v1, %s6894_s24  ;;  %v791_v41 = vrot.slane %v4185_v35, %v4638_v7 }
  0xe5   : > { %v669_v42 = vpop.permute.xlu1 %668  ;;  %v667_v43 = vpop.permute.xlu0 %666  ;;  %v663_v44 = vpack.c.bf16 %v661_v38, %v659_v40  ;;  %v662_v45 = vpack.c.bf16 %v660_v37, %v658_v39  ;;  %v787_v40 = vrot.slane %v4185_v35, %v4647_v9 }
  0xe7   : > { %1152 = vrot.lane.b32.xlu1 %v4519_v2, %s6894_s24  ;;  %2073 = vmatprep.subr.bf16.mxu0 %v663_v44 }
  0xe8   : > { %1150 = vrot.lane.b32.xlu0 %v4513_v0, %s6894_s24  ;;  %2074 = vmatpush1.bf16.msra.mxu0 %v662_v45  ;;  %s6898_s24 = smov 114  }
  0xe9   : > { %v673_v48 = vpop.permute.xlu1 %672  ;;  %v671_v49 = vpop.permute.xlu0 %670 }
  0xea   : > { %v676_v50 = vsel %vm674_vm12, %v669_v42, %v673_v48  ;;  %v678_v51 = vsel %vm674_vm12, %v673_v48, %v669_v42  ;;  %v675_v52 = vsel %vm674_vm12, %v667_v43, %v671_v49  ;;  %v677_v53 = vsel %vm674_vm12, %v671_v49, %v667_v43 }
  0xeb   : > { %v694_v54 = vmul.f32 %v685_v46, %v678_v51  ;;  %v695_v55 = vmul.f32 %v689_v47, %v676_v50  ;;  %v692_v56 = vmul.f32 %v685_v46, %v677_v53  ;;  %v693_v57 = vmul.f32 %v689_v47, %v675_v52  ;;  %1182 = vrot.lane.b32.xlu1 %v4526_v3, %s6896_s18  ;;  %v4186_v52 = vld [vmem:[%s6872_s1 + $0x20] ss:$8 sm:$0x3] }
  0xec   : > { %1180 = vrot.lane.b32.xlu0 %v4516_v1, %s6896_s18  ;;  %v825_v58 = vrot.slane %v4186_v52, %v4638_v7 }
  0xed   : > { %v703_v59 = vpop.permute.xlu1 %702  ;;  %v701_v60 = vpop.permute.xlu0 %700  ;;  %v697_v61 = vpack.c.bf16 %v695_v55, %v693_v57  ;;  %v696_v62 = vpack.c.bf16 %v694_v54, %v692_v56  ;;  %v821_v57 = vrot.slane %v4186_v52, %v4647_v9 }
  0xef   : > { %1186 = vrot.lane.b32.xlu1 %v4519_v2, %s6896_s18  ;;  %2075 = vmatprep.subr.bf16.mxu0 %v697_v61 }
  0xf0   : > { %1184 = vrot.lane.b32.xlu0 %v4513_v0, %s6896_s18  ;;  %2076 = vmatpush1.bf16.msra.mxu0 %v696_v62  ;;  %s6900_s18 = smov 113  }
  0xf1   : > { %v707_v5 = vpop.permute.xlu1 %706  ;;  %v705_v8 = vpop.permute.xlu0 %704 }
  0xf2   : > { %v710_v10 = vsel %vm708_vm13, %v703_v59, %v707_v5  ;;  %v712_v11 = vsel %vm708_vm13, %v707_v5, %v703_v59  ;;  %v709_v12 = vsel %vm708_vm13, %v701_v60, %v705_v8  ;;  %v711_v13 = vsel %vm708_vm13, %v705_v8, %v701_v60  ;;  %v4376_v59 = vld [vmem:[%s6873_s2] ss:$28 sps:$4 sm:$0xff]  }
  0xf3   : > { %v728_v14 = vmul.f32 %v719_v63, %v712_v11  ;;  %v729_v15 = vmul.f32 %v723_v4, %v710_v10  ;;  %v726_v16 = vmul.f32 %v719_v63, %v711_v13  ;;  %v727_v17 = vmul.f32 %v723_v4, %v709_v12  ;;  %1216 = vrot.lane.b32.xlu1 %v4526_v3, %s6898_s24  ;;  %v4187_v12 = vld [vmem:[%s6872_s1 + $0x21] ss:$8 sm:$0x3] }
  0xf4   : > { %1214 = vrot.lane.b32.xlu0 %v4516_v1, %s6898_s24 }
  0xf5   : > { %v737_v19 = vpop.permute.xlu1 %736  ;;  %v735_v20 = vpop.permute.xlu0 %734  ;;  %v731_v21 = vpack.c.bf16 %v729_v15, %v727_v17  ;;  %v730_v22 = vpack.c.bf16 %v728_v14, %v726_v16  ;;  %v5033_v17 = vld [vmem:[%s4510_s26 + $0x18] sm:$0xff] }
  0xf7   : > { %1220 = vrot.lane.b32.xlu1 %v4519_v2, %s6898_s24  ;;  %2077 = vmatprep.subr.bf16.mxu0 %v731_v21 }
  0xf8   : > { %1218 = vrot.lane.b32.xlu0 %v4513_v0, %s6898_s24  ;;  %2078 = vmatpush1.bf16.msra.mxu0 %v730_v22  ;;  %s6950_s24 = smov 112  }
  0xf9   : > { %v741_v25 = vpop.permute.xlu1 %740  ;;  %v739_v26 = vpop.permute.xlu0 %738 }
  0xfa   : > { %v744_v27 = vsel %vm6958_vm14, %v737_v19, %v741_v25  ;;  %v746_v28 = vsel %vm6958_vm14, %v741_v25, %v737_v19  ;;  %v743_v29 = vsel %vm6958_vm14, %v735_v20, %v739_v26  ;;  %v745_v30 = vsel %vm6958_vm14, %v739_v26, %v735_v20 }
  0xfb   : > { %v762_v31 = vmul.f32 %v753_v23, %v746_v28  ;;  %v763_v32 = vmul.f32 %v757_v24, %v744_v27  ;;  %v760_v33 = vmul.f32 %v753_v23, %v745_v30  ;;  %v761_v34 = vmul.f32 %v757_v24, %v743_v29  ;;  %1250 = vrot.lane.b32.xlu1 %v4526_v3, %s6900_s18  ;;  %v5054_v27 = vld [vmem:[%s4510_s26 + $0x10] sm:$0xff]  ;;  %v5059_v30 = vld [vmem:[%s4510_s26] sm:$0xff] }
  0xfc   : > { %1248 = vrot.lane.b32.xlu0 %v4516_v1, %s6900_s18  ;;  %vm6960_vm14 = vcmp.lt.s32.totalorder %v4636_v6, 99 }
  0xfd   : > { %v771_v36 = vpop.permute.xlu1 %770  ;;  %v769_v37 = vpop.permute.xlu0 %768  ;;  %v765_v38 = vpack.c.bf16 %v763_v32, %v761_v34  ;;  %v764_v39 = vpack.c.bf16 %v762_v31, %v760_v33  ;;  %v4188_v31 = vld [vmem:[%s6872_s1 + $0x22] ss:$8 sm:$0x3] }
  0xff   : > { %1254 = vrot.lane.b32.xlu1 %v4519_v2, %s6900_s18  ;;  %2079 = vmatprep.subr.bf16.mxu0 %v765_v38 }
 0x100   : > { %1252 = vrot.lane.b32.xlu0 %v4513_v0, %s6900_s18  ;;  %2080 = vmatpush1.bf16.msra.mxu0 %v764_v39  ;;  %s6948_s18 = smov 111  }
 0x101   : > { %v775_v42 = vpop.permute.xlu1 %774  ;;  %v773_v43 = vpop.permute.xlu0 %772 }
 0x102   : > { %v778_v44 = vsel %vm6902_vm15, %v771_v36, %v775_v42  ;;  %v780_v45 = vsel %vm6902_vm15, %v775_v42, %v771_v36  ;;  %v777_v46 = vsel %vm6902_vm15, %v769_v37, %v773_v43  ;;  %v779_v47 = vsel %vm6902_vm15, %v773_v43, %v769_v37 }
 0x103   : > { %v796_v48 = vmul.f32 %v787_v40, %v780_v45  ;;  %v797_v49 = vmul.f32 %v791_v41, %v778_v44  ;;  %v794_v50 = vmul.f32 %v787_v40, %v779_v47  ;;  %v795_v51 = vmul.f32 %v791_v41, %v777_v46  ;;  %1284 = vrot.lane.b32.xlu1 %v4526_v3, %s6950_s24 }
 0x104   : > { %1282 = vrot.lane.b32.xlu0 %v4516_v1, %s6950_s24  ;;  %vm6907_vm15 = vcmp.lt.s32.totalorder %v4636_v6, 17  ;;  %v889_v36 = vrot.slane %v4188_v31, %v4647_v9  ;;  %v893_v37 = vrot.slane %v4188_v31, %v4638_v7 }
 0x105   : > { %v805_v53 = vpop.permute.xlu1 %804  ;;  %v799_v54 = vpack.c.bf16 %v797_v49, %v795_v51  ;;  %v798_v55 = vpack.c.bf16 %v796_v48, %v794_v50  ;;  %v4189_v48 = vld [vmem:[%s6872_s1 + $0x23] ss:$8 sm:$0x3] }
 0x106   : > { %v803_v56 = vpop.permute.xlu0 %802 }
 0x107   : > { %1288 = vrot.lane.b32.xlu1 %v4519_v2, %s6950_s24  ;;  %2081 = vmatprep.subr.bf16.mxu0 %v799_v54  ;;  %v4381_v2 = vld [vmem:[%s6873_s2 + $0xc] ss:$28 sps:$4 sm:$0xff]   ;;  %v927_v54 = vrot.slane %v4189_v48, %v4638_v7 }
 0x108   : > { %1286 = vrot.lane.b32.xlu0 %v4513_v0, %s6950_s24  ;;  %2082 = vmatpush1.bf16.msra.mxu0 %v798_v55  ;;  %s6984_s24 = smov 15  }
 0x109   : > { %v809_v60 = vpop.permute.xlu1 %808 }
 0x10a   : > { %v812_v61 = vsel %vm6907_vm15, %v805_v53, %v809_v60  ;;  %v814_v62 = vsel %vm6907_vm15, %v809_v60, %v805_v53  ;;  %v807_v63 = vpop.permute.xlu0 %806  ;;  %v923_v53 = vrot.slane %v4189_v48, %v4647_v9 }
 0x10b   : > { %v830_v4 = vmul.f32 %v821_v57, %v814_v62  ;;  %v831_v0 = vmul.f32 %v825_v58, %v812_v61  ;;  %v811_v5 = vsel %vm6907_vm15, %v803_v56, %v807_v63  ;;  %v813_v8 = vsel %vm6907_vm15, %v807_v63, %v803_v56  ;;  %1318 = vrot.lane.b32.xlu1 %v4526_v3, %s6948_s18 }
 0x10c   : > { %v828_v10 = vmul.f32 %v821_v57, %v813_v8  ;;  %v829_v11 = vmul.f32 %v825_v58, %v811_v5  ;;  %1316 = vrot.lane.b32.xlu0 %v4516_v1, %s6948_s18  ;;  %2084 = vmatmul.mubr.bf16.vlgmr.msra.gmra.mrb[0].mxu0 %v4376_v59  ;;  %vm6908_vm15 = vcmp.lt.s32.totalorder %v4636_v6, 16  ;;  %v855_v1 = vrot.slane %v4187_v12, %v4647_v9 }
 0x10d   : > { %v839_v13 = vpop.permute.xlu1 %838  ;;  %2126 = vmatprep.mubr.bf16.mxu0 %v4381_v2  ;;  %v859_v3 = vrot.slane %v4187_v12, %v4638_v7 }
 0x10e   : > { %v832_v14 = vpack.c.bf16 %v830_v4, %v828_v10  ;;  %v837_v15 = vpop.permute.xlu0 %836  ;;  %v833_v16 = vpack.c.bf16 %v831_v0, %v829_v11  ;;  %v4190_v4 = vld [vmem:[%s6872_s1 + $0x24] ss:$8 sm:$0x3] }
 0x10f   : > { %1322 = vrot.lane.b32.xlu1 %v5033_v17, %s6948_s18  ;;  %v957_v11 = vrot.slane %v4190_v4, %v4647_v9  ;;  %v961_v12 = vrot.slane %v4190_v4, %v4638_v7 }
 0x110   : > { %1320 = vrot.lane.b32.xlu0 %v5041_v18, %s6948_s18  ;;  %2094 = vmatprep.subr.bf16.mxu0 %v833_v16  ;;  %s6954_s18 = smov 78  }
 0x111   : > { %2095 = vmatpush1.bf16.msra.mxu0 %v832_v14  ;;  %v843_v19 = vpop.permute.xlu1 %842 }
 0x112   : > { %v846_v20 = vsel %vm6908_vm15, %v839_v13, %v843_v19  ;;  %v848_v21 = vsel %vm6908_vm15, %v843_v19, %v839_v13  ;;  %v841_v22 = vpop.permute.xlu0 %840 }
 0x113   : > { %v864_v23 = vmul.f32 %v855_v1, %v848_v21  ;;  %v865_v24 = vmul.f32 %v859_v3, %v846_v20  ;;  %v845_v25 = vsel %vm6908_vm15, %v837_v15, %v841_v22  ;;  %v847_v26 = vsel %vm6908_vm15, %v841_v22, %v837_v15  ;;  %1352 = vrot.lane.b32.xlu1 %v5054_v27, %s6909_s23 }
 0x114   : > { %v862_v28 = vmul.f32 %v855_v1, %v847_v26  ;;  %v863_v29 = vmul.f32 %v859_v3, %v845_v25  ;;  %1350 = vrot.lane.b32.xlu0 %v5059_v30, %s6909_s23  ;;  %vm6911_vm15 = vcmp.lt.s32.totalorder %v4636_v6, 15 }
 0x115   : > { %v873_v32 = vpop.permute.xlu1 %872 }
 0x116   : > { %v866_v33 = vpack.c.bf16 %v864_v23, %v862_v28  ;;  %v871_v34 = vpop.permute.xlu0 %870  ;;  %v867_v35 = vpack.c.bf16 %v865_v24, %v863_v29  ;;  %v4191_v23 = vld [vmem:[%s6872_s1 + $0x25] ss:$8 sm:$0x3] }
 0x117   : > { %1356 = vrot.lane.b32.xlu1 %v5033_v17, %s6909_s23  ;;  %v991_v29 = vrot.slane %v4191_v23, %v4647_v9  ;;  %v995_v31 = vrot.slane %v4191_v23, %v4638_v7 }
 0x118   : > { %1354 = vrot.lane.b32.xlu0 %v5041_v18, %s6909_s23  ;;  %2096 = vmatprep.subr.bf16.mxu0 %v867_v35  ;;  %s6915_s23 = smov 99  }
 0x119   : > { %2097 = vmatpush1.bf16.msra.mxu0 %v866_v33  ;;  %v877_v38 = vpop.permute.xlu1 %876 }
 0x11a   : > { %v880_v39 = vsel %vm6911_vm15, %v873_v32, %v877_v38  ;;  %v882_v40 = vsel %vm6911_vm15, %v877_v38, %v873_v32  ;;  %v875_v41 = vpop.permute.xlu0 %874 }
 0x11b   : > { %v898_v42 = vmul.f32 %v889_v36, %v882_v40  ;;  %v899_v43 = vmul.f32 %v893_v37, %v880_v39  ;;  %v879_v44 = vsel %vm6911_vm15, %v871_v34, %v875_v41  ;;  %v881_v45 = vsel %vm6911_vm15, %v875_v41, %v871_v34  ;;  %1386 = vrot.lane.b32.xlu1 %v5054_v27, %s6912_s19 }
 0x11c   : > { %v896_v46 = vmul.f32 %v889_v36, %v881_v45  ;;  %v897_v47 = vmul.f32 %v893_v37, %v879_v44  ;;  %1384 = vrot.lane.b32.xlu0 %v5059_v30, %s6912_s19  ;;  %vm6914_vm15 = vcmp.lt.s32.totalorder %v4636_v6, 14 }
 0x11d   : > { %v907_v49 = vpop.permute.xlu1 %906 }
 0x11e   : > { %v900_v50 = vpack.c.bf16 %v898_v42, %v896_v46  ;;  %v905_v51 = vpop.permute.xlu0 %904  ;;  %v901_v52 = vpack.c.bf16 %v899_v43, %v897_v47  ;;  %v4192_v42 = vld [vmem:[%s6872_s1 + $0x26] ss:$8 sm:$0x3] }
 0x11f   : > { %1390 = vrot.lane.b32.xlu1 %v5033_v17, %s6912_s19  ;;  %v1025_v47 = vrot.slane %v4192_v42, %v4647_v9  ;;  %v1029_v48 = vrot.slane %v4192_v42, %v4638_v7 }
 0x120   : > { %1388 = vrot.lane.b32.xlu0 %v5041_v18, %s6912_s19  ;;  %2098 = vmatprep.subr.bf16.mxu0 %v901_v52  ;;  %s6918_s19 = smov 98  }
 0x121   : > { %2099 = vmatpush1.bf16.msra.mxu0 %v900_v50  ;;  %v911_v55 = vpop.permute.xlu1 %910 }
 0x122   : > { %v914_v56 = vsel %vm6914_vm15, %v907_v49, %v911_v55  ;;  %v916_v57 = vsel %vm6914_vm15, %v911_v55, %v907_v49  ;;  %v909_v58 = vpop.permute.xlu0 %908 }
 0x123   : > { %v932_v59 = vmul.f32 %v923_v53, %v916_v57  ;;  %v933_v60 = vmul.f32 %v927_v54, %v914_v56  ;;  %v913_v2 = vsel %vm6914_vm15, %v905_v51, %v909_v58  ;;  %v915_v61 = vsel %vm6914_vm15, %v909_v58, %v905_v51  ;;  %1420 = vrot.lane.b32.xlu1 %v5054_v27, %s6915_s23 }
 0x124   : > { %v930_v62 = vmul.f32 %v923_v53, %v915_v61  ;;  %v931_v63 = vmul.f32 %v927_v54, %v913_v2  ;;  %1418 = vrot.lane.b32.xlu0 %v5059_v30, %s6915_s23  ;;  %vm6917_vm15 = vcmp.lt.s32.totalorder %v4636_v6, 13 }
 0x125   : > { %v941_v0 = vpop.permute.xlu1 %940 }
 0x126   : > { %v934_v5 = vpack.c.bf16 %v932_v59, %v930_v62  ;;  %v939_v8 = vpop.permute.xlu0 %938  ;;  %v935_v10 = vpack.c.bf16 %v933_v60, %v931_v63  ;;  %v4193_v59 = vld [vmem:[%s6872_s1 + $0x27] ss:$8 sm:$0x3] }
 0x127   : > { %1424 = vrot.lane.b32.xlu1 %v5033_v17, %s6915_s23  ;;  %v1059_v63 = vrot.slane %v4193_v59, %v4647_v9  ;;  %v1063_v4 = vrot.slane %v4193_v59, %v4638_v7 }
 0x128   : > { %1422 = vrot.lane.b32.xlu0 %v5041_v18, %s6915_s23  ;;  %2100 = vmatprep.subr.bf16.mxu0 %v935_v10  ;;  %s6921_s23 = smov 97  }
 0x129   : > { %2101 = vmatpush1.bf16.msra.mxu0 %v934_v5  ;;  %v945_v13 = vpop.permute.xlu1 %944 }
 0x12a   : > { %v948_v14 = vsel %vm6917_vm15, %v941_v0, %v945_v13  ;;  %v950_v15 = vsel %vm6917_vm15, %v945_v13, %v941_v0  ;;  %v943_v16 = vpop.permute.xlu0 %942 }
 0x12b   : > { %v966_v1 = vmul.f32 %v957_v11, %v950_v15  ;;  %v967_v3 = vmul.f32 %v961_v12, %v948_v14  ;;  %v947_v19 = vsel %vm6917_vm15, %v939_v8, %v943_v16  ;;  %v949_v20 = vsel %vm6917_vm15, %v943_v16, %v939_v8  ;;  %1454 = vrot.lane.b32.xlu1 %v5054_v27, %s6918_s19 }
 0x12c   : > { %v964_v21 = vmul.f32 %v957_v11, %v949_v20  ;;  %v965_v22 = vmul.f32 %v961_v12, %v947_v19  ;;  %1452 = vrot.lane.b32.xlu0 %v5059_v30, %s6918_s19  ;;  %vm6920_vm15 = vcmp.lt.s32.totalorder %v4636_v6, 3 }
 0x12d   : > { %v975_v24 = vpop.permute.xlu1 %974 }
 0x12e   : > { %v968_v25 = vpack.c.bf16 %v966_v1, %v964_v21  ;;  %v973_v26 = vpop.permute.xlu0 %972  ;;  %v969_v28 = vpack.c.bf16 %v967_v3, %v965_v22  ;;  %v4194_v1 = vld [vmem:[%s6872_s1 + $0x31] ss:$8 sm:$0x3]  ;;  %v1075_v22 = vpack.c.bf16 %v5033_v17, %v5041_v18 }
 0x12f   : > { %1458 = vrot.lane.b32.xlu1 %v5033_v17, %s6918_s19  ;;  %v1097_v23 = vrot.slane %v4194_v1, %v4647_v9 }
 0x130   : > { %1456 = vrot.lane.b32.xlu0 %v5041_v18, %s6918_s19  ;;  %2102 = vmatprep.subr.bf16.mxu0 %v969_v28  ;;  %s6924_s19 = smov 96  }
 0x131   : > { %2103 = vmatpush1.bf16.msra.mxu0 %v968_v25  ;;  %v979_v32 = vpop.permute.xlu1 %978 }
 0x132   : > { %v982_v33 = vsel %vm6920_vm15, %v975_v24, %v979_v32  ;;  %v984_v34 = vsel %vm6920_vm15, %v979_v32, %v975_v24  ;;  %v977_v35 = vpop.permute.xlu0 %976  ;;  %v1101_v24 = vrot.slane %v4194_v1, %v4638_v7 }
 0x133   : > { %v1000_v36 = vmul.f32 %v991_v29, %v984_v34  ;;  %v1001_v37 = vmul.f32 %v995_v31, %v982_v33  ;;  %v981_v38 = vsel %vm6920_vm15, %v973_v26, %v977_v35  ;;  %v983_v39 = vsel %vm6920_vm15, %v977_v35, %v973_v26  ;;  %1488 = vrot.lane.b32.xlu1 %v5054_v27, %s6921_s23 }
 0x134   : > { %v998_v40 = vmul.f32 %v991_v29, %v983_v39  ;;  %v999_v41 = vmul.f32 %v995_v31, %v981_v38  ;;  %1486 = vrot.lane.b32.xlu0 %v5059_v30, %s6921_s23  ;;  %vm6923_vm15 = vcmp.lt.s32.totalorder %v4636_v6, 2  ;;  %v1074_v26 = vpack.c.bf16 %v5054_v27, %v5059_v30  ;;  %v4195_v38 = vld [vmem:[%s6872_s1 + $0x32] ss:$8 sm:$0x3] }
 0x135   : > { %v1009_v43 = vpop.permute.xlu1 %1008 }
 0x136   : > { %v1002_v44 = vpack.c.bf16 %v1000_v36, %v998_v40  ;;  %v1007_v45 = vpop.permute.xlu0 %1006  ;;  %v1003_v46 = vpack.c.bf16 %v1001_v37, %v999_v41 }
 0x137   : > { %1492 = vrot.lane.b32.xlu1 %v5033_v17, %s6921_s23 }
 0x138   : > { %1490 = vrot.lane.b32.xlu0 %v5041_v18, %s6921_s23  ;;  %2104 = vmatprep.subr.bf16.mxu0 %v1003_v46  ;;  %s6927_s23 = smov 95  }
 0x139   : > { %2105 = vmatpush1.bf16.msra.mxu0 %v1002_v44  ;;  %v1013_v49 = vpop.permute.xlu1 %1012  ;;  %v1135_v44 = vrot.slane %v4195_v38, %v4638_v7 }
 0x13a   : > { %v1016_v50 = vsel %vm6923_vm15, %v1009_v43, %v1013_v49  ;;  %v1018_v51 = vsel %vm6923_vm15, %v1013_v49, %v1009_v43  ;;  %v1011_v52 = vpop.permute.xlu0 %1010  ;;  %v1131_v43 = vrot.slane %v4195_v38, %v4647_v9 }
 0x13b   : > { %v1034_v53 = vmul.f32 %v1025_v47, %v1018_v51  ;;  %v1035_v54 = vmul.f32 %v1029_v48, %v1016_v50  ;;  %v1015_v55 = vsel %vm6923_vm15, %v1007_v45, %v1011_v52  ;;  %v1017_v56 = vsel %vm6923_vm15, %v1011_v52, %v1007_v45  ;;  %1522 = vrot.lane.b32.xlu1 %v5054_v27, %s6924_s19 }
 0x13c   : > { %v1032_v57 = vmul.f32 %v1025_v47, %v1017_v56  ;;  %v1033_v58 = vmul.f32 %v1029_v48, %v1015_v55  ;;  %1520 = vrot.lane.b32.xlu0 %v5059_v30, %s6924_s19  ;;  %vm6926_vm15 = vcmp.lt.s32.totalorder %v4636_v6, 1  ;;  %v4196_v55 = vld [vmem:[%s6872_s1 + $0x33] ss:$8 sm:$0x3] }
 0x13d   : > { %v1043_v60 = vpop.permute.xlu1 %1042 }
 0x13e   : > { %v1036_v2 = vpack.c.bf16 %v1034_v53, %v1032_v57  ;;  %v1041_v61 = vpop.permute.xlu0 %1040  ;;  %v1037_v62 = vpack.c.bf16 %v1035_v54, %v1033_v58 }
 0x13f   : > { %1526 = vrot.lane.b32.xlu1 %v5033_v17, %s6924_s19 }
 0x140   : > { %1524 = vrot.lane.b32.xlu0 %v5041_v18, %s6924_s19  ;;  %2106 = vmatprep.subr.bf16.mxu0 %v1037_v62  ;;  %s6930_s19 = smov 94  }
 0x141   : > { %2107 = vmatpush1.bf16.msra.mxu0 %v1036_v2  ;;  %v1047_v0 = vpop.permute.xlu1 %1046  ;;  %v1169_v2 = vrot.slane %v4196_v55, %v4638_v7 }
 0x142   : > { %v1050_v5 = vsel %vm6926_vm15, %v1043_v60, %v1047_v0  ;;  %v1052_v8 = vsel %vm6926_vm15, %v1047_v0, %v1043_v60  ;;  %v1045_v10 = vpop.permute.xlu0 %1044  ;;  %v1165_v60 = vrot.slane %v4196_v55, %v4647_v9 }
 0x143   : > { %v1068_v11 = vmul.f32 %v1059_v63, %v1052_v8  ;;  %v1069_v12 = vmul.f32 %v1063_v4, %v1050_v5  ;;  %v1049_v13 = vsel %vm6926_vm15, %v1041_v61, %v1045_v10  ;;  %v1051_v14 = vsel %vm6926_vm15, %v1045_v10, %v1041_v61  ;;  %1556 = vrot.lane.b32.xlu1 %v5054_v27, %s6927_s23 }
 0x144   : > { %v1066_v15 = vmul.f32 %v1059_v63, %v1051_v14  ;;  %v1067_v16 = vmul.f32 %v1063_v4, %v1049_v13  ;;  %1554 = vrot.lane.b32.xlu0 %v5059_v30, %s6927_s23  ;;  %vm6929_vm15 = vcmp.lt.s32.totalorder %v4636_v6, 127  ;;  %v4197_v13 = vld [vmem:[%s6872_s1 + $0x34] ss:$8 sm:$0x3] }
 0x145   : > { %v1081_v3 = vpop.permute.xlu1 %1080 }
 0x146   : > { %v1070_v19 = vpack.c.bf16 %v1068_v11, %v1066_v15  ;;  %v1079_v20 = vpop.permute.xlu0 %1078  ;;  %v1071_v21 = vpack.c.bf16 %v1069_v12, %v1067_v16 }
 0x147   : > { %1560 = vrot.lane.b32.xlu1 %v5033_v17, %s6927_s23 }
 0x148   : > { %1558 = vrot.lane.b32.xlu0 %v5041_v18, %s6927_s23  ;;  %2108 = vmatprep.subr.bf16.mxu0 %v1071_v21  ;;  %s6933_s23 = smov 93  }
 0x149   : > { %2109 = vmatpush1.bf16.msra.mxu0 %v1070_v19  ;;  %v1085_v25 = vpop.permute.xlu1 %1084  ;;  %v1203_v19 = vrot.slane %v4197_v13, %v4638_v7 }
 0x14a   : > { %v1088_v28 = vsel %vm6929_vm15, %v1081_v3, %v1085_v25  ;;  %v1090_v29 = vsel %vm6929_vm15, %v1085_v25, %v1081_v3  ;;  %v1083_v31 = vpop.permute.xlu0 %1082  ;;  %2110 = vmatprep.subr.bf16.mxu0 %v1075_v22  ;;  %v1199_v3 = vrot.slane %v4197_v13, %v4647_v9 }
 0x14b   : > { %v1106_v32 = vmul.f32 %v1097_v23, %v1088_v28  ;;  %v1107_v33 = vmul.f32 %v1101_v24, %v1090_v29  ;;  %v1087_v34 = vsel %vm6929_vm15, %v1079_v20, %v1083_v31  ;;  %v1089_v35 = vsel %vm6929_vm15, %v1083_v31, %v1079_v20  ;;  %1590 = vrot.lane.b32.xlu1 %v5054_v27, %s6930_s19 }
 0x14c   : > { %v1104_v36 = vmul.f32 %v1097_v23, %v1087_v34  ;;  %v1105_v37 = vmul.f32 %v1101_v24, %v1089_v35  ;;  %1588 = vrot.lane.b32.xlu0 %v5059_v30, %s6930_s19  ;;  %vm6932_vm15 = vcmp.lt.s32.totalorder %v4636_v6, 126 }
 0x14d   : > { %2111 = vmatpush1.bf16.msra.mxu0 %v1074_v26  ;;  %v1115_v39 = vpop.permute.xlu1 %1114 }
 0x14e   : > { %v1108_v40 = vpack.c.bf16 %v1106_v32, %v1104_v36  ;;  %v1113_v41 = vpop.permute.xlu0 %1112  ;;  %v1109_v42 = vpack.c.bf16 %v1107_v33, %v1105_v37  ;;  %v4198_v32 = vld [vmem:[%s6872_s1 + $0x35] ss:$8 sm:$0x3] }
 0x14f   : > { %1594 = vrot.lane.b32.xlu1 %v5033_v17, %s6930_s19  ;;  %v1233_v37 = vrot.slane %v4198_v32, %v4647_v9  ;;  %v1237_v38 = vrot.slane %v4198_v32, %v4638_v7 }
 0x150   : > { %1592 = vrot.lane.b32.xlu0 %v5041_v18, %s6930_s19  ;;  %2112 = vmatprep.subr.bf16.mxu0 %v1109_v42  ;;  %s6936_s19 = smov 83  }
 0x151   : > { %2113 = vmatpush1.bf16.msra.mxu0 %v1108_v40  ;;  %v1119_v45 = vpop.permute.xlu1 %1118 }
 0x152   : > { %v1122_v46 = vsel %vm6932_vm15, %v1115_v39, %v1119_v45  ;;  %v1124_v47 = vsel %vm6932_vm15, %v1119_v45, %v1115_v39  ;;  %v1117_v48 = vpop.permute.xlu0 %1116 }
 0x153   : > { %v1140_v49 = vmul.f32 %v1131_v43, %v1122_v46  ;;  %v1141_v50 = vmul.f32 %v1135_v44, %v1124_v47  ;;  %v1121_v51 = vsel %vm6932_vm15, %v1113_v41, %v1117_v48  ;;  %v1123_v52 = vsel %vm6932_vm15, %v1117_v48, %v1113_v41  ;;  %1624 = vrot.lane.b32.xlu1 %v5054_v27, %s6933_s23 }
 0x154   : > { %v1138_v53 = vmul.f32 %v1131_v43, %v1121_v51  ;;  %v1139_v54 = vmul.f32 %v1135_v44, %v1123_v52  ;;  %1622 = vrot.lane.b32.xlu0 %v5059_v30, %s6933_s23  ;;  %vm6935_vm15 = vcmp.lt.s32.totalorder %v4636_v6, 125 }
 0x155   : > { %v1149_v56 = vpop.permute.xlu1 %1148 }
 0x156   : > { %v1142_v57 = vpack.c.bf16 %v1140_v49, %v1138_v53  ;;  %v1147_v58 = vpop.permute.xlu0 %1146  ;;  %v1143_v59 = vpack.c.bf16 %v1141_v50, %v1139_v54  ;;  %v4199_v49 = vld [vmem:[%s6872_s1 + $0x36] ss:$8 sm:$0x3] }
 0x157   : > { %1628 = vrot.lane.b32.xlu1 %v5033_v17, %s6933_s23  ;;  %v1267_v54 = vrot.slane %v4199_v49, %v4647_v9  ;;  %v1271_v55 = vrot.slane %v4199_v49, %v4638_v7 }
 0x158   : > { %1626 = vrot.lane.b32.xlu0 %v5041_v18, %s6933_s23  ;;  %2114 = vmatprep.subr.bf16.mxu0 %v1143_v59  ;;  %s6939_s23 = smov 82  }
 0x159   : > { %2115 = vmatpush1.bf16.msra.mxu0 %v1142_v57  ;;  %v1153_v61 = vpop.permute.xlu1 %1152 }
 0x15a   : > { %v1156_v62 = vsel %vm6935_vm15, %v1149_v56, %v1153_v61  ;;  %v1158_v63 = vsel %vm6935_vm15, %v1153_v61, %v1149_v56  ;;  %v1151_v4 = vpop.permute.xlu0 %1150 }
 0x15b   : > { %v1174_v0 = vmul.f32 %v1165_v60, %v1156_v62  ;;  %v1175_v5 = vmul.f32 %v1169_v2, %v1158_v63  ;;  %v1155_v8 = vsel %vm6935_vm15, %v1147_v58, %v1151_v4  ;;  %v1157_v10 = vsel %vm6935_vm15, %v1151_v4, %v1147_v58  ;;  %1658 = vrot.lane.b32.xlu1 %v5054_v27, %s6936_s19 }
 0x15c   : > { %v1172_v11 = vmul.f32 %v1165_v60, %v1155_v8  ;;  %v1173_v12 = vmul.f32 %v1169_v2, %v1157_v10  ;;  %1656 = vrot.lane.b32.xlu0 %v5059_v30, %s6936_s19  ;;  %vm6938_vm15 = vcmp.lt.s32.totalorder %v4636_v6, 115 }
 0x15d   : > { %v1183_v14 = vpop.permute.xlu1 %1182 }
 0x15e   : > { %v1176_v15 = vpack.c.bf16 %v1174_v0, %v1172_v11  ;;  %v1181_v16 = vpop.permute.xlu0 %1180  ;;  %v1177_v1 = vpack.c.bf16 %v1175_v5, %v1173_v12  ;;  %v4200_v0 = vld [vmem:[%s6872_s1 + $0x37] ss:$8 sm:$0x3] }
 0x15f   : > { %1662 = vrot.lane.b32.xlu1 %v5033_v17, %s6936_s19  ;;  %v1301_v12 = vrot.slane %v4200_v0, %v4647_v9  ;;  %v1305_v13 = vrot.slane %v4200_v0, %v4638_v7 }
 0x160   : > { %1660 = vrot.lane.b32.xlu0 %v5041_v18, %s6936_s19  ;;  %2116 = vmatprep.subr.bf16.mxu0 %v1177_v1  ;;  %s6942_s19 = smov 81  }
 0x161   : > { %2117 = vmatpush1.bf16.msra.mxu0 %v1176_v15  ;;  %v1187_v20 = vpop.permute.xlu1 %1186 }
 0x162   : > { %v1190_v21 = vsel %vm6938_vm15, %v1183_v14, %v1187_v20  ;;  %v1192_v22 = vsel %vm6938_vm15, %v1187_v20, %v1183_v14  ;;  %v1185_v23 = vpop.permute.xlu0 %1184 }
 0x163   : > { %v1208_v24 = vmul.f32 %v1199_v3, %v1190_v21  ;;  %v1209_v25 = vmul.f32 %v1203_v19, %v1192_v22  ;;  %v1189_v26 = vsel %vm6938_vm15, %v1181_v16, %v1185_v23  ;;  %v1191_v28 = vsel %vm6938_vm15, %v1185_v23, %v1181_v16  ;;  %1692 = vrot.lane.b32.xlu1 %v5054_v27, %s6939_s23 }
 0x164   : > { %v1206_v29 = vmul.f32 %v1199_v3, %v1189_v26  ;;  %v1207_v31 = vmul.f32 %v1203_v19, %v1191_v28  ;;  %1690 = vrot.lane.b32.xlu0 %v5059_v30, %s6939_s23  ;;  %vm6941_vm15 = vcmp.lt.s32.totalorder %v4636_v6, 114 }
 0x165   : > { %v1217_v33 = vpop.permute.xlu1 %1216 }
 0x166   : > { %v1210_v34 = vpack.c.bf16 %v1208_v24, %v1206_v29  ;;  %v1215_v35 = vpop.permute.xlu0 %1214  ;;  %v1211_v36 = vpack.c.bf16 %v1209_v25, %v1207_v31  ;;  %v4201_v24 = vld [vmem:[%s6872_s1 + $0x40] ss:$8 sm:$0x3] }
 0x167   : > { %1696 = vrot.lane.b32.xlu1 %v5033_v17, %s6939_s23  ;;  %v1335_v31 = vrot.slane %v4201_v24, %v4647_v9  ;;  %v1339_v32 = vrot.slane %v4201_v24, %v4638_v7 }
 0x168   : > { %1694 = vrot.lane.b32.xlu0 %v5041_v18, %s6939_s23  ;;  %2118 = vmatprep.subr.bf16.mxu0 %v1211_v36  ;;  %s6945_s23 = smov 80  }
 0x169   : > { %2119 = vmatpush1.bf16.msra.mxu0 %v1210_v34  ;;  %v1221_v39 = vpop.permute.xlu1 %1220 }
 0x16a   : > { %v1224_v40 = vsel %vm6941_vm15, %v1217_v33, %v1221_v39  ;;  %v1226_v41 = vsel %vm6941_vm15, %v1221_v39, %v1217_v33  ;;  %v1219_v42 = vpop.permute.xlu0 %1218  ;;  %v4379_v33 = vld [vmem:[%s6873_s2 + $0x8] ss:$28 sps:$4 sm:$0xff]  }
 0x16b   : > { %v1242_v43 = vmul.f32 %v1233_v37, %v1224_v40  ;;  %v1243_v44 = vmul.f32 %v1237_v38, %v1226_v41  ;;  %v1223_v45 = vsel %vm6941_vm15, %v1215_v35, %v1219_v42  ;;  %v1225_v46 = vsel %vm6941_vm15, %v1219_v42, %v1215_v35  ;;  %1726 = vrot.lane.b32.xlu1 %v5054_v27, %s6942_s19  ;;  %v4384_v35 = vld [vmem:[%s6873_s2 + $0x14] ss:$28 sps:$4 sm:$0xff]  }
 0x16c   : > { %v1240_v47 = vmul.f32 %v1233_v37, %v1223_v45  ;;  %v1241_v48 = vmul.f32 %v1237_v38, %v1225_v46  ;;  %1724 = vrot.lane.b32.xlu0 %v5059_v30, %s6942_s19  ;;  %vm6944_vm15 = vcmp.lt.s32.totalorder %v4636_v6, 113  ;;  %v4202_v45 = vld [vmem:[%s6872_s1 + $0x41] ss:$8 sm:$0x3] }
 0x16d   : > { %v1251_v50 = vpop.permute.xlu1 %1250 }
 0x16e   : > { %v1244_v51 = vpack.c.bf16 %v1242_v43, %v1240_v47  ;;  %v1249_v52 = vpop.permute.xlu0 %1248  ;;  %v1245_v53 = vpack.c.bf16 %v1243_v44, %v1241_v48 }
 0x16f   : > { %1730 = vrot.lane.b32.xlu1 %v5033_v17, %s6942_s19 }
 0x170   : > { %1728 = vrot.lane.b32.xlu0 %v5041_v18, %s6942_s19  ;;  %2120 = vmatprep.subr.bf16.mxu0 %v1245_v53  ;;  %s6956_s19 = smov 79  }
 0x171   : > { %2121 = vmatpush1.bf16.msra.mxu0 %v1244_v51  ;;  %v1255_v56 = vpop.permute.xlu1 %1254  ;;  %v1373_v51 = vrot.slane %v4202_v45, %v4638_v7 }
 0x172   : > { %v1258_v57 = vsel %vm6944_vm15, %v1251_v50, %v1255_v56  ;;  %v1260_v58 = vsel %vm6944_vm15, %v1255_v56, %v1251_v50  ;;  %v1253_v59 = vpop.permute.xlu0 %1252  ;;  %v1369_v50 = vrot.slane %v4202_v45, %v4647_v9  ;;  %v6977_v56 = vmov 0  }
 0x173   : > { %v1276_v60 = vmul.f32 %v1267_v54, %v1258_v57  ;;  %v1277_v2 = vmul.f32 %v1271_v55, %v1260_v58  ;;  %v1257_v61 = vsel %vm6944_vm15, %v1249_v52, %v1253_v59  ;;  %v1259_v62 = vsel %vm6944_vm15, %v1253_v59, %v1249_v52  ;;  %1760 = vrot.lane.b32.xlu1 %v5054_v27, %s6945_s23 }
 0x174   : > { %v1274_v63 = vmul.f32 %v1267_v54, %v1257_v61  ;;  %v1275_v4 = vmul.f32 %v1271_v55, %v1259_v62  ;;  %1758 = vrot.lane.b32.xlu0 %v5059_v30, %s6945_s23  ;;  %vm6947_vm15 = vcmp.lt.s32.totalorder %v4636_v6, 112  ;;  %4375 = vset.pattern.permute.xlu1 %v6977_v56  ;;  %v4203_v62 = vld [vmem:[%s6872_s1 + $0x42] ss:$8 sm:$0x3] }
 0x175   : > { %v1285_v5 = vpop.permute.xlu1 %1284  ;;  %4374 = vset.pattern.permute.xlu0 %v6977_v56 }
 0x176   : > { %v1278_v8 = vpack.c.bf16 %v1276_v60, %v1274_v63  ;;  %v1283_v10 = vpop.permute.xlu0 %1282  ;;  %v1279_v11 = vpack.c.bf16 %v1277_v2, %v1275_v4 }
 0x177   : > { %1764 = vrot.lane.b32.xlu1 %v5033_v17, %s6945_s23 }
 0x178   : > { %1762 = vrot.lane.b32.xlu0 %v5041_v18, %s6945_s23  ;;  %2122 = vmatprep.subr.bf16.mxu0 %v1279_v11  ;;  %s6985_s23 = smov 14  }
 0x179   : > { %2123 = vmatpush1.bf16.msra.mxu0 %v1278_v8  ;;  %v1289_v14 = vpop.permute.xlu1 %1288  ;;  %v1407_v8 = vrot.slane %v4203_v62, %v4638_v7 }
 0x17a   : > { %v1292_v15 = vsel %vm6947_vm15, %v1285_v5, %v1289_v14  ;;  %v1294_v16 = vsel %vm6947_vm15, %v1289_v14, %v1285_v5  ;;  %v1287_v1 = vpop.permute.xlu0 %1286 }
 0x17b   : > { %v1310_v3 = vmul.f32 %v1301_v12, %v1292_v15  ;;  %v1311_v19 = vmul.f32 %v1305_v13, %v1294_v16  ;;  %v1291_v20 = vsel %vm6947_vm15, %v1283_v10, %v1287_v1  ;;  %v1293_v21 = vsel %vm6947_vm15, %v1287_v1, %v1283_v10  ;;  %1794 = vrot.lane.b32.xlu1 %v5054_v27, %s6956_s19 }
 0x17c   : > { %v1308_v22 = vmul.f32 %v1301_v12, %v1291_v20  ;;  %v1309_v23 = vmul.f32 %v1305_v13, %v1293_v21  ;;  %1792 = vrot.lane.b32.xlu0 %v5059_v30, %s6956_s19  ;;  %vm6952_vm15 = vcmp.lt.s32.totalorder %v4636_v6, 111 }
 0x17d   : > { %v1319_v25 = vpop.permute.xlu1 %1318 }
 0x17e   : > { %v1312_v26 = vpack.c.bf16 %v1310_v3, %v1308_v22  ;;  %v1317_v28 = vpop.permute.xlu0 %1316  ;;  %v1313_v29 = vpack.c.bf16 %v1311_v19, %v1309_v23  ;;  %v4204_v19 = vld [vmem:[%s6872_s1 + $0x43] ss:$8 sm:$0x3] }
 0x17f   : > { %1798 = vrot.lane.b32.xlu1 %v5033_v17, %s6956_s19  ;;  %v1437_v24 = vrot.slane %v4204_v19, %v4647_v9 }
 0x180   : > { %1796 = vrot.lane.b32.xlu0 %v5041_v18, %s6956_s19  ;;  %2124 = vmatprep.subr.bf16.mxu0 %v1313_v29  ;;  %s4284_s19 = sshll.u32 %s7154_s22, 6  ;;  %s6981_s22 = smov 18  }
 0x181   : > { %2125 = vmatpush1.bf16.msra.mxu0 %v1312_v26  ;;  %v1323_v34 = vpop.permute.xlu1 %1322  ;;  %s5637_s20 = scalar_lea.vmem %s6877_s6, %s4284_s19  ;;  %s6986_s19 = smov 13  }
 0x182   : > { %v1326_v36 = vsel %vm6952_vm15, %v1319_v25, %v1323_v34  ;;  %v1328_v37 = vsel %vm6952_vm15, %v1323_v34, %v1319_v25  ;;  %v1321_v38 = vpop.permute.xlu0 %1320  ;;  %v1441_v25 = vrot.slane %v4204_v19, %v4638_v7 }
 0x183   : > { %v1344_v39 = vmul.f32 %v1335_v31, %v1326_v36  ;;  %v1345_v40 = vmul.f32 %v1339_v32, %v1328_v37  ;;  %v1325_v41 = vsel %vm6952_vm15, %v1317_v28, %v1321_v38  ;;  %v1327_v42 = vsel %vm6952_vm15, %v1321_v38, %v1317_v28  ;;  %1828 = vrot.lane.b32.xlu1 %v5054_v27, %s6954_s18  ;;  %v4205_v38 = vld [vmem:[%s6872_s1 + $0x44] ss:$8 sm:$0x3] }
 0x184   : > { %v1342_v43 = vmul.f32 %v1335_v31, %v1325_v41  ;;  %v1343_v44 = vmul.f32 %v1339_v32, %v1327_v42  ;;  %1826 = vrot.lane.b32.xlu0 %v5059_v30, %s6954_s18  ;;  %2127 = vmatmul.mubr.bf16.vlgmr.msra.gmra.mrb[0].mxu0 %v4379_v33  ;;  %vm6953_vm15 = vcmp.lt.s32.totalorder %v4636_v6, 110 }
 0x185   : > { %v1353_v46 = vpop.permute.xlu1 %1352  ;;  %2169 = vmatprep.mubr.bf16.mxu0 %v4384_v35 }
 0x186   : > { %v1346_v47 = vpack.c.bf16 %v1344_v39, %v1342_v43  ;;  %v1351_v48 = vpop.permute.xlu0 %1350  ;;  %v1347_v49 = vpack.c.bf16 %v1345_v40, %v1343_v44  ;;  %v1471_v43 = vrot.slane %v4205_v38, %v4647_v9  ;;  %v1475_v44 = vrot.slane %v4205_v38, %v4638_v7 }
 0x187   : > { %1832 = vrot.lane.b32.xlu1 %v5033_v17, %s6954_s18 }
 0x188   : > { %1830 = vrot.lane.b32.xlu0 %v5041_v18, %s6954_s18  ;;  %2137 = vmatprep.subr.bf16.mxu0 %v1347_v49  ;;  %s6995_s18 = smov 125  }
 0x189   : > { %2138 = vmatpush1.bf16.msra.mxu0 %v1346_v47  ;;  %v1357_v52 = vpop.permute.xlu1 %1356 }
 0x18a   : > { %v1360_v53 = vsel %vm6953_vm15, %v1353_v46, %v1357_v52  ;;  %v1362_v54 = vsel %vm6953_vm15, %v1357_v52, %v1353_v46  ;;  %v1355_v55 = vpop.permute.xlu0 %1354 }
 0x18b   : > { %v1378_v57 = vmul.f32 %v1369_v50, %v1360_v53  ;;  %v1379_v58 = vmul.f32 %v1373_v51, %v1362_v54  ;;  %v1359_v59 = vsel %vm6953_vm15, %v1351_v48, %v1355_v55  ;;  %v1361_v60 = vsel %vm6953_vm15, %v1355_v55, %v1351_v48  ;;  %1862 = vrot.lane.b32.xlu1 %v5054_v27, %s6973_s25  ;;  %v4206_v55 = vld [vmem:[%s6872_s1 + $0x45] ss:$8 sm:$0x3] }
 0x18c   : > { %v1376_v2 = vmul.f32 %v1369_v50, %v1359_v59  ;;  %v1377_v61 = vmul.f32 %v1373_v51, %v1361_v60  ;;  %1860 = vrot.lane.b32.xlu0 %v5059_v30, %s6973_s25  ;;  %vm6959_vm15 = vcmp.lt.s32.totalorder %v4636_v6, 109  ;;  %v1403_v27 = vrot.slane %v4203_v62, %v4647_v9  ;;  %v2001_v30 = vld [vmem:[%s6874_s3 + $0x8] sm:$0xff] }
 0x18d   : > { %v1387_v63 = vpop.permute.xlu1 %1386 }
 0x18e   : > { %v1380_v4 = vpack.c.bf16 %v1378_v57, %v1376_v2  ;;  %v1385_v0 = vpop.permute.xlu0 %1384  ;;  %v1381_v5 = vpack.c.bf16 %v1379_v58, %v1377_v61  ;;  %v1505_v2 = vrot.slane %v4206_v55, %v4647_v9  ;;  %v1509_v61 = vrot.slane %v4206_v55, %v4638_v7 }
 0x18f   : > { %1866 = vrot.lane.b32.xlu1 %v5033_v17, %s6973_s25  ;;  %v2000_v17 = vld [vmem:[%s6874_s3] sm:$0xff] }
 0x190   : > { %1864 = vrot.lane.b32.xlu0 %v5041_v18, %s6973_s25  ;;  %2139 = vmatprep.subr.bf16.mxu0 %v1381_v5  ;;  %s6983_s25 = smov 16  }
 0x191   : > { %2140 = vmatpush1.bf16.msra.mxu0 %v1380_v4  ;;  %v1391_v10 = vpop.permute.xlu1 %1390 }
 0x192   : > { %v1394_v11 = vsel %vm6959_vm15, %v1387_v63, %v1391_v10  ;;  %v1396_v12 = vsel %vm6959_vm15, %v1391_v10, %v1387_v63  ;;  %v1389_v13 = vpop.permute.xlu0 %1388 }
 0x193   : > { %v1412_v14 = vmul.f32 %v1403_v27, %v1394_v11  ;;  %v1413_v18 = vmul.f32 %v1407_v8, %v1396_v12  ;;  %v1393_v15 = vsel %vm6959_vm15, %v1385_v0, %v1389_v13  ;;  %v1395_v16 = vsel %vm6959_vm15, %v1389_v13, %v1385_v0  ;;  %2009 = vperm.xlu1 %4375, %v2001_v30   ;;  %v4207_v11 = vld [vmem:[%s6872_s1 + $0x46] ss:$8 sm:$0x3] }
 0x194   : > { %v1410_v1 = vmul.f32 %v1403_v27, %v1393_v15  ;;  %v1411_v3 = vmul.f32 %v1407_v8, %v1395_v16  ;;  %2004 = vperm.xlu0 %4374, %v2000_v17   ;;  %vm6961_vm15 = vcmp.lt.s32.totalorder %v4636_v6, 98  ;;  %v1539_v15 = vrot.slane %v4207_v11, %v4647_v9 }
 0x195   : > { %v1421_v20 = vpop.permute.xlu1 %1420  ;;  %v1543_v16 = vrot.slane %v4207_v11, %v4638_v7 }
 0x196   : > { %v1414_v21 = vpack.c.bf16 %v1412_v14, %v1410_v1  ;;  %v1419_v22 = vpop.permute.xlu0 %1418  ;;  %v1415_v23 = vpack.c.bf16 %v1413_v18, %v1411_v3 }
 0x198   : > { %2141 = vmatprep.subr.bf16.mxu0 %v1415_v23 }
 0x199   : > { %2142 = vmatpush1.bf16.msra.mxu0 %v1414_v21  ;;  %v1425_v26 = vpop.permute.xlu1 %1424 }
 0x19a   : > { %v1428_v28 = vsel %vm6960_vm14, %v1421_v20, %v1425_v26  ;;  %v1430_v29 = vsel %vm6960_vm14, %v1425_v26, %v1421_v20  ;;  %v1423_v31 = vpop.permute.xlu0 %1422 }
 0x19b   : > { %v1446_v32 = vmul.f32 %v1437_v24, %v1428_v28  ;;  %v1447_v33 = vmul.f32 %v1441_v25, %v1430_v29  ;;  %v1427_v34 = vsel %vm6960_vm14, %v1419_v22, %v1423_v31  ;;  %v1429_v35 = vsel %vm6960_vm14, %v1423_v31, %v1419_v22  ;;  %v4208_v28 = vld [vmem:[%s6872_s1 + $0x47] ss:$8 sm:$0x3] }
 0x19c   : > { %v1444_v36 = vmul.f32 %v1437_v24, %v1427_v34  ;;  %v1445_v37 = vmul.f32 %v1441_v25, %v1429_v35  ;;  %vm6962_vm14 = vcmp.lt.s32.totalorder %v4636_v6, 97  ;;  %v1573_v34 = vrot.slane %v4208_v28, %v4647_v9 }
 0x19d   : > { %v1455_v39 = vpop.permute.xlu1 %1454  ;;  %v1577_v35 = vrot.slane %v4208_v28, %v4638_v7 }
 0x19e   : > { %v1448_v40 = vpack.c.bf16 %v1446_v32, %v1444_v36  ;;  %v1453_v41 = vpop.permute.xlu0 %1452  ;;  %v1449_v42 = vpack.c.bf16 %v1447_v33, %v1445_v37 }
 0x1a0   : > { %2143 = vmatprep.subr.bf16.mxu0 %v1449_v42 }
 0x1a1   : > { %2144 = vmatpush1.bf16.msra.mxu0 %v1448_v40  ;;  %v1459_v45 = vpop.permute.xlu1 %1458 }
 0x1a2   : > { %v1462_v46 = vsel %vm6961_vm15, %v1455_v39, %v1459_v45  ;;  %v1464_v47 = vsel %vm6961_vm15, %v1459_v45, %v1455_v39  ;;  %v1457_v48 = vpop.permute.xlu0 %1456 }
 0x1a3   : > { %v1480_v49 = vmul.f32 %v1471_v43, %v1462_v46  ;;  %v1481_v50 = vmul.f32 %v1475_v44, %v1464_v47  ;;  %v1461_v51 = vsel %vm6961_vm15, %v1453_v41, %v1457_v48  ;;  %v1463_v52 = vsel %vm6961_vm15, %v1457_v48, %v1453_v41  ;;  %v4209_v46 = vld [vmem:[%s6872_s1 + $0x50] ss:$8 sm:$0x3] }
 0x1a4   : > { %v1478_v53 = vmul.f32 %v1471_v43, %v1461_v51  ;;  %v1479_v54 = vmul.f32 %v1475_v44, %v1463_v52  ;;  %vm6963_vm15 = vcmp.lt.s32.totalorder %v4636_v6, 96  ;;  %v1607_v51 = vrot.slane %v4209_v46, %v4647_v9 }
 0x1a5   : > { %v1489_v57 = vpop.permute.xlu1 %1488  ;;  %v1611_v52 = vrot.slane %v4209_v46, %v4638_v7 }
 0x1a6   : > { %v1482_v58 = vpack.c.bf16 %v1480_v49, %v1478_v53  ;;  %v1487_v59 = vpop.permute.xlu0 %1486  ;;  %v1483_v60 = vpack.c.bf16 %v1481_v50, %v1479_v54 }
 0x1a8   : > { %2145 = vmatprep.subr.bf16.mxu0 %v1483_v60 }
 0x1a9   : > { %2146 = vmatpush1.bf16.msra.mxu0 %v1482_v58  ;;  %v1493_v62 = vpop.permute.xlu1 %1492 }
 0x1aa   : > { %v1496_v63 = vsel %vm6962_vm14, %v1489_v57, %v1493_v62  ;;  %v1498_v4 = vsel %vm6962_vm14, %v1493_v62, %v1489_v57  ;;  %v1491_v0 = vpop.permute.xlu0 %1490 }
 0x1ab   : > { %v1514_v5 = vmul.f32 %v1505_v2, %v1496_v63  ;;  %v1515_v27 = vmul.f32 %v1509_v61, %v1498_v4  ;;  %v1495_v8 = vsel %vm6962_vm14, %v1487_v59, %v1491_v0  ;;  %v1497_v30 = vsel %vm6962_vm14, %v1491_v0, %v1487_v59  ;;  %v4210_v63 = vld [vmem:[%s6872_s1 + $0x51] ss:$8 sm:$0x3] }
 0x1ac   : > { %v1512_v10 = vmul.f32 %v1505_v2, %v1495_v8  ;;  %v1513_v17 = vmul.f32 %v1509_v61, %v1497_v30  ;;  %vm6964_vm14 = vcmp.lt.s32.totalorder %v4636_v6, 95  ;;  %v1641_v8 = vrot.slane %v4210_v63, %v4647_v9 }
 0x1ad   : > { %v1523_v12 = vpop.permute.xlu1 %1522  ;;  %v1645_v30 = vrot.slane %v4210_v63, %v4638_v7 }
 0x1ae   : > { %v1516_v13 = vpack.c.bf16 %v1514_v5, %v1512_v10  ;;  %v1521_v14 = vpop.permute.xlu0 %1520  ;;  %v1517_v18 = vpack.c.bf16 %v1515_v27, %v1513_v17 }
 0x1b0   : > { %2147 = vmatprep.subr.bf16.mxu0 %v1517_v18 }
 0x1b1   : > { %2148 = vmatpush1.bf16.msra.mxu0 %v1516_v13  ;;  %v1527_v1 = vpop.permute.xlu1 %1526 }
 0x1b2   : > { %v1530_v3 = vsel %vm6963_vm15, %v1523_v12, %v1527_v1  ;;  %v1532_v19 = vsel %vm6963_vm15, %v1527_v1, %v1523_v12  ;;  %v1525_v20 = vpop.permute.xlu0 %1524 }
 0x1b3   : > { %v1548_v21 = vmul.f32 %v1539_v15, %v1530_v3  ;;  %v1549_v22 = vmul.f32 %v1543_v16, %v1532_v19  ;;  %v1529_v23 = vsel %vm6963_vm15, %v1521_v14, %v1525_v20  ;;  %v1531_v24 = vsel %vm6963_vm15, %v1525_v20, %v1521_v14  ;;  %v4211_v3 = vld [vmem:[%s6872_s1 + $0x52] ss:$8 sm:$0x3] }
 0x1b4   : > { %v1546_v25 = vmul.f32 %v1539_v15, %v1529_v23  ;;  %v1547_v26 = vmul.f32 %v1543_v16, %v1531_v24  ;;  %vm6965_vm15 = vcmp.lt.s32.totalorder %v4636_v6, 94  ;;  %v1675_v23 = vrot.slane %v4211_v3, %v4647_v9 }
 0x1b5   : > { %v1557_v29 = vpop.permute.xlu1 %1556  ;;  %v1679_v24 = vrot.slane %v4211_v3, %v4638_v7 }
 0x1b6   : > { %v1550_v31 = vpack.c.bf16 %v1548_v21, %v1546_v25  ;;  %v1555_v32 = vpop.permute.xlu0 %1554  ;;  %v1551_v33 = vpack.c.bf16 %v1549_v22, %v1547_v26 }
 0x1b8   : > { %2149 = vmatprep.subr.bf16.mxu0 %v1551_v33 }
 0x1b9   : > { %2150 = vmatpush1.bf16.msra.mxu0 %v1550_v31  ;;  %v1561_v36 = vpop.permute.xlu1 %1560 }
 0x1ba   : > { %v1564_v37 = vsel %vm6964_vm14, %v1557_v29, %v1561_v36  ;;  %v1566_v38 = vsel %vm6964_vm14, %v1561_v36, %v1557_v29  ;;  %v1559_v39 = vpop.permute.xlu0 %1558 }
 0x1bb   : > { %v1582_v40 = vmul.f32 %v1573_v34, %v1564_v37  ;;  %v1583_v41 = vmul.f32 %v1577_v35, %v1566_v38  ;;  %v1563_v42 = vsel %vm6964_vm14, %v1555_v32, %v1559_v39  ;;  %v1565_v43 = vsel %vm6964_vm14, %v1559_v39, %v1555_v32  ;;  %v4212_v37 = vld [vmem:[%s6872_s1 + $0x53] ss:$8 sm:$0x3] }
 0x1bc   : > { %v1580_v44 = vmul.f32 %v1573_v34, %v1563_v42  ;;  %v1581_v45 = vmul.f32 %v1577_v35, %v1565_v43  ;;  %vm6966_vm14 = vcmp.lt.s32.totalorder %v4636_v6, 93  ;;  %v1709_v42 = vrot.slane %v4212_v37, %v4647_v9 }
 0x1bd   : > { %v1591_v47 = vpop.permute.xlu1 %1590  ;;  %v1713_v43 = vrot.slane %v4212_v37, %v4638_v7 }
 0x1be   : > { %v1584_v48 = vpack.c.bf16 %v1582_v40, %v1580_v44  ;;  %v1589_v49 = vpop.permute.xlu0 %1588  ;;  %v1585_v50 = vpack.c.bf16 %v1583_v41, %v1581_v45 }
 0x1c0   : > { %2151 = vmatprep.subr.bf16.mxu0 %v1585_v50 }
 0x1c1   : > { %2152 = vmatpush1.bf16.msra.mxu0 %v1584_v48  ;;  %v1595_v53 = vpop.permute.xlu1 %1594 }
 0x1c2   : > { %v1598_v54 = vsel %vm6965_vm15, %v1591_v47, %v1595_v53  ;;  %v1600_v55 = vsel %vm6965_vm15, %v1595_v53, %v1591_v47  ;;  %v1593_v57 = vpop.permute.xlu0 %1592 }
 0x1c3   : > { %v1616_v58 = vmul.f32 %v1607_v51, %v1598_v54  ;;  %v1617_v59 = vmul.f32 %v1611_v52, %v1600_v55  ;;  %v1597_v60 = vsel %vm6965_vm15, %v1589_v49, %v1593_v57  ;;  %v1599_v2 = vsel %vm6965_vm15, %v1593_v57, %v1589_v49  ;;  %v4213_v54 = vld [vmem:[%s6872_s1 + $0x54] ss:$8 sm:$0x3] }
 0x1c4   : > { %v1614_v61 = vmul.f32 %v1607_v51, %v1597_v60  ;;  %v1615_v62 = vmul.f32 %v1611_v52, %v1599_v2  ;;  %vm6967_vm15 = vcmp.lt.s32.totalorder %v4636_v6, 83  ;;  %v1743_v60 = vrot.slane %v4213_v54, %v4647_v9 }
 0x1c5   : > { %v1625_v4 = vpop.permute.xlu1 %1624  ;;  %v1747_v2 = vrot.slane %v4213_v54, %v4638_v7 }
 0x1c6   : > { %v1618_v0 = vpack.c.bf16 %v1616_v58, %v1614_v61  ;;  %v1623_v5 = vpop.permute.xlu0 %1622  ;;  %v1619_v27 = vpack.c.bf16 %v1617_v59, %v1615_v62 }
 0x1c8   : > { %2153 = vmatprep.subr.bf16.mxu0 %v1619_v27 }
 0x1c9   : > { %2154 = vmatpush1.bf16.msra.mxu0 %v1618_v0  ;;  %v1629_v10 = vpop.permute.xlu1 %1628 }
 0x1ca   : > { %v1632_v17 = vsel %vm6966_vm14, %v1625_v4, %v1629_v10  ;;  %v1634_v11 = vsel %vm6966_vm14, %v1629_v10, %v1625_v4  ;;  %v1627_v12 = vpop.permute.xlu0 %1626 }
 0x1cb   : > { %v1650_v13 = vmul.f32 %v1641_v8, %v1632_v17  ;;  %v1651_v14 = vmul.f32 %v1645_v30, %v1634_v11  ;;  %v1631_v18 = vsel %vm6966_vm14, %v1623_v5, %v1627_v12  ;;  %v1633_v15 = vsel %vm6966_vm14, %v1627_v12, %v1623_v5  ;;  %v4214_v17 = vld [vmem:[%s6872_s1 + $0x55] ss:$8 sm:$0x3] }
 0x1cc   : > { %v1648_v16 = vmul.f32 %v1641_v8, %v1631_v18  ;;  %v1649_v1 = vmul.f32 %v1645_v30, %v1633_v15  ;;  %vm6968_vm14 = vcmp.lt.s32.totalorder %v4636_v6, 82  ;;  %v1777_v18 = vrot.slane %v4214_v17, %v4647_v9 }
 0x1cd   : > { %v1659_v19 = vpop.permute.xlu1 %1658  ;;  %v1781_v15 = vrot.slane %v4214_v17, %v4638_v7 }
 0x1ce   : > { %v1652_v20 = vpack.c.bf16 %v1650_v13, %v1648_v16  ;;  %v1657_v21 = vpop.permute.xlu0 %1656  ;;  %v1653_v22 = vpack.c.bf16 %v1651_v14, %v1649_v1 }
 0x1d0   : > { %2155 = vmatprep.subr.bf16.mxu0 %v1653_v22 }
 0x1d1   : > { %2156 = vmatpush1.bf16.msra.mxu0 %v1652_v20  ;;  %v1663_v25 = vpop.permute.xlu1 %1662 }
 0x1d2   : > { %v1666_v26 = vsel %vm6967_vm15, %v1659_v19, %v1663_v25  ;;  %v1668_v28 = vsel %vm6967_vm15, %v1663_v25, %v1659_v19  ;;  %v1661_v29 = vpop.permute.xlu0 %1660 }
 0x1d3   : > { %v1684_v31 = vmul.f32 %v1675_v23, %v1666_v26  ;;  %v1685_v32 = vmul.f32 %v1679_v24, %v1668_v28  ;;  %v1665_v33 = vsel %vm6967_vm15, %v1657_v21, %v1661_v29  ;;  %v1667_v34 = vsel %vm6967_vm15, %v1661_v29, %v1657_v21  ;;  %v4215_v26 = vld [vmem:[%s6872_s1 + $0x56] ss:$8 sm:$0x3] }
 0x1d4   : > { %v1682_v35 = vmul.f32 %v1675_v23, %v1665_v33  ;;  %v1683_v36 = vmul.f32 %v1679_v24, %v1667_v34  ;;  %vm6969_vm15 = vcmp.lt.s32.totalorder %v4636_v6, 81  ;;  %v1811_v33 = vrot.slane %v4215_v26, %v4647_v9 }
 0x1d5   : > { %v1693_v38 = vpop.permute.xlu1 %1692  ;;  %v1815_v34 = vrot.slane %v4215_v26, %v4638_v7 }
 0x1d6   : > { %v1686_v39 = vpack.c.bf16 %v1684_v31, %v1682_v35  ;;  %v1691_v40 = vpop.permute.xlu0 %1690  ;;  %v1687_v41 = vpack.c.bf16 %v1685_v32, %v1683_v36 }
 0x1d8   : > { %2157 = vmatprep.subr.bf16.mxu0 %v1687_v41 }
 0x1d9   : > { %2158 = vmatpush1.bf16.msra.mxu0 %v1686_v39  ;;  %v1697_v44 = vpop.permute.xlu1 %1696 }
 0x1da   : > { %v1700_v45 = vsel %vm6968_vm14, %v1693_v38, %v1697_v44  ;;  %v1702_v46 = vsel %vm6968_vm14, %v1697_v44, %v1693_v38  ;;  %v1695_v47 = vpop.permute.xlu0 %1694 }
 0x1db   : > { %v1718_v48 = vmul.f32 %v1709_v42, %v1700_v45  ;;  %v1719_v49 = vmul.f32 %v1713_v43, %v1702_v46  ;;  %v1699_v50 = vsel %vm6968_vm14, %v1691_v40, %v1695_v47  ;;  %v1701_v51 = vsel %vm6968_vm14, %v1695_v47, %v1691_v40  ;;  %v4216_v45 = vld [vmem:[%s6872_s1 + $0x57] ss:$8 sm:$0x3] }
 0x1dc   : > { %v1716_v52 = vmul.f32 %v1709_v42, %v1699_v50  ;;  %v1717_v53 = vmul.f32 %v1713_v43, %v1701_v51  ;;  %vm6970_vm14 = vcmp.lt.s32.totalorder %v4636_v6, 80  ;;  %v1845_v50 = vrot.slane %v4216_v45, %v4647_v9 }
 0x1dd   : > { %v1727_v55 = vpop.permute.xlu1 %1726  ;;  %v1849_v51 = vrot.slane %v4216_v45, %v4638_v7 }
 0x1de   : > { %v1720_v57 = vpack.c.bf16 %v1718_v48, %v1716_v52  ;;  %v1725_v58 = vpop.permute.xlu0 %1724  ;;  %v1721_v59 = vpack.c.bf16 %v1719_v49, %v1717_v53 }
 0x1e0   : > { %2159 = vmatprep.subr.bf16.mxu0 %v1721_v59 }
 0x1e1   : > { %2160 = vmatpush1.bf16.msra.mxu0 %v1720_v57  ;;  %v1731_v61 = vpop.permute.xlu1 %1730 }
 0x1e2   : > { %v1734_v62 = vsel %vm6969_vm15, %v1727_v55, %v1731_v61  ;;  %v1736_v63 = vsel %vm6969_vm15, %v1731_v61, %v1727_v55  ;;  %v1729_v4 = vpop.permute.xlu0 %1728 }
 0x1e3   : > { %v1752_v0 = vmul.f32 %v1743_v60, %v1734_v62  ;;  %v1753_v5 = vmul.f32 %v1747_v2, %v1736_v63  ;;  %v1733_v27 = vsel %vm6969_vm15, %v1725_v58, %v1729_v4  ;;  %v1735_v8 = vsel %vm6969_vm15, %v1729_v4, %v1725_v58  ;;  %v4217_v62 = vld [vmem:[%s6872_s1 + $0x60] ss:$8 sm:$0x3] }
 0x1e4   : > { %v1750_v30 = vmul.f32 %v1743_v60, %v1733_v27  ;;  %v1751_v10 = vmul.f32 %v1747_v2, %v1735_v8  ;;  %vm6971_vm15 = vcmp.lt.s32.totalorder %v4636_v6, 79  ;;  %v1879_v27 = vrot.slane %v4217_v62, %v4647_v9 }
 0x1e5   : > { %v1761_v11 = vpop.permute.xlu1 %1760  ;;  %v1883_v8 = vrot.slane %v4217_v62, %v4638_v7 }
 0x1e6   : > { %v1754_v12 = vpack.c.bf16 %v1752_v0, %v1750_v30  ;;  %v1759_v13 = vpop.permute.xlu0 %1758  ;;  %v1755_v14 = vpack.c.bf16 %v1753_v5, %v1751_v10  ;;  %v4382_v30 = vld [vmem:[%s6873_s2 + $0x10] ss:$28 sps:$4 sm:$0xff]  }
 0x1e8   : > { %2161 = vmatprep.subr.bf16.mxu0 %v1755_v14 }
 0x1e9   : > { %2162 = vmatpush1.bf16.msra.mxu0 %v1754_v12  ;;  %v1765_v16 = vpop.permute.xlu1 %1764 }
 0x1ea   : > { %v1768_v1 = vsel %vm6970_vm14, %v1761_v11, %v1765_v16  ;;  %v1770_v3 = vsel %vm6970_vm14, %v1765_v16, %v1761_v11  ;;  %v1763_v19 = vpop.permute.xlu0 %1762 }
 0x1eb   : > { %v1786_v20 = vmul.f32 %v1777_v18, %v1768_v1  ;;  %v1787_v21 = vmul.f32 %v1781_v15, %v1770_v3  ;;  %v1767_v22 = vsel %vm6970_vm14, %v1759_v13, %v1763_v19  ;;  %v1769_v23 = vsel %vm6970_vm14, %v1763_v19, %v1759_v13 }
 0x1ec   : > { %v1784_v24 = vmul.f32 %v1777_v18, %v1767_v22  ;;  %v1785_v25 = vmul.f32 %v1781_v15, %v1769_v23  ;;  %vm6972_vm14 = vcmp.lt.s32.totalorder %v4636_v6, 78 }
 0x1ed   : > { %v1795_v28 = vpop.permute.xlu1 %1794 }
 0x1ee   : > { %v1788_v29 = vpack.c.bf16 %v1786_v20, %v1784_v24  ;;  %v1793_v31 = vpop.permute.xlu0 %1792  ;;  %v1789_v32 = vpack.c.bf16 %v1787_v21, %v1785_v25  ;;  %v4385_v20 = vld [vmem:[%s6873_s2 + $0x18] ss:$28 sps:$4 sm:$0xff]  }
 0x1f0   : > { %2163 = vmatprep.subr.bf16.mxu0 %v1789_v32 }
 0x1f1   : > { %2164 = vmatpush1.bf16.msra.mxu0 %v1788_v29  ;;  %v1799_v35 = vpop.permute.xlu1 %1798  ;;  %v4400_v29 = vld [vmem:[%s4510_s26] sm:$0xff] }
 0x1f2   : > { %v1802_v36 = vsel %vm6971_vm15, %v1795_v28, %v1799_v35  ;;  %v1804_v37 = vsel %vm6971_vm15, %v1799_v35, %v1795_v28  ;;  %v1797_v38 = vpop.permute.xlu0 %1796 }
 0x1f3   : > { %v1820_v39 = vmul.f32 %v1811_v33, %v1802_v36  ;;  %v1821_v40 = vmul.f32 %v1815_v34, %v1804_v37  ;;  %v1801_v41 = vsel %vm6971_vm15, %v1793_v31, %v1797_v38  ;;  %v1803_v42 = vsel %vm6971_vm15, %v1797_v38, %v1793_v31  ;;  %v4402_v38 = vld [vmem:[%s4510_s26 + $0x10] sm:$0xff] }
 0x1f4   : > { %v1818_v43 = vmul.f32 %v1811_v33, %v1801_v41  ;;  %v1819_v44 = vmul.f32 %v1815_v34, %v1803_v42  ;;  %vm1868_vm15 = vcmp.lt.s32.totalorder %v4636_v6, 77  ;;  %v4401_v34 = vld [vmem:[%s4510_s26 + $0x8] sm:$0xff] }
 0x1f5   : > { %v1829_v46 = vpop.permute.xlu1 %1828 }
 0x1f6   : > { %v1822_v47 = vpack.c.bf16 %v1820_v39, %v1818_v43  ;;  %v1827_v48 = vpop.permute.xlu0 %1826  ;;  %v1823_v49 = vpack.c.bf16 %v1821_v40, %v1819_v44  ;;  %v4403_v40 = vld [vmem:[%s4510_s26 + $0x18] sm:$0xff]  ;;  %s6982_s26 = smov 17  }
 0x1f8   : > { %2165 = vmatprep.subr.bf16.mxu0 %v1823_v49 }
 0x1f9   : > { %2166 = vmatpush1.bf16.msra.mxu0 %v1822_v47  ;;  %v1833_v52 = vpop.permute.xlu1 %1832 }
 0x1fa   : > { %v1836_v53 = vsel %vm6972_vm14, %v1829_v46, %v1833_v52  ;;  %v1838_v54 = vsel %vm6972_vm14, %v1833_v52, %v1829_v46  ;;  %v1831_v55 = vpop.permute.xlu0 %1830 }
 0x1fb   : > { %v1854_v57 = vmul.f32 %v1845_v50, %v1836_v53  ;;  %v1855_v58 = vmul.f32 %v1849_v51, %v1838_v54  ;;  %v1835_v59 = vsel %vm6972_vm14, %v1827_v48, %v1831_v55  ;;  %v1837_v60 = vsel %vm6972_vm14, %v1831_v55, %v1827_v48 }
 0x1fc   : > { %v1852_v2 = vmul.f32 %v1845_v50, %v1835_v59  ;;  %v1853_v61 = vmul.f32 %v1849_v51, %v1837_v60  ;;  %vm2047_vm14 = vcmask 130048   ;;  %v4388_v60 = vld [vmem:[%s6875_s4 + $0x4] ss:$28 sps:$4 sm:$0xff]  }
 0x1fd   : > { %v1863_v63 = vpop.permute.xlu1 %1862  ;;  %3963 = vmatprep.mubr.bf16.mxu1 %v4388_v60 }
 0x1fe   : > { %v1856_v4 = vpack.c.bf16 %v1854_v57, %v1852_v2  ;;  %v1861_v0 = vpop.permute.xlu0 %1860  ;;  %v1857_v5 = vpack.c.bf16 %v1855_v58, %v1853_v61 }
 0x200   : > { %2167 = vmatprep.subr.bf16.mxu0 %v1857_v5 }
 0x201   : > { %2168 = vmatpush1.bf16.msra.mxu0 %v1856_v4  ;;  %v1867_v10 = vpop.permute.xlu1 %1866 }
 0x202   : > { %v1870_v17 = vsel %vm1868_vm15, %v1863_v63, %v1867_v10  ;;  %v1872_v11 = vsel %vm1868_vm15, %v1867_v10, %v1863_v63  ;;  %v1865_v12 = vpop.permute.xlu0 %1864 }
 0x203   : > { %v1888_v13 = vmul.f32 %v1879_v27, %v1870_v17  ;;  %v1889_v14 = vmul.f32 %v1883_v8, %v1872_v11  ;;  %v1869_v18 = vsel %vm1868_vm15, %v1861_v0, %v1865_v12  ;;  %v1871_v15 = vsel %vm1868_vm15, %v1865_v12, %v1861_v0 }
 0x204   : > { %v1886_v16 = vmul.f32 %v1879_v27, %v1869_v18  ;;  %v1887_v1 = vmul.f32 %v1883_v8, %v1871_v15  ;;  %2170 = vmatmul.mubr.bf16.vlgmr.msra.gmra.mrb[0].mxu0 %v4382_v30 }
 0x205   : > { %2212 = vmatprep.mubr.bf16.mxu0 %v6977_v56 }
 0x206   : > { %v1890_v3 = vpack.c.bf16 %v1888_v13, %v1886_v16  ;;  %v1891_v19 = vpack.c.bf16 %v1889_v14, %v1887_v1 }
 0x208   : > { %2180 = vmatprep.subr.bf16.mxu0 %v1891_v19 }
 0x209   : > { %2181 = vmatpush1.bf16.msra.mxu0 %v1890_v3 }
 0x210   : > { %4225 = vmatmul.mubr.msk.bf16.vlgmr.msra.gmra.mrb[0].mxu0 %vm2047_vm14, %v4385_v20 }
 0x212   : > { %v2010_v23 = vpop.permute.xlu1 %2009 }
 0x213   : > { %v2005_v21 = vpop.permute.xlu0 %2004 }
 0x2e3   : > { %v2214_v22 = vpop.f32.mrb[0].mxu0 }
 0x2e4   : > { %v4285_v24 = vadd.f32 %v2214_v22, %v2005_v21  ;;  %v2216_v25 = vpop.f32.mrb[1].mxu0 }
 0x2e5   : > { %v4286_v26 = vadd.f32 %v2216_v25, %v2005_v21  ;;  %v2218_v28 = vpop.f32.mrb[2].mxu0  ;;  %v2247_v25 = vld [vmem:[%s6872_s1] ss:$8 sm:$0x3] }
 0x2e6   : > { %v2223_v31 = vadd.f32 %v4400_v29, %v4285_v24  ;;  %v4287_v32 = vadd.f32 %v2218_v28, %v2010_v23  ;;  %v2220_v33 = vpop.f32.mrb[3].mxu0  ;;  %v4226_v29 = vld [vmem:[%s6872_s1 + $0x1] ss:$8 sm:$0x3] }
 0x2e7   : > { %v2224_v35 = vadd.f32 %v4401_v34, %v4286_v26  ;;  %v4288_v36 = vadd.f32 %v2220_v33, %v2010_v23 }
 0x2e8   : > { %2227 = vst [vmem:[%s5637_s20] sm:$0xff] %v2223_v31  ;;  %v5642_v37 = vmax.f32 %v2223_v31, 0.0  ;;  %v2225_v39 = vadd.f32 %v4402_v38, %v4287_v32  ;;  %v2256_v31 = vrot.slane %v2247_v25, %v4638_v7  ;;  %v2252_v32 = vrot.slane %v2247_v25, %v4647_v9 }
 0x2e9   : > { %2228 = vst [vmem:[%s5637_s20 + $0x8] sm:$0xff] %v2224_v35  ;;  %v2226_v41 = vadd.f32 %v4403_v40, %v4288_v36  ;;  %v5733_v43 = vmax.f32 %v2224_v35, 0.0  ;;  %v2284_v38 = vrot.slane %v4226_v29, %v4647_v9 }
 0x2ea   : > { %2229 = vst [vmem:[%s5637_s20 + $0x10] sm:$0xff] %v2225_v39  ;;  %v5648_v42 = vmax.f32 %v2225_v39, 0.0  ;;  %2235 = vrot.lane.b32.xlu1 %v5642_v37, %s4412_s27  ;;  %v2288_v39 = vrot.slane %v4226_v29, %v4638_v7 }
 0x2eb   : > { %2230 = vst [vmem:[%s5637_s20 + $0x18] sm:$0xff] %v2226_v41  ;;  %v5737_v44 = vmax.f32 %v2226_v41, 0.0  ;;  %v4227_v41 = vld [vmem:[%s6872_s1 + $0x2] ss:$8 sm:$0x3] }
 0x2ec   : > { %2237 = vrot.lane.b32.xlu0 %v5648_v42, %s4412_s27 }
 0x2ee   : > { %2267 = vrot.lane.b32.xlu1 %v5642_v37, %s4413_s28 }
 0x2f0   : > { %2269 = vrot.lane.b32.xlu0 %v5648_v42, %s4413_s28 }
 0x2f2   : > { %2299 = vrot.lane.b32.xlu1 %v5642_v37, %s4414_s29 }
 0x2f4   : > { %2301 = vrot.lane.b32.xlu0 %v5648_v42, %s4414_s29 }
 0x2f6   : > { %2331 = vrot.lane.b32.xlu1 %v5642_v37, %s4415_s30 }
 0x2f8   : > { %2333 = vrot.lane.b32.xlu0 %v5648_v42, %s4415_s30 }
 0x2fa   : > { %2363 = vrot.lane.b32.xlu1 %v5642_v37, %s4416_s7 }
 0x2fc   : > { %2365 = vrot.lane.b32.xlu0 %v5648_v42, %s4416_s7 }
 0x2fe   : > { %2395 = vrot.lane.b32.xlu1 %v5642_v37, %s4417_s8 }
 0x300   : > { %2397 = vrot.lane.b32.xlu0 %v5648_v42, %s4417_s8 }
 0x302   : > { %2427 = vrot.lane.b32.xlu1 %v5642_v37, %s4418_s9 }
 0x304   : > { %2429 = vrot.lane.b32.xlu0 %v5648_v42, %s4418_s9 }
 0x306   : > { %2459 = vrot.lane.b32.xlu1 %v5642_v37, %s4419_s10 }
 0x308   : > { %2461 = vrot.lane.b32.xlu0 %v5648_v42, %s4419_s10 }
 0x30a   : > { %2491 = vrot.lane.b32.xlu1 %v5642_v37, %s4420_s11 }
 0x30c   : > { %2493 = vrot.lane.b32.xlu0 %v5648_v42, %s4420_s11 }
 0x30e   : > { %2523 = vrot.lane.b32.xlu1 %v5642_v37, %s4421_s12 }
 0x310   : > { %2525 = vrot.lane.b32.xlu0 %v5648_v42, %s4421_s12 }
 0x312   : > { %2555 = vrot.lane.b32.xlu1 %v5642_v37, %s4422_s13 }
 0x314   : > { %2557 = vrot.lane.b32.xlu0 %v5648_v42, %s4422_s13 }
 0x316   : > { %2587 = vrot.lane.b32.xlu1 %v5642_v37, %s4423_s14 }
 0x318   : > { %2589 = vrot.lane.b32.xlu0 %v5648_v42, %s4423_s14 }
 0x31a   : > { %2619 = vrot.lane.b32.xlu1 %v5642_v37, %s4424_s15 }
 0x31c   : > { %2621 = vrot.lane.b32.xlu0 %v5648_v42, %s4424_s15 }
 0x31e   : > { %2651 = vrot.lane.b32.xlu1 %v5642_v37, %s4425_s16 }
 0x320   : > { %2653 = vrot.lane.b32.xlu0 %v5648_v42, %s4425_s16 }
 0x322   : > { %2683 = vrot.lane.b32.xlu1 %v5642_v37, %s4426_s17 }
 0x324   : > { %2685 = vrot.lane.b32.xlu0 %v5648_v42, %s4426_s17 }
 0x326   : > { %2715 = vrot.lane.b32.xlu1 %v5642_v37, %s6981_s22 }
 0x328   : > { %2717 = vrot.lane.b32.xlu0 %v5648_v42, %s6981_s22 }
 0x32a   : > { %2747 = vrot.lane.b32.xlu1 %v5642_v37, %s6982_s26 }
 0x32c   : > { %2749 = vrot.lane.b32.xlu0 %v5648_v42, %s6982_s26 }
 0x32e   : > { %2779 = vrot.lane.b32.xlu1 %v5642_v37, %s6983_s25 }
 0x330   : > { %2781 = vrot.lane.b32.xlu0 %v5648_v42, %s6983_s25 }
 0x332   : > { %2811 = vrot.lane.b32.xlu1 %v5642_v37, %s6984_s24 }
 0x334   : > { %2813 = vrot.lane.b32.xlu0 %v5648_v42, %s6984_s24 }
 0x336   : > { %2843 = vrot.lane.b32.xlu1 %v5642_v37, %s6985_s23 }
 0x338   : > { %2845 = vrot.lane.b32.xlu0 %v5648_v42, %s6985_s23 }
 0x33a   : > { %2875 = vrot.lane.b32.xlu1 %v5642_v37, %s6986_s19 }
 0x33c   : > { %2877 = vrot.lane.b32.xlu0 %v5648_v42, %s6986_s19 }
 0x33e   : > { %2239 = vrot.lane.b32.xlu1 %v5733_v43, %s4412_s27 }
 0x340   : > { %2241 = vrot.lane.b32.xlu0 %v5737_v44, %s4412_s27 }
 0x342   : > { %2271 = vrot.lane.b32.xlu1 %v5733_v43, %s4413_s28 }
 0x344   : > { %2273 = vrot.lane.b32.xlu0 %v5737_v44, %s4413_s28  ;;  %s7003_s28 = smov 110  }
 0x346   : > { %2303 = vrot.lane.b32.xlu1 %v5733_v43, %s4414_s29 }
 0x348   : > { %2305 = vrot.lane.b32.xlu0 %v5737_v44, %s4414_s29  ;;  %s6987_s29 = smov 3  }
 0x34a   : > { %2335 = vrot.lane.b32.xlu1 %v5733_v43, %s4415_s30 }
 0x34c   : > { %2337 = vrot.lane.b32.xlu0 %v5737_v44, %s4415_s30  ;;  %s6988_s30 = smov 2  }
 0x34e   : > { %2367 = vrot.lane.b32.xlu1 %v5733_v43, %s4416_s7 }
 0x350   : > { %2369 = vrot.lane.b32.xlu0 %v5737_v44, %s4416_s7  ;;  %s6989_s7 = smov 1  }
 0x352   : > { %2399 = vrot.lane.b32.xlu1 %v5733_v43, %s4417_s8 }
 0x354   : > { %2401 = vrot.lane.b32.xlu0 %v5737_v44, %s4417_s8  ;;  %s6991_s8 = smov 127  }
 0x356   : > { %2431 = vrot.lane.b32.xlu1 %v5733_v43, %s4418_s9 }
 0x358   : > { %2433 = vrot.lane.b32.xlu0 %v5737_v44, %s4418_s9  ;;  %s7012_s9 = smov 109  }
 0x35a   : > { %2463 = vrot.lane.b32.xlu1 %v5733_v43, %s4419_s10 }
 0x35c   : > { %2465 = vrot.lane.b32.xlu0 %v5737_v44, %s4419_s10  ;;  %v5771_v45 = vpop.permute.xlu1 %2235 }
 0x35e   : > { %v5773_v46 = vpop.permute.xlu0 %2237  ;;  %2495 = vrot.lane.b32.xlu1 %v5733_v43, %s4420_s11 }
 0x360   : > { %2497 = vrot.lane.b32.xlu0 %v5737_v44, %s4420_s11  ;;  %v5779_v47 = vpop.permute.xlu1 %2267  ;;  %s6998_s11 = smov 113  }
 0x362   : > { %v5781_v48 = vpop.permute.xlu0 %2269  ;;  %2527 = vrot.lane.b32.xlu1 %v5733_v43, %s4421_s12 }
 0x364   : > { %2529 = vrot.lane.b32.xlu0 %v5737_v44, %s4421_s12  ;;  %v5787_v49 = vpop.permute.xlu1 %2299  ;;  %s7088_s12 = smov 78  }
 0x366   : > { %v5789_v50 = vpop.permute.xlu0 %2301  ;;  %2559 = vrot.lane.b32.xlu1 %v5733_v43, %s4422_s13 }
 0x368   : > { %2561 = vrot.lane.b32.xlu0 %v5737_v44, %s4422_s13  ;;  %v5795_v51 = vpop.permute.xlu1 %2331  ;;  %s6994_s13 = smov 126  }
 0x36a   : > { %v5797_v52 = vpop.permute.xlu0 %2333  ;;  %2591 = vrot.lane.b32.xlu1 %v5733_v43, %s4423_s14 }
 0x36c   : > { %2593 = vrot.lane.b32.xlu0 %v5737_v44, %s4423_s14  ;;  %v5803_v53 = vpop.permute.xlu1 %2363  ;;  %s7058_s14 = smov 93  }
 0x36e   : > { %v5805_v54 = vpop.permute.xlu0 %2365  ;;  %2623 = vrot.lane.b32.xlu1 %v5733_v43, %s4424_s15 }
 0x370   : > { %2625 = vrot.lane.b32.xlu0 %v5737_v44, %s4424_s15  ;;  %v5811_v55 = vpop.permute.xlu1 %2395 }
 0x372   : > { %v5813_v57 = vpop.permute.xlu0 %2397  ;;  %2655 = vrot.lane.b32.xlu1 %v5733_v43, %s4425_s16 }
 0x374   : > { %2657 = vrot.lane.b32.xlu0 %v5737_v44, %s4425_s16  ;;  %v5819_v58 = vpop.permute.xlu1 %2427  ;;  %s6999_s16 = smov 112  }
 0x376   : > { %v5821_v59 = vpop.permute.xlu0 %2429  ;;  %2687 = vrot.lane.b32.xlu1 %v5733_v43, %s4426_s17 }
 0x378   : > { %2689 = vrot.lane.b32.xlu0 %v5737_v44, %s4426_s17  ;;  %v5830_v2 = vpop.permute.xlu1 %2459  ;;  %s7063_s17 = smov 83  }
 0x37a   : > { %v5832_v61 = vpop.permute.xlu0 %2461  ;;  %2719 = vrot.lane.b32.xlu1 %v5733_v43, %s6981_s22 }
 0x37c   : > { %2721 = vrot.lane.b32.xlu0 %v5737_v44, %s6981_s22  ;;  %v5838_v62 = vpop.permute.xlu1 %2491 }
 0x37e   : > { %v5840_v63 = vpop.permute.xlu0 %2493  ;;  %2751 = vrot.lane.b32.xlu1 %v5733_v43, %s6982_s26 }
 0x380   : > { %2753 = vrot.lane.b32.xlu0 %v5737_v44, %s6982_s26  ;;  %v5846_v4 = vpop.permute.xlu1 %2523  ;;  %s7068_s26 = smov 82  }
 0x382   : > { %v5848_v0 = vpop.permute.xlu0 %2525  ;;  %2783 = vrot.lane.b32.xlu1 %v5733_v43, %s6983_s25 }
 0x384   : > { %2785 = vrot.lane.b32.xlu0 %v5737_v44, %s6983_s25  ;;  %v5854_v5 = vpop.permute.xlu1 %2555  ;;  %s7000_s25 = smov 111  }
 0x386   : > { %v5856_v27 = vpop.permute.xlu0 %2557  ;;  %2815 = vrot.lane.b32.xlu1 %v5733_v43, %s6984_s24 }
 0x388   : > { %2817 = vrot.lane.b32.xlu0 %v5737_v44, %s6984_s24  ;;  %v5862_v8 = vpop.permute.xlu1 %2587 }
 0x38a   : > { %v5864_v30 = vpop.permute.xlu0 %2589  ;;  %2847 = vrot.lane.b32.xlu1 %v5733_v43, %s6985_s23 }
 0x38c   : > { %2849 = vrot.lane.b32.xlu0 %v5737_v44, %s6985_s23  ;;  %v5870_v10 = vpop.permute.xlu1 %2619  ;;  %s6996_s23 = smov 115  }
 0x38e   : > { %v5872_v17 = vpop.permute.xlu0 %2621  ;;  %2879 = vrot.lane.b32.xlu1 %v5733_v43, %s6986_s19 }
 0x390   : > { %2881 = vrot.lane.b32.xlu0 %v5737_v44, %s6986_s19  ;;  %v5878_v11 = vpop.permute.xlu1 %2651  ;;  %s7038_s19 = smov 97  }
 0x392   : > { %v5880_v12 = vpop.permute.xlu0 %2653  ;;  %2907 = vrot.lane.b32.xlu1 %v5642_v37, %s6987_s29 }
 0x394   : > { %2909 = vrot.lane.b32.xlu0 %v5648_v42, %s6987_s29  ;;  %v5886_v13 = vpop.permute.xlu1 %2683 }
 0x396   : > { %v5888_v14 = vpop.permute.xlu0 %2685  ;;  %2911 = vrot.lane.b32.xlu1 %v5733_v43, %s6987_s29 }
 0x398   : > { %2913 = vrot.lane.b32.xlu0 %v5737_v44, %s6987_s29  ;;  %v5894_v18 = vpop.permute.xlu1 %2715  ;;  %s7043_s29 = smov 96  }
 0x39a   : > { %v5896_v15 = vpop.permute.xlu0 %2717  ;;  %2939 = vrot.lane.b32.xlu1 %v5642_v37, %s6988_s30 }
 0x39c   : > { %2941 = vrot.lane.b32.xlu0 %v5648_v42, %s6988_s30  ;;  %v5902_v16 = vpop.permute.xlu1 %2747 }
 0x39e   : > { %v5904_v1 = vpop.permute.xlu0 %2749  ;;  %2943 = vrot.lane.b32.xlu1 %v5733_v43, %s6988_s30 }
 0x3a0   : > { %2945 = vrot.lane.b32.xlu0 %v5737_v44, %s6988_s30  ;;  %v5910_v3 = vpop.permute.xlu1 %2779  ;;  %s6997_s30 = smov 114  }
 0x3a2   : > { %v5912_v19 = vpop.permute.xlu0 %2781  ;;  %2971 = vrot.lane.b32.xlu1 %v5642_v37, %s6989_s7 }
 0x3a4   : > { %2973 = vrot.lane.b32.xlu0 %v5648_v42, %s6989_s7  ;;  %v5918_v20 = vpop.permute.xlu1 %2811 }
 0x3a6   : > { %v5920_v21 = vpop.permute.xlu0 %2813  ;;  %2975 = vrot.lane.b32.xlu1 %v5733_v43, %s6989_s7 }
 0x3a8   : > { %2977 = vrot.lane.b32.xlu0 %v5737_v44, %s6989_s7  ;;  %v5926_v22 = vpop.permute.xlu1 %2843  ;;  %s7083_s7 = smov 79  }
 0x3aa   : > { %v5928_v23 = vpop.permute.xlu0 %2845  ;;  %3007 = vrot.lane.b32.xlu1 %v5642_v37, %s6991_s8 }
 0x3ab   : > { %6990 = vst [vmem:[#allocation3_spill] sm:$0xff] %v5928_v23 }
 0x3ac   : > { %3009 = vrot.lane.b32.xlu0 %v5648_v42, %s6991_s8  ;;  %v5934_v24 = vpop.permute.xlu1 %2875 }
 0x3ad   : > { %6992 = vst [vmem:[#allocation4_spill] sm:$0xff] %v5934_v24  ;;  %v2316_v24 = vrot.slane %v4227_v41, %v4647_v9 }
 0x3ae   : > { %v5939_v26 = vpop.permute.xlu0 %2877  ;;  %3011 = vrot.lane.b32.xlu1 %v5733_v43, %s6991_s8 }
 0x3af   : > { %6993 = vst [vmem:[#allocation5_spill] sm:$0xff] %v5939_v26 }
 0x3b0   : > { %3013 = vrot.lane.b32.xlu0 %v5737_v44, %s6991_s8  ;;  %v2240_v28 = vpop.permute.xlu1 %2239  ;;  %s7048_s8 = smov 95  }
 0x3b1   : > { %v2245_v33 = vsel %vm267_vm0, %v2240_v28, %v5771_v45  ;;  %v2243_v34 = vsel %vm267_vm0, %v5771_v45, %v2240_v28 }
 0x3b2   : > { %v2242_v35 = vpop.permute.xlu0 %2241  ;;  %3039 = vrot.lane.b32.xlu1 %v5642_v37, %s6994_s13  ;;  %v2260_v60 = vmul.f32 %v2256_v31, %v2243_v34  ;;  %v2259_v28 = vmul.f32 %v2252_v32, %v2245_v33  ;;  %v2320_v33 = vrot.slane %v4227_v41, %v4638_v7 }
 0x3b3   : > { %v2246_v36 = vsel %vm267_vm0, %v2242_v35, %v5773_v46  ;;  %v2244_v40 = vsel %vm267_vm0, %v5773_v46, %v2242_v35  ;;  %vm7001_vm0 = vcmp.lt.s32.totalorder %v4636_v6, 19 }
 0x3b4   : > { %3041 = vrot.lane.b32.xlu0 %v5648_v42, %s6994_s13  ;;  %v2272_v45 = vpop.permute.xlu1 %2271  ;;  %v2262_v25 = vmul.f32 %v2256_v31, %v2244_v40  ;;  %v2261_v56 = vmul.f32 %v2252_v32, %v2246_v36 }
 0x3b5   : > { %v2275_v29 = vsel %vm300_vm1, %v5779_v47, %v2272_v45  ;;  %v2277_v46 = vsel %vm300_vm1, %v2272_v45, %v5779_v47  ;;  %v4228_v47 = vld [vmem:[%s6872_s1 + $0x3] ss:$8 sm:$0x3] }
 0x3b6   : > { %v2274_v35 = vpop.permute.xlu0 %2273  ;;  %3043 = vrot.lane.b32.xlu1 %v5733_v43, %s6994_s13  ;;  %v2264_v26 = vpack.c.bf16 %v2262_v25, %v2260_v60  ;;  %v2263_v23 = vpack.c.bf16 %v2261_v56, %v2259_v28  ;;  %v2291_v34 = vmul.f32 %v2284_v38, %v2277_v46  ;;  %v2292_v36 = vmul.f32 %v2288_v39, %v2275_v29 }
 0x3b7   : > { %v2276_v31 = vsel %vm300_vm1, %v5781_v48, %v2274_v35  ;;  %v2278_v32 = vsel %vm300_vm1, %v2274_v35, %v5781_v48  ;;  %vm7002_vm1 = vmmov %vm7001_vm0 }
 0x3b8   : > { %v2293_v40 = vmul.f32 %v2284_v38, %v2278_v32  ;;  %v2294_v45 = vmul.f32 %v2288_v39, %v2276_v31  ;;  %3045 = vrot.lane.b32.xlu0 %v5737_v44, %s6994_s13  ;;  %3931 = vmatprep.subr.bf16.mxu1 %v2264_v26  ;;  %v2304_v56 = vpop.permute.xlu1 %2303  ;;  %v2348_v39 = vrot.slane %v4228_v47, %v4647_v9 }
 0x3b9   : > { %v2307_v60 = vsel %vm334_vm2, %v5787_v49, %v2304_v56  ;;  %v2309_v48 = vsel %vm334_vm2, %v2304_v56, %v5787_v49  ;;  %3932 = vmatpush1.bf16.msra.mxu1 %v2263_v23  ;;  %v2352_v49 = vrot.slane %v4228_v47, %v4638_v7  ;;  %v4229_v23 = vld [vmem:[%s6872_s1 + $0x4] ss:$8 sm:$0x3] }
 0x3ba   : > { %v2306_v41 = vpop.permute.xlu0 %2305  ;;  %3071 = vrot.lane.b32.xlu1 %v5642_v37, %s6995_s18  ;;  %v2296_v38 = vpack.c.bf16 %v2294_v45, %v2292_v36  ;;  %v2295_v25 = vpack.c.bf16 %v2293_v40, %v2291_v34  ;;  %v2323_v28 = vmul.f32 %v2316_v24, %v2309_v48  ;;  %v2324_v46 = vmul.f32 %v2320_v33, %v2307_v60  ;;  %v4230_v60 = vld [vmem:[%s6872_s1 + $0x5] ss:$8 sm:$0x3] }
 0x3bb   : > { %v2308_v26 = vsel %vm334_vm2, %v5789_v50, %v2306_v41  ;;  %v2310_v29 = vsel %vm334_vm2, %v2306_v41, %v5789_v50  ;;  %vm7004_vm2 = vmmov %vm7001_vm0 }
 0x3bc   : > { %v2325_v35 = vmul.f32 %v2316_v24, %v2310_v29  ;;  %v2326_v31 = vmul.f32 %v2320_v33, %v2308_v26  ;;  %3073 = vrot.lane.b32.xlu0 %v5648_v42, %s6995_s18  ;;  %3933 = vmatprep.subr.bf16.mxu1 %v2296_v38  ;;  %v2336_v34 = vpop.permute.xlu1 %2335  ;;  %v2380_v33 = vrot.slane %v4229_v23, %v4647_v9 }
 0x3bd   : > { %v2339_v32 = vsel %vm368_vm3, %v5795_v51, %v2336_v34  ;;  %v2341_v50 = vsel %vm368_vm3, %v2336_v34, %v5795_v51  ;;  %3934 = vmatpush1.bf16.msra.mxu1 %v2295_v25  ;;  %v2384_v51 = vrot.slane %v4229_v23, %v4638_v7  ;;  %v2412_v29 = vrot.slane %v4230_v60, %v4647_v9 }
 0x3be   : > { %v2338_v47 = vpop.permute.xlu0 %2337  ;;  %3075 = vrot.lane.b32.xlu1 %v5733_v43, %s6995_s18  ;;  %v2328_v24 = vpack.c.bf16 %v2326_v31, %v2324_v46  ;;  %v2327_v36 = vpack.c.bf16 %v2325_v35, %v2323_v28  ;;  %v2355_v40 = vmul.f32 %v2348_v39, %v2341_v50  ;;  %v2356_v48 = vmul.f32 %v2352_v49, %v2339_v32  ;;  %v4231_v31 = vld [vmem:[%s6872_s1 + $0x6] ss:$8 sm:$0x3] }
 0x3bf   : > { %v2340_v45 = vsel %vm368_vm3, %v5797_v52, %v2338_v47  ;;  %v2342_v56 = vsel %vm368_vm3, %v2338_v47, %v5797_v52  ;;  %vm7005_vm3 = vmmov %vm7001_vm0 }
 0x3c0   : > { %v2357_v41 = vmul.f32 %v2348_v39, %v2342_v56  ;;  %v2358_v38 = vmul.f32 %v2352_v49, %v2340_v45  ;;  %3077 = vrot.lane.b32.xlu0 %v5737_v44, %s6995_s18  ;;  %3935 = vmatprep.subr.bf16.mxu1 %v2328_v24  ;;  %v2368_v25 = vpop.permute.xlu1 %2367  ;;  %s7021_s18 = smov 99  }
 0x3c1   : > { %v2371_v28 = vsel %vm402_vm4, %v5803_v53, %v2368_v25  ;;  %v2373_v52 = vsel %vm402_vm4, %v2368_v25, %v5803_v53  ;;  %3936 = vmatpush1.bf16.msra.mxu1 %v2327_v36  ;;  %v2416_v53 = vrot.slane %v4230_v60, %v4638_v7 }
 0x3c2   : > { %v2370_v26 = vpop.permute.xlu0 %2369  ;;  %3103 = vrot.lane.b32.xlu1 %v5642_v37, %s6996_s23  ;;  %v2360_v39 = vpack.c.bf16 %v2358_v38, %v2356_v48  ;;  %v2359_v49 = vpack.c.bf16 %v2357_v41, %v2355_v40  ;;  %v2387_v23 = vmul.f32 %v2380_v33, %v2373_v52  ;;  %v2388_v34 = vmul.f32 %v2384_v51, %v2371_v28  ;;  %v4232_v48 = vld [vmem:[%s6872_s1 + $0x7] ss:$8 sm:$0x3] }
 0x3c3   : > { %v2372_v46 = vsel %vm402_vm4, %v5805_v54, %v2370_v26  ;;  %v2374_v35 = vsel %vm402_vm4, %v2370_v26, %v5805_v54  ;;  %v2444_v40 = vrot.slane %v4231_v31, %v4647_v9  ;;  %vm7006_vm4 = vcmp.lt.s32.totalorder %v4636_v6, 18 }
 0x3c4   : > { %v2389_v32 = vmul.f32 %v2380_v33, %v2374_v35  ;;  %v2390_v50 = vmul.f32 %v2384_v51, %v2372_v46  ;;  %3105 = vrot.lane.b32.xlu0 %v5648_v42, %s6996_s23  ;;  %3937 = vmatprep.subr.bf16.mxu1 %v2360_v39  ;;  %v2400_v47 = vpop.permute.xlu1 %2399 }
 0x3c5   : > { %v2403_v24 = vsel %vm436_vm5, %v5811_v55, %v2400_v47  ;;  %v2405_v54 = vsel %vm436_vm5, %v2400_v47, %v5811_v55  ;;  %3938 = vmatpush1.bf16.msra.mxu1 %v2359_v49  ;;  %v2448_v55 = vrot.slane %v4231_v31, %v4638_v7 }
 0x3c6   : > { %v2402_v36 = vpop.permute.xlu0 %2401  ;;  %3107 = vrot.lane.b32.xlu1 %v5733_v43, %s6996_s23  ;;  %v2392_v33 = vpack.c.bf16 %v2390_v50, %v2388_v34  ;;  %v2391_v45 = vpack.c.bf16 %v2389_v32, %v2387_v23  ;;  %v2419_v56 = vmul.f32 %v2412_v29, %v2405_v54  ;;  %v2420_v41 = vmul.f32 %v2416_v53, %v2403_v24 }
 0x3c7   : > { %v2404_v51 = vsel %vm436_vm5, %v5813_v57, %v2402_v36  ;;  %v2406_v60 = vsel %vm436_vm5, %v2402_v36, %v5813_v57  ;;  %vm7007_vm5 = vmmov %vm7006_vm4 }
 0x3c8   : > { %v2421_v38 = vmul.f32 %v2412_v29, %v2406_v60  ;;  %v2422_v25 = vmul.f32 %v2416_v53, %v2404_v51  ;;  %3109 = vrot.lane.b32.xlu0 %v5737_v44, %s6996_s23  ;;  %3939 = vmatprep.subr.bf16.mxu1 %v2392_v33  ;;  %v2432_v28 = vpop.permute.xlu1 %2431  ;;  %v2476_v29 = vrot.slane %v4232_v48, %v4647_v9  ;;  %v4233_v53 = vld [vmem:[%s6872_s1 + $0x10] ss:$8 sm:$0x3]  ;;  %v4234_v51 = vld [vmem:[%s6872_s1 + $0x11] ss:$8 sm:$0x3] }
 0x3c9   : > { %v2435_v52 = vsel %vm470_vm6, %v5819_v58, %v2432_v28  ;;  %v2437_v57 = vsel %vm470_vm6, %v2432_v28, %v5819_v58  ;;  %3940 = vmatpush1.bf16.msra.mxu1 %v2391_v45  ;;  %v2480_v58 = vrot.slane %v4232_v48, %v4638_v7  ;;  %v2508_v36 = vrot.slane %v4233_v53, %v4647_v9  ;;  %s7073_s23 = smov 81  }
 0x3ca   : > { %v2434_v26 = vpop.permute.xlu0 %2433  ;;  %3135 = vrot.lane.b32.xlu1 %v5642_v37, %s6997_s30  ;;  %v2424_v39 = vpack.c.bf16 %v2422_v25, %v2420_v41  ;;  %v2423_v49 = vpack.c.bf16 %v2421_v38, %v2419_v56  ;;  %v2451_v23 = vmul.f32 %v2444_v40, %v2437_v57  ;;  %v2452_v31 = vmul.f32 %v2448_v55, %v2435_v52 }
 0x3cb   : > { %v2436_v46 = vsel %vm470_vm6, %v5821_v59, %v2434_v26  ;;  %v2438_v35 = vsel %vm470_vm6, %v2434_v26, %v5821_v59  ;;  %v2540_v52 = vrot.slane %v4234_v51, %v4647_v9  ;;  %vm7008_vm6 = vmmov %vm7006_vm4 }
 0x3cc   : > { %v2453_v34 = vmul.f32 %v2444_v40, %v2438_v35  ;;  %v2454_v32 = vmul.f32 %v2448_v55, %v2436_v46  ;;  %3137 = vrot.lane.b32.xlu0 %v5648_v42, %s6997_s30  ;;  %3941 = vmatprep.subr.bf16.mxu1 %v2424_v39  ;;  %v2464_v50 = vpop.permute.xlu1 %2463 }
 0x3cd   : > { %v2467_v47 = vsel %vm504_vm7, %v5830_v2, %v2464_v50  ;;  %v2469_v59 = vsel %vm504_vm7, %v2464_v50, %v5830_v2  ;;  %3942 = vmatpush1.bf16.msra.mxu1 %v2423_v49  ;;  %v2512_v2 = vrot.slane %v4233_v53, %v4638_v7  ;;  %v4235_v49 = vld [vmem:[%s6872_s1 + $0x12] ss:$8 sm:$0x3] }
 0x3ce   : > { %v2466_v24 = vpop.permute.xlu0 %2465  ;;  %3139 = vrot.lane.b32.xlu1 %v5733_v43, %s6997_s30  ;;  %v2456_v54 = vpack.c.bf16 %v2454_v32, %v2452_v31  ;;  %v2455_v33 = vpack.c.bf16 %v2453_v34, %v2451_v23  ;;  %v2483_v40 = vmul.f32 %v2476_v29, %v2469_v59  ;;  %v2484_v60 = vmul.f32 %v2480_v58, %v2467_v47 }
 0x3cf   : > { %v2468_v45 = vsel %vm504_vm7, %v5832_v61, %v2466_v24  ;;  %v2470_v56 = vsel %vm504_vm7, %v2466_v24, %v5832_v61  ;;  %v2572_v32 = vrot.slane %v4235_v49, %v4647_v9  ;;  %vm7009_vm7 = vmmov %vm7006_vm4 }
 0x3d0   : > { %v2485_v55 = vmul.f32 %v2476_v29, %v2470_v56  ;;  %v2486_v48 = vmul.f32 %v2480_v58, %v2468_v45  ;;  %3141 = vrot.lane.b32.xlu0 %v5737_v44, %s6997_s30  ;;  %3943 = vmatprep.subr.bf16.mxu1 %v2456_v54  ;;  %v2496_v41 = vpop.permute.xlu1 %2495  ;;  %v4236_v54 = vld [vmem:[%s6872_s1 + $0x13] ss:$8 sm:$0x3] }
 0x3d1   : > { %v2499_v38 = vsel %vm538_vm8, %v5838_v62, %v2496_v41  ;;  %v2501_v61 = vsel %vm538_vm8, %v2496_v41, %v5838_v62  ;;  %3944 = vmatpush1.bf16.msra.mxu1 %v2455_v33  ;;  %v2544_v62 = vrot.slane %v4234_v51, %v4638_v7 }
 0x3d2   : > { %v2498_v25 = vpop.permute.xlu0 %2497  ;;  %3167 = vrot.lane.b32.xlu1 %v5642_v37, %s6998_s11  ;;  %v2488_v28 = vpack.c.bf16 %v2486_v48, %v2484_v60  ;;  %v2487_v57 = vpack.c.bf16 %v2485_v55, %v2483_v40  ;;  %v2515_v26 = vmul.f32 %v2508_v36, %v2501_v61  ;;  %v2516_v23 = vmul.f32 %v2512_v2, %v2499_v38  ;;  %v4237_v61 = vld [vmem:[%s6872_s1 + $0x14] ss:$8 sm:$0x3] }
 0x3d3   : > { %v2500_v39 = vsel %vm538_vm8, %v5840_v63, %v2498_v25  ;;  %v2502_v29 = vsel %vm538_vm8, %v2498_v25, %v5840_v63  ;;  %v2604_v60 = vrot.slane %v4236_v54, %v4647_v9  ;;  %vm7010_vm8 = vcmp.lt.s32.totalorder %v4636_v6, 17 }
 0x3d4   : > { %v2517_v46 = vmul.f32 %v2508_v36, %v2502_v29  ;;  %v2518_v35 = vmul.f32 %v2512_v2, %v2500_v39  ;;  %3169 = vrot.lane.b32.xlu0 %v5648_v42, %s6998_s11  ;;  %3945 = vmatprep.subr.bf16.mxu1 %v2488_v28  ;;  %v2528_v58 = vpop.permute.xlu1 %2527 }
 0x3d5   : > { %v2531_v53 = vsel %vm572_vm9, %v5846_v4, %v2528_v58  ;;  %v2533_v63 = vsel %vm572_vm9, %v2528_v58, %v5846_v4  ;;  %3946 = vmatpush1.bf16.msra.mxu1 %v2487_v57  ;;  %v2576_v4 = vrot.slane %v4235_v49, %v4638_v7  ;;  %v4238_v58 = vld [vmem:[%s6872_s1 + $0x15] ss:$8 sm:$0x3] }
 0x3d6   : > { %v2530_v31 = vpop.permute.xlu0 %2529  ;;  %3171 = vrot.lane.b32.xlu1 %v5733_v43, %s6998_s11  ;;  %v2520_v34 = vpack.c.bf16 %v2518_v35, %v2516_v23  ;;  %v2519_v50 = vpack.c.bf16 %v2517_v46, %v2515_v26  ;;  %v2547_v47 = vmul.f32 %v2540_v52, %v2533_v63  ;;  %v2548_v36 = vmul.f32 %v2544_v62, %v2531_v53 }
 0x3d7   : > { %v2532_v59 = vsel %vm572_vm9, %v5848_v0, %v2530_v31  ;;  %v2534_v24 = vsel %vm572_vm9, %v2530_v31, %v5848_v0  ;;  %vm7011_vm9 = vmmov %vm7010_vm8 }
 0x3d8   : > { %v2549_v33 = vmul.f32 %v2540_v52, %v2534_v24  ;;  %v2550_v40 = vmul.f32 %v2544_v62, %v2532_v59  ;;  %3173 = vrot.lane.b32.xlu0 %v5737_v44, %s6998_s11  ;;  %3947 = vmatprep.subr.bf16.mxu1 %v2520_v34  ;;  %v2560_v45 = vpop.permute.xlu1 %2559  ;;  %v2636_v62 = vrot.slane %v4237_v61, %v4647_v9  ;;  %s7053_s11 = smov 94  }
 0x3d9   : > { %v2563_v56 = vsel %vm606_vm10, %v5854_v5, %v2560_v45  ;;  %v2565_v0 = vsel %vm606_vm10, %v2560_v45, %v5854_v5  ;;  %3948 = vmatpush1.bf16.msra.mxu1 %v2519_v50  ;;  %v2608_v5 = vrot.slane %v4236_v54, %v4638_v7  ;;  %v2668_v59 = vrot.slane %v4238_v58, %v4647_v9 }
 0x3da   : > { %v2562_v2 = vpop.permute.xlu0 %2561  ;;  %3199 = vrot.lane.b32.xlu1 %v5642_v37, %s6999_s16  ;;  %v2552_v51 = vpack.c.bf16 %v2550_v40, %v2548_v36  ;;  %v2551_v55 = vpack.c.bf16 %v2549_v33, %v2547_v47  ;;  %v2579_v48 = vmul.f32 %v2572_v32, %v2565_v0  ;;  %v2580_v25 = vmul.f32 %v2576_v4, %v2563_v56  ;;  %v4239_v33 = vld [vmem:[%s6872_s1 + $0x16] ss:$8 sm:$0x3] }
 0x3db   : > { %v2564_v41 = vsel %vm606_vm10, %v5856_v27, %v2562_v2  ;;  %v2566_v38 = vsel %vm606_vm10, %v2562_v2, %v5856_v27  ;;  %vm7013_vm10 = vmmov %vm7010_vm8 }
 0x3dc   : > { %v2581_v28 = vmul.f32 %v2572_v32, %v2566_v38  ;;  %v2582_v52 = vmul.f32 %v2576_v4, %v2564_v41  ;;  %3201 = vrot.lane.b32.xlu0 %v5648_v42, %s6999_s16  ;;  %3949 = vmatprep.subr.bf16.mxu1 %v2552_v51  ;;  %v2592_v57 = vpop.permute.xlu1 %2591 }
 0x3dd   : > { %v2595_v26 = vsel %vm640_vm11, %v5862_v8, %v2592_v57  ;;  %v2597_v27 = vsel %vm640_vm11, %v2592_v57, %v5862_v8  ;;  %3950 = vmatpush1.bf16.msra.mxu1 %v2551_v55  ;;  %v2640_v8 = vrot.slane %v4237_v61, %v4638_v7  ;;  %v2700_v55 = vrot.slane %v4239_v33, %v4647_v9  ;;  %v4240_v61 = vld [vmem:[%s6872_s1 + $0x17] ss:$8 sm:$0x3] }
 0x3de   : > { %v2594_v39 = vpop.permute.xlu0 %2593  ;;  %3203 = vrot.lane.b32.xlu1 %v5733_v43, %s6999_s16  ;;  %v2584_v29 = vpack.c.bf16 %v2582_v52, %v2580_v25  ;;  %v2583_v49 = vpack.c.bf16 %v2581_v28, %v2579_v48  ;;  %v2611_v23 = vmul.f32 %v2604_v60, %v2597_v27  ;;  %v2612_v53 = vmul.f32 %v2608_v5, %v2595_v26 }
 0x3df   : > { %v2596_v46 = vsel %vm640_vm11, %v5864_v30, %v2594_v39  ;;  %v2598_v35 = vsel %vm640_vm11, %v2594_v39, %v5864_v30  ;;  %vm7014_vm11 = vmmov %vm7010_vm8 }
 0x3e0   : > { %v2613_v63 = vmul.f32 %v2604_v60, %v2598_v35  ;;  %v2614_v31 = vmul.f32 %v2608_v5, %v2596_v46  ;;  %3205 = vrot.lane.b32.xlu0 %v5737_v44, %s6999_s16  ;;  %3951 = vmatprep.subr.bf16.mxu1 %v2584_v29  ;;  %v2624_v34 = vpop.permute.xlu1 %2623  ;;  %v2732_v29 = vrot.slane %v4240_v61, %v4647_v9  ;;  %v4241_v35 = vld [vmem:[%s6872_s1 + $0x20] ss:$8 sm:$0x3] }
 0x3e1   : > { %v2627_v32 = vsel %vm674_vm12, %v5870_v10, %v2624_v34  ;;  %v2629_v30 = vsel %vm674_vm12, %v2624_v34, %v5870_v10  ;;  %3952 = vmatpush1.bf16.msra.mxu1 %v2583_v49  ;;  %v2672_v10 = vrot.slane %v4238_v58, %v4638_v7 }
 0x3e2   : > { %v2626_v50 = vpop.permute.xlu0 %2625  ;;  %3231 = vrot.lane.b32.xlu1 %v5642_v37, %s7000_s25  ;;  %v2616_v47 = vpack.c.bf16 %v2614_v31, %v2612_v53  ;;  %v2615_v24 = vpack.c.bf16 %v2613_v63, %v2611_v23  ;;  %v2643_v4 = vmul.f32 %v2636_v62, %v2629_v30  ;;  %v2644_v40 = vmul.f32 %v2640_v8, %v2627_v32 }
 0x3e3   : > { %v2628_v54 = vsel %vm674_vm12, %v5872_v17, %v2626_v50  ;;  %v2630_v36 = vsel %vm674_vm12, %v2626_v50, %v5872_v17  ;;  %v2764_v30 = vrot.slane %v4241_v35, %v4647_v9  ;;  %vm7015_vm12 = vcmp.lt.s32.totalorder %v4636_v6, 16 }
 0x3e4   : > { %v2645_v45 = vmul.f32 %v2636_v62, %v2630_v36  ;;  %v2646_v56 = vmul.f32 %v2640_v8, %v2628_v54  ;;  %3233 = vrot.lane.b32.xlu0 %v5648_v42, %s7000_s25  ;;  %3953 = vmatprep.subr.bf16.mxu1 %v2616_v47  ;;  %v2656_v0 = vpop.permute.xlu1 %2655 }
 0x3e5   : > { %v2659_v2 = vsel %vm708_vm13, %v5878_v11, %v2656_v0  ;;  %v2661_v17 = vsel %vm708_vm13, %v2656_v0, %v5878_v11  ;;  %3954 = vmatpush1.bf16.msra.mxu1 %v2615_v24  ;;  %v2704_v11 = vrot.slane %v4239_v33, %v4638_v7  ;;  %v4242_v33 = vld [vmem:[%s6872_s1 + $0x21] ss:$8 sm:$0x3] }
 0x3e6   : > { %v2658_v51 = vpop.permute.xlu0 %2657  ;;  %3235 = vrot.lane.b32.xlu1 %v5733_v43, %s7000_s25  ;;  %v2648_v60 = vpack.c.bf16 %v2646_v56, %v2644_v40  ;;  %v2647_v48 = vpack.c.bf16 %v2645_v45, %v2643_v4  ;;  %v2675_v41 = vmul.f32 %v2668_v59, %v2661_v17  ;;  %v2676_v25 = vmul.f32 %v2672_v10, %v2659_v2 }
 0x3e7   : > { %v2660_v38 = vsel %vm708_vm13, %v5880_v12, %v2658_v51  ;;  %v2662_v5 = vsel %vm708_vm13, %v2658_v51, %v5880_v12  ;;  %vm7016_vm13 = vmmov %vm7015_vm12 }
 0x3e8   : > { %v2677_v28 = vmul.f32 %v2668_v59, %v2662_v5  ;;  %v2678_v52 = vmul.f32 %v2672_v10, %v2660_v38  ;;  %3237 = vrot.lane.b32.xlu0 %v5737_v44, %s7000_s25  ;;  %3955 = vmatprep.subr.bf16.mxu1 %v2648_v60  ;;  %v2688_v57 = vpop.permute.xlu1 %2687  ;;  %v2796_v60 = vrot.slane %v4242_v33, %v4647_v9  ;;  %v4243_v38 = vld [vmem:[%s6872_s1 + $0x22] ss:$8 sm:$0x3]  ;;  %s7032_s25 = smov 98  }
 0x3e9   : > { %v2691_v26 = vsel %vm7001_vm0, %v5886_v13, %v2688_v57  ;;  %v2693_v12 = vsel %vm7002_vm1, %v2688_v57, %v5886_v13  ;;  %3956 = vmatpush1.bf16.msra.mxu1 %v2647_v48  ;;  %v2736_v13 = vrot.slane %v4240_v61, %v4638_v7  ;;  %v2800_v5 = vrot.slane %v4242_v33, %v4638_v7  ;;  %vm7017_vm0 = vmmov %vm7015_vm12 }
 0x3ea   : > { %v2690_v27 = vpop.permute.xlu0 %2689  ;;  %3263 = vrot.lane.b32.xlu1 %v5642_v37, %s7003_s28  ;;  %v2680_v39 = vpack.c.bf16 %v2678_v52, %v2676_v25  ;;  %v2679_v62 = vpack.c.bf16 %v2677_v28, %v2675_v41  ;;  %v2707_v49 = vmul.f32 %v2700_v55, %v2693_v12  ;;  %v2708_v8 = vmul.f32 %v2704_v11, %v2691_v26  ;;  %vm7018_vm1 = vmmov %vm7017_vm0 }
 0x3eb   : > { %v2692_v23 = vsel %vm7004_vm2, %v5888_v14, %v2690_v27  ;;  %v2694_v46 = vsel %vm7005_vm3, %v2690_v27, %v5888_v14  ;;  %v2828_v12 = vrot.slane %v4243_v38, %v4647_v9  ;;  %v4391_v27 = vld [vmem:[%s6875_s4 + $0xc] ss:$28 sps:$4 sm:$0xff]   ;;  %vm7019_vm2 = vcmp.lt.s32.totalorder %v4636_v6, 15 }
 0x3ec   : > { %v2709_v58 = vmul.f32 %v2700_v55, %v2694_v46  ;;  %v2710_v53 = vmul.f32 %v2704_v11, %v2692_v23  ;;  %3265 = vrot.lane.b32.xlu0 %v5648_v42, %s7003_s28  ;;  %3957 = vmatprep.subr.bf16.mxu1 %v2680_v39  ;;  %v2720_v63 = vpop.permute.xlu1 %2719  ;;  %v4386_v11 = vld [vmem:[%s6875_s4] ss:$28 sps:$4 sm:$0xff]   ;;  %v2832_v23 = vrot.slane %v4243_v38, %v4638_v7  ;;  %vm7020_vm3 = vmmov %vm7019_vm2 }
 0x3ed   : > { %v2723_v31 = vsel %vm7006_vm4, %v5894_v18, %v2720_v63  ;;  %v2725_v14 = vsel %vm7007_vm5, %v2720_v63, %v5894_v18  ;;  %3958 = vmatpush1.bf16.msra.mxu1 %v2679_v62  ;;  %v2768_v18 = vrot.slane %v4241_v35, %v4638_v7  ;;  %v4244_v46 = vld [vmem:[%s6872_s1 + $0x23] ss:$8 sm:$0x3]  ;;  %vm7022_vm4 = vmmov %vm7019_vm2 }
 0x3ee   : > { %v2722_v34 = vpop.permute.xlu0 %2721  ;;  %3267 = vrot.lane.b32.xlu1 %v5733_v43, %s7003_s28  ;;  %v2712_v32 = vpack.c.bf16 %v2710_v53, %v2708_v8  ;;  %v2711_v50 = vpack.c.bf16 %v2709_v58, %v2707_v49  ;;  %v2739_v47 = vmul.f32 %v2732_v29, %v2725_v14  ;;  %v2740_v4 = vmul.f32 %v2736_v13, %v2723_v31  ;;  %vm7023_vm5 = vmmov %vm7019_vm2 }
 0x3ef   : > { %v2724_v59 = vsel %vm7008_vm6, %v5896_v15, %v2722_v34  ;;  %v2726_v24 = vsel %vm7009_vm7, %v2722_v34, %v5896_v15  ;;  %vm7024_vm6 = vcmp.lt.s32.totalorder %v4636_v6, 14 }
 0x3f0   : > { %v2741_v54 = vmul.f32 %v2732_v29, %v2726_v24  ;;  %v2742_v36 = vmul.f32 %v2736_v13, %v2724_v59  ;;  %3269 = vrot.lane.b32.xlu0 %v5737_v44, %s7003_s28  ;;  %3959 = vmatprep.subr.bf16.mxu1 %v2712_v32  ;;  %v2752_v10 = vpop.permute.xlu1 %2751  ;;  %vm7025_vm7 = vmmov %vm7024_vm6  ;;  %s7078_s28 = smov 80  }
 0x3f1   : > { %v2755_v40 = vsel %vm7010_vm8, %v5902_v16, %v2752_v10  ;;  %v2757_v15 = vsel %vm7011_vm9, %v2752_v10, %v5902_v16  ;;  %3960 = vmatpush1.bf16.msra.mxu1 %v2711_v50  ;;  %vm7027_vm8 = vmmov %vm7024_vm6 }
 0x3f2   : > { %v2754_v45 = vpop.permute.xlu0 %2753  ;;  %3295 = vrot.lane.b32.xlu1 %v5642_v37, %s7012_s9  ;;  %v2744_v56 = vpack.c.bf16 %v2742_v36, %v2740_v4  ;;  %v2743_v0 = vpack.c.bf16 %v2741_v54, %v2739_v47  ;;  %v2771_v2 = vmul.f32 %v2764_v30, %v2757_v15  ;;  %v2772_v55 = vmul.f32 %v2768_v18, %v2755_v40  ;;  %v7026_v4 = vld [vmem:[#allocation3_spill] sm:$0xff]  ;;  %vm7028_vm9 = vmmov %vm7024_vm6 }
 0x3f3   : > { %v2756_v17 = vsel %vm7013_vm10, %v5904_v1, %v2754_v45  ;;  %v2758_v51 = vsel %vm7014_vm11, %v2754_v45, %v5904_v1  ;;  %v2864_v47 = vrot.slane %v4244_v46, %v4638_v7  ;;  %vm7030_vm10 = vcmp.lt.s32.totalorder %v4636_v6, 13 }
 0x3f4   : > { %v2773_v16 = vmul.f32 %v2764_v30, %v2758_v51  ;;  %v2774_v48 = vmul.f32 %v2768_v18, %v2756_v17  ;;  %3297 = vrot.lane.b32.xlu0 %v5648_v42, %s7012_s9  ;;  %3961 = vmatprep.subr.bf16.mxu1 %v2744_v56  ;;  %v2784_v41 = vpop.permute.xlu1 %2783  ;;  %v4245_v30 = vld [vmem:[%s6872_s1 + $0x24] ss:$8 sm:$0x3]  ;;  %vm7031_vm11 = vmmov %vm7030_vm10 }
 0x3f5   : > { %v2789_v1 = vsel %vm7015_vm12, %v2784_v41, %v5910_v3  ;;  %3962 = vmatpush1.bf16.msra.mxu1 %v2743_v0  ;;  %v2787_v25 = vsel %vm7016_vm13, %v5910_v3, %v2784_v41  ;;  %v2892_v33 = vrot.slane %v4245_v30, %v4647_v9  ;;  %vm7034_vm12 = vmmov %vm7030_vm10 }
 0x3f6   : > { %v2775_v61 = vpack.c.bf16 %v2773_v16, %v2771_v2  ;;  %v2786_v28 = vpop.permute.xlu0 %2785  ;;  %3299 = vrot.lane.b32.xlu1 %v5733_v43, %s7012_s9  ;;  %v2776_v52 = vpack.c.bf16 %v2774_v48, %v2772_v55  ;;  %v2803_v3 = vmul.f32 %v2796_v60, %v2789_v1  ;;  %v2804_v49 = vmul.f32 %v2800_v5, %v2787_v25  ;;  %v7029_v2 = vld [vmem:[#allocation4_spill] sm:$0xff]  ;;  %v7033_v16 = vld [vmem:[#allocation5_spill] sm:$0xff]  ;;  %vm7035_vm13 = vmmov %vm7030_vm10 }
 0x3f7   : > { %v2788_v57 = vsel %vm7017_vm0, %v5912_v19, %v2786_v28  ;;  %v2790_v26 = vsel %vm7018_vm1, %v2786_v28, %v5912_v19  ;;  %v4246_v28 = vld [vmem:[%s6872_s1 + $0x25] ss:$8 sm:$0x3]  ;;  %vm7036_vm0 = vcmp.lt.s32.totalorder %v4636_v6, 3 }
 0x3f8   : > { %v2805_v39 = vmul.f32 %v2796_v60, %v2790_v26  ;;  %v2806_v29 = vmul.f32 %v2800_v5, %v2788_v57  ;;  %3301 = vrot.lane.b32.xlu0 %v5737_v44, %s7012_s9  ;;  %3974 = vmatprep.subr.bf16.mxu1 %v2776_v52  ;;  %v2816_v62 = vpop.permute.xlu1 %2815  ;;  %vm7037_vm1 = vmmov %vm7036_vm0 }
 0x3f9   : > { %v2821_v19 = vsel %vm7019_vm2, %v2816_v62, %v5918_v20  ;;  %3964 = vmatmul.mubr.bf16.vlgmr.msra.gmra.mrb[0].mxu1 %v4386_v11  ;;  %v2819_v35 = vsel %vm7020_vm3, %v5918_v20, %v2816_v62  ;;  %v2860_v20 = vrot.slane %v4244_v46, %v4647_v9  ;;  %vm7039_vm2 = vmmov %vm7036_vm0 }
 0x3fa   : > { %v2807_v13 = vpack.c.bf16 %v2805_v39, %v2803_v3  ;;  %3975 = vmatpush1.bf16.msra.mxu1 %v2775_v61  ;;  %v2818_v8 = vpop.permute.xlu0 %2817  ;;  %3327 = vrot.lane.b32.xlu1 %v5642_v37, %s7021_s18  ;;  %v2808_v63 = vpack.c.bf16 %v2806_v29, %v2804_v49  ;;  %v2835_v31 = vmul.f32 %v2828_v12, %v2821_v19  ;;  %vm7040_vm3 = vmmov %vm7036_vm0 }
 0x3fb   : > { %v2820_v58 = vsel %vm7022_vm4, %v5920_v21, %v2818_v8  ;;  %v2822_v53 = vsel %vm7023_vm5, %v2818_v8, %v5920_v21  ;;  %4006 = vmatprep.mubr.bf16.mxu1 %v4391_v27  ;;  %v2836_v50 = vmul.f32 %v2832_v23, %v2819_v35  ;;  %v2928_v27 = vrot.slane %v4246_v28, %v4638_v7 }
 0x3fc   : > { %v2837_v14 = vmul.f32 %v2828_v12, %v2822_v53  ;;  %v2838_v34 = vmul.f32 %v2832_v23, %v2820_v58  ;;  %3329 = vrot.lane.b32.xlu0 %v5648_v42, %s7021_s18  ;;  %v2848_v32 = vpop.permute.xlu1 %2847  ;;  %3976 = vmatprep.subr.bf16.mxu1 %v2808_v63  ;;  %v2924_v12 = vrot.slane %v4246_v28, %v4647_v9  ;;  %v4247_v58 = vld [vmem:[%s6872_s1 + $0x26] ss:$8 sm:$0x3]  ;;  %vm7041_vm4 = vcmp.lt.s32.totalorder %v4636_v6, 2 }
 0x3fd   : > { %v2853_v21 = vsel %vm7024_vm6, %v2848_v32, %v5926_v22  ;;  %v2851_v24 = vsel %vm7025_vm7, %v5926_v22, %v2848_v32  ;;  %v2896_v22 = vrot.slane %v4245_v30, %v4638_v7  ;;  %vm7042_vm5 = vmmov %vm7041_vm4 }
 0x3fe   : > { %v2839_v59 = vpack.c.bf16 %v2837_v14, %v2835_v31  ;;  %3977 = vmatpush1.bf16.msra.mxu1 %v2807_v13  ;;  %v2850_v18 = vpop.permute.xlu0 %2849  ;;  %3331 = vrot.lane.b32.xlu1 %v5733_v43, %s7021_s18  ;;  %v2840_v10 = vpack.c.bf16 %v2838_v34, %v2836_v50  ;;  %v2867_v40 = vmul.f32 %v2860_v20, %v2853_v21  ;;  %vm7044_vm6 = vmmov %vm7041_vm4 }
 0x3ff   : > { %v2852_v54 = vsel %vm7027_vm8, %v7026_v4, %v2850_v18  ;;  %v2854_v36 = vsel %vm7028_vm9, %v2850_v18, %v7026_v4  ;;  %v2868_v0 = vmul.f32 %v2864_v47, %v2851_v24  ;;  %v2956_v14 = vrot.slane %v4247_v58, %v4647_v9  ;;  %vm7045_vm7 = vmmov %vm7041_vm4 }
 0x400   : > { %v2869_v15 = vmul.f32 %v2860_v20, %v2854_v36  ;;  %v2870_v45 = vmul.f32 %v2864_v47, %v2852_v54  ;;  %3333 = vrot.lane.b32.xlu0 %v5737_v44, %s7021_s18  ;;  %v2880_v56 = vpop.permute.xlu1 %2879  ;;  %3978 = vmatprep.subr.bf16.mxu1 %v2840_v10  ;;  %v2960_v34 = vrot.slane %v4247_v58, %v4638_v7  ;;  %v4248_v36 = vld [vmem:[%s6872_s1 + $0x27] ss:$8 sm:$0x3]  ;;  %vm7046_vm8 = vcmp.lt.s32.totalorder %v4636_v6, 1 }
 0x401   : > { %v2883_v17 = vsel %vm7030_vm10, %v7029_v2, %v2880_v56  ;;  %v2885_v51 = vsel %vm7031_vm11, %v2880_v56, %v7029_v2  ;;  %vm7047_vm9 = vmmov %vm7046_vm8 }
 0x402   : > { %v2871_v60 = vpack.c.bf16 %v2869_v15, %v2867_v40  ;;  %3979 = vmatpush1.bf16.msra.mxu1 %v2839_v59  ;;  %v2882_v55 = vpop.permute.xlu0 %2881  ;;  %3359 = vrot.lane.b32.xlu1 %v5642_v37, %s7032_s25  ;;  %v2872_v38 = vpack.c.bf16 %v2870_v45, %v2868_v0  ;;  %v2899_v5 = vmul.f32 %v2892_v33, %v2885_v51  ;;  %vm7049_vm10 = vmmov %vm7046_vm8 }
 0x403   : > { %v2884_v48 = vsel %vm7034_vm12, %v7033_v16, %v2882_v55  ;;  %v2886_v41 = vsel %vm7035_vm13, %v2882_v55, %v7033_v16  ;;  %v2900_v1 = vmul.f32 %v2896_v22, %v2883_v17  ;;  %v2988_v15 = vrot.slane %v4248_v36, %v4647_v9  ;;  %vm7050_vm11 = vmmov %vm7046_vm8 }
 0x404   : > { %v2901_v11 = vmul.f32 %v2892_v33, %v2886_v41  ;;  %v2902_v61 = vmul.f32 %v2896_v22, %v2884_v48  ;;  %3361 = vrot.lane.b32.xlu0 %v5648_v42, %s7032_s25  ;;  %v2908_v25 = vpop.permute.xlu1 %2907  ;;  %3980 = vmatprep.subr.bf16.mxu1 %v2872_v38  ;;  %v2992_v45 = vrot.slane %v4248_v36, %v4638_v7  ;;  %v4249_v38 = vld [vmem:[%s6872_s1 + $0x31] ss:$8 sm:$0x3]  ;;  %vm7051_vm12 = vcmp.lt.s32.totalorder %v4636_v6, 127 }
 0x405   : > { %vm7052_vm13 = vmmov %vm7051_vm12 }
 0x406   : > { %v2903_v52 = vpack.c.bf16 %v2901_v11, %v2899_v5  ;;  %3981 = vmatpush1.bf16.msra.mxu1 %v2871_v60  ;;  %v2910_v57 = vpop.permute.xlu0 %2909  ;;  %3363 = vrot.lane.b32.xlu1 %v5733_v43, %s7032_s25  ;;  %v2904_v26 = vpack.c.bf16 %v2902_v61, %v2900_v1  ;;  %v3024_v61 = vrot.slane %v4249_v38, %v4647_v9 }
 0x408   : > { %3365 = vrot.lane.b32.xlu0 %v5737_v44, %s7032_s25  ;;  %3982 = vmatprep.subr.bf16.mxu1 %v2904_v26  ;;  %v2912_v3 = vpop.permute.xlu1 %2911 }
 0x409   : > { %v2915_v39 = vsel %vm7036_vm0, %v2908_v25, %v2912_v3  ;;  %v2917_v29 = vsel %vm7037_vm1, %v2912_v3, %v2908_v25  ;;  %v3028_v25 = vrot.slane %v4249_v38, %v4638_v7  ;;  %vm7054_vm0 = vmmov %vm7051_vm12 }
 0x40a   : > { %3983 = vmatpush1.bf16.msra.mxu1 %v2903_v52  ;;  %v2914_v62 = vpop.permute.xlu0 %2913  ;;  %3391 = vrot.lane.b32.xlu1 %v5642_v37, %s7038_s19  ;;  %v2931_v19 = vmul.f32 %v2924_v12, %v2917_v29  ;;  %v2932_v46 = vmul.f32 %v2928_v27, %v2915_v39  ;;  %v3004_v52 = vpack.c.bf16 %v5737_v44, %v5733_v43  ;;  %vm7055_vm1 = vmmov %vm7054_vm0 }
 0x40b   : > { %v2916_v49 = vsel %vm7039_vm2, %v2910_v57, %v2914_v62  ;;  %v2918_v23 = vsel %vm7040_vm3, %v2914_v62, %v2910_v57  ;;  %v3003_v39 = vpack.c.bf16 %v5648_v42, %v5642_v37  ;;  %vm7056_vm2 = vcmp.lt.s32.totalorder %v4636_v6, 126 }
 0x40c   : > { %v2933_v13 = vmul.f32 %v2924_v12, %v2918_v23  ;;  %v2934_v35 = vmul.f32 %v2928_v27, %v2916_v49  ;;  %3393 = vrot.lane.b32.xlu0 %v5648_v42, %s7038_s19  ;;  %v2940_v8 = vpop.permute.xlu1 %2939  ;;  %vm7057_vm3 = vmmov %vm7056_vm2 }
 0x40e   : > { %v2935_v53 = vpack.c.bf16 %v2933_v13, %v2931_v19  ;;  %v2942_v63 = vpop.permute.xlu0 %2941  ;;  %3395 = vrot.lane.b32.xlu1 %v5733_v43, %s7038_s19  ;;  %v2936_v31 = vpack.c.bf16 %v2934_v35, %v2932_v46  ;;  %v4250_v46 = vld [vmem:[%s6872_s1 + $0x32] ss:$8 sm:$0x3] }
 0x40f   : > { %v3056_v58 = vrot.slane %v4250_v46, %v4647_v9 }
 0x410   : > { %3397 = vrot.lane.b32.xlu0 %v5737_v44, %s7038_s19  ;;  %3984 = vmatprep.subr.bf16.mxu1 %v2936_v31  ;;  %v2944_v20 = vpop.permute.xlu1 %2943 }
 0x411   : > { %v2947_v32 = vsel %vm7041_vm4, %v2940_v8, %v2944_v20  ;;  %v2949_v30 = vsel %vm7042_vm5, %v2944_v20, %v2940_v8  ;;  %3985 = vmatpush1.bf16.msra.mxu1 %v2935_v53  ;;  %v3060_v53 = vrot.slane %v4250_v46, %v4638_v7  ;;  %vm7059_vm4 = vmmov %vm7056_vm2 }
 0x412   : > { %v2946_v50 = vpop.permute.xlu0 %2945  ;;  %3423 = vrot.lane.b32.xlu1 %v5642_v37, %s7043_s29  ;;  %v2963_v59 = vmul.f32 %v2956_v14, %v2949_v30  ;;  %v2964_v24 = vmul.f32 %v2960_v34, %v2947_v32  ;;  %vm7060_vm5 = vmmov %vm7056_vm2 }
 0x413   : > { %v2948_v47 = vsel %vm7044_vm6, %v2942_v63, %v2946_v50  ;;  %v2950_v21 = vsel %vm7045_vm7, %v2946_v50, %v2942_v63  ;;  %vm7061_vm6 = vcmp.lt.s32.totalorder %v4636_v6, 125 }
 0x414   : > { %v2965_v18 = vmul.f32 %v2956_v14, %v2950_v21  ;;  %v2966_v4 = vmul.f32 %v2960_v34, %v2948_v47  ;;  %3425 = vrot.lane.b32.xlu0 %v5648_v42, %s7043_s29  ;;  %v2972_v54 = vpop.permute.xlu1 %2971  ;;  %vm7062_vm7 = vmmov %vm7061_vm6 }
 0x416   : > { %v2967_v10 = vpack.c.bf16 %v2965_v18, %v2963_v59  ;;  %v2974_v33 = vpop.permute.xlu0 %2973  ;;  %3427 = vrot.lane.b32.xlu1 %v5733_v43, %s7043_s29  ;;  %v2968_v40 = vpack.c.bf16 %v2966_v4, %v2964_v24  ;;  %v4251_v24 = vld [vmem:[%s6872_s1 + $0x33] ss:$8 sm:$0x3] }
 0x417   : > { %v3088_v36 = vrot.slane %v4251_v24, %v4647_v9 }
 0x418   : > { %3429 = vrot.lane.b32.xlu0 %v5737_v44, %s7043_s29  ;;  %3986 = vmatprep.subr.bf16.mxu1 %v2968_v40  ;;  %v2976_v22 = vpop.permute.xlu1 %2975 }
 0x419   : > { %v2979_v56 = vsel %vm7046_vm8, %v2972_v54, %v2976_v22  ;;  %v2981_v0 = vsel %vm7047_vm9, %v2976_v22, %v2972_v54  ;;  %3987 = vmatpush1.bf16.msra.mxu1 %v2967_v10  ;;  %v3092_v10 = vrot.slane %v4251_v24, %v4638_v7  ;;  %vm7064_vm8 = vmmov %vm7061_vm6 }
 0x41a   : > { %v2978_v2 = vpop.permute.xlu0 %2977  ;;  %3455 = vrot.lane.b32.xlu1 %v5642_v37, %s7048_s8  ;;  %v2995_v60 = vmul.f32 %v2988_v15, %v2981_v0  ;;  %v2996_v55 = vmul.f32 %v2992_v45, %v2979_v56  ;;  %vm7065_vm9 = vmmov %vm7061_vm6 }
 0x41b   : > { %v2980_v17 = vsel %vm7049_vm10, %v2974_v33, %v2978_v2  ;;  %v2982_v51 = vsel %vm7050_vm11, %v2978_v2, %v2974_v33  ;;  %vm7066_vm10 = vcmp.lt.s32.totalorder %v4636_v6, 115 }
 0x41c   : > { %v2997_v16 = vmul.f32 %v2988_v15, %v2982_v51  ;;  %v2998_v48 = vmul.f32 %v2992_v45, %v2980_v17  ;;  %3457 = vrot.lane.b32.xlu0 %v5648_v42, %s7048_s8  ;;  %v3008_v41 = vpop.permute.xlu1 %3007  ;;  %vm7067_vm11 = vmmov %vm7066_vm10 }
 0x41e   : > { %v2999_v5 = vpack.c.bf16 %v2997_v16, %v2995_v60  ;;  %v3010_v1 = vpop.permute.xlu0 %3009  ;;  %3459 = vrot.lane.b32.xlu1 %v5733_v43, %s7048_s8  ;;  %v3000_v11 = vpack.c.bf16 %v2998_v48, %v2996_v55  ;;  %v4252_v55 = vld [vmem:[%s6872_s1 + $0x34] ss:$8 sm:$0x3] }
 0x41f   : > { %v3120_v38 = vrot.slane %v4252_v55, %v4647_v9 }
 0x420   : > { %3461 = vrot.lane.b32.xlu0 %v5737_v44, %s7048_s8  ;;  %3988 = vmatprep.subr.bf16.mxu1 %v3000_v11  ;;  %v3012_v28 = vpop.permute.xlu1 %3011 }
 0x421   : > { %v3015_v57 = vsel %vm7051_vm12, %v3008_v41, %v3012_v28  ;;  %v3017_v26 = vsel %vm7052_vm13, %v3012_v28, %v3008_v41  ;;  %3989 = vmatpush1.bf16.msra.mxu1 %v2999_v5  ;;  %v3124_v5 = vrot.slane %v4252_v55, %v4638_v7  ;;  %vm7069_vm12 = vmmov %vm7066_vm10 }
 0x422   : > { %v3014_v12 = vpop.permute.xlu0 %3013  ;;  %3487 = vrot.lane.b32.xlu1 %v5642_v37, %s7053_s11  ;;  %3990 = vmatprep.subr.bf16.mxu1 %v3004_v52  ;;  %v3031_v29 = vmul.f32 %v3024_v61, %v3015_v57  ;;  %v3032_v62 = vmul.f32 %v3028_v25, %v3017_v26  ;;  %vm7070_vm13 = vmmov %vm7066_vm10 }
 0x423   : > { %v3016_v27 = vsel %vm7054_vm0, %v3010_v1, %v3014_v12  ;;  %v3018_v3 = vsel %vm7055_vm1, %v3014_v12, %v3010_v1  ;;  %vm7071_vm0 = vcmp.lt.s32.totalorder %v4636_v6, 114 }
 0x424   : > { %v3033_v49 = vmul.f32 %v3024_v61, %v3016_v27  ;;  %v3034_v23 = vmul.f32 %v3028_v25, %v3018_v3  ;;  %3489 = vrot.lane.b32.xlu0 %v5648_v42, %s7053_s11  ;;  %v3040_v19 = vpop.permute.xlu1 %3039  ;;  %vm7072_vm1 = vmmov %vm7071_vm0 }
 0x425   : > { %3991 = vmatpush1.bf16.msra.mxu1 %v3003_v39  ;;  %v4253_v39 = vld [vmem:[%s6872_s1 + $0x35] ss:$8 sm:$0x3] }
 0x426   : > { %v3035_v13 = vpack.c.bf16 %v3033_v49, %v3031_v29  ;;  %v3042_v35 = vpop.permute.xlu0 %3041  ;;  %3491 = vrot.lane.b32.xlu1 %v5733_v43, %s7053_s11  ;;  %v3036_v8 = vpack.c.bf16 %v3034_v23, %v3032_v62  ;;  %v3152_v23 = vrot.slane %v4253_v39, %v4647_v9 }
 0x428   : > { %3493 = vrot.lane.b32.xlu0 %v5737_v44, %s7053_s11  ;;  %v3044_v63 = vpop.permute.xlu1 %3043  ;;  %3992 = vmatprep.subr.bf16.mxu1 %v3036_v8 }
 0x429   : > { %v3047_v31 = vsel %vm7056_vm2, %v3040_v19, %v3044_v63  ;;  %v3049_v14 = vsel %vm7057_vm3, %v3044_v63, %v3040_v19  ;;  %3993 = vmatpush1.bf16.msra.mxu1 %v3035_v13  ;;  %v3156_v19 = vrot.slane %v4253_v39, %v4638_v7  ;;  %vm7074_vm2 = vmmov %vm7071_vm0 }
 0x42a   : > { %v3046_v34 = vpop.permute.xlu0 %3045  ;;  %3519 = vrot.lane.b32.xlu1 %v5642_v37, %s7058_s14  ;;  %v3063_v30 = vmul.f32 %v3056_v58, %v3047_v31  ;;  %v3064_v50 = vmul.f32 %v3060_v53, %v3049_v14  ;;  %vm7075_vm3 = vmmov %vm7071_vm0 }
 0x42b   : > { %v3048_v20 = vsel %vm7059_vm4, %v3042_v35, %v3046_v34  ;;  %v3050_v32 = vsel %vm7060_vm5, %v3046_v34, %v3042_v35  ;;  %vm7076_vm4 = vcmp.lt.s32.totalorder %v4636_v6, 113 }
 0x42c   : > { %v3065_v47 = vmul.f32 %v3056_v58, %v3048_v20  ;;  %v3066_v21 = vmul.f32 %v3060_v53, %v3050_v32  ;;  %3521 = vrot.lane.b32.xlu0 %v5648_v42, %s7058_s14  ;;  %v3072_v59 = vpop.permute.xlu1 %3071  ;;  %v4254_v32 = vld [vmem:[%s6872_s1 + $0x36] ss:$8 sm:$0x3]  ;;  %vm7077_vm5 = vmmov %vm7076_vm4 }
 0x42e   : > { %v3067_v18 = vpack.c.bf16 %v3065_v47, %v3063_v30  ;;  %v3074_v4 = vpop.permute.xlu0 %3073  ;;  %3523 = vrot.lane.b32.xlu1 %v5733_v43, %s7058_s14  ;;  %v3068_v54 = vpack.c.bf16 %v3066_v21, %v3064_v50  ;;  %v3184_v21 = vrot.slane %v4254_v32, %v4647_v9 }
 0x430   : > { %3525 = vrot.lane.b32.xlu0 %v5737_v44, %s7058_s14  ;;  %v3076_v33 = vpop.permute.xlu1 %3075  ;;  %3994 = vmatprep.subr.bf16.mxu1 %v3068_v54 }
 0x431   : > { %v3079_v40 = vsel %vm7061_vm6, %v3072_v59, %v3076_v33  ;;  %v3081_v15 = vsel %vm7062_vm7, %v3076_v33, %v3072_v59  ;;  %3995 = vmatpush1.bf16.msra.mxu1 %v3067_v18  ;;  %v3188_v59 = vrot.slane %v4254_v32, %v4638_v7  ;;  %vm7079_vm6 = vmmov %vm7076_vm4 }
 0x432   : > { %v3078_v45 = vpop.permute.xlu0 %3077  ;;  %3551 = vrot.lane.b32.xlu1 %v5642_v37, %s7063_s17  ;;  %v3095_v0 = vmul.f32 %v3088_v36, %v3079_v40  ;;  %v3096_v2 = vmul.f32 %v3092_v10, %v3081_v15  ;;  %vm7080_vm7 = vmmov %vm7076_vm4 }
 0x433   : > { %v3080_v22 = vsel %vm7064_vm8, %v3074_v4, %v3078_v45  ;;  %v3082_v56 = vsel %vm7065_vm9, %v3078_v45, %v3074_v4  ;;  %vm7081_vm8 = vcmp.lt.s32.totalorder %v4636_v6, 112 }
 0x434   : > { %v3097_v17 = vmul.f32 %v3088_v36, %v3080_v22  ;;  %v3098_v51 = vmul.f32 %v3092_v10, %v3082_v56  ;;  %3553 = vrot.lane.b32.xlu0 %v5648_v42, %s7063_s17  ;;  %v3104_v60 = vpop.permute.xlu1 %3103  ;;  %v4255_v56 = vld [vmem:[%s6872_s1 + $0x37] ss:$8 sm:$0x3]  ;;  %vm7082_vm9 = vmmov %vm7081_vm8 }
 0x436   : > { %v3099_v16 = vpack.c.bf16 %v3097_v17, %v3095_v0  ;;  %v3106_v48 = vpop.permute.xlu0 %3105  ;;  %3555 = vrot.lane.b32.xlu1 %v5733_v43, %s7063_s17  ;;  %v3100_v41 = vpack.c.bf16 %v3098_v51, %v3096_v2  ;;  %v3216_v51 = vrot.slane %v4255_v56, %v4647_v9 }
 0x438   : > { %3557 = vrot.lane.b32.xlu0 %v5737_v44, %s7063_s17  ;;  %v3108_v1 = vpop.permute.xlu1 %3107  ;;  %3996 = vmatprep.subr.bf16.mxu1 %v3100_v41  ;;  %s7093_s17 = smov 77  }
 0x439   : > { %v3111_v11 = vsel %vm7066_vm10, %v3104_v60, %v3108_v1  ;;  %v3113_v61 = vsel %vm7067_vm11, %v3108_v1, %v3104_v60  ;;  %3997 = vmatpush1.bf16.msra.mxu1 %v3099_v16  ;;  %v3220_v60 = vrot.slane %v4255_v56, %v4638_v7  ;;  %vm7084_vm10 = vmmov %vm7081_vm8 }
 0x43a   : > { %v3110_v25 = vpop.permute.xlu0 %3109  ;;  %3583 = vrot.lane.b32.xlu1 %v5642_v37, %s7068_s26  ;;  %v3127_v57 = vmul.f32 %v3120_v38, %v3111_v11  ;;  %v3128_v26 = vmul.f32 %v3124_v5, %v3113_v61  ;;  %vm7085_vm11 = vmmov %vm7081_vm8 }
 0x43b   : > { %v3112_v28 = vsel %vm7069_vm12, %v3106_v48, %v3110_v25  ;;  %v3114_v52 = vsel %vm7070_vm13, %v3110_v25, %v3106_v48  ;;  %vm7086_vm12 = vcmp.lt.s32.totalorder %v4636_v6, 111 }
 0x43c   : > { %v3129_v12 = vmul.f32 %v3120_v38, %v3112_v28  ;;  %v3130_v27 = vmul.f32 %v3124_v5, %v3114_v52  ;;  %3585 = vrot.lane.b32.xlu0 %v5648_v42, %s7068_s26  ;;  %v3136_v3 = vpop.permute.xlu1 %3135  ;;  %v4256_v52 = vld [vmem:[%s6872_s1 + $0x40] ss:$8 sm:$0x3]  ;;  %vm7087_vm13 = vmmov %vm7086_vm12 }
 0x43e   : > { %v3131_v29 = vpack.c.bf16 %v3129_v12, %v3127_v57  ;;  %v3138_v62 = vpop.permute.xlu0 %3137  ;;  %3587 = vrot.lane.b32.xlu1 %v5733_v43, %s7068_s26  ;;  %v3132_v49 = vpack.c.bf16 %v3130_v27, %v3128_v26  ;;  %v3248_v27 = vrot.slane %v4256_v52, %v4647_v9 }
 0x440   : > { %3589 = vrot.lane.b32.xlu0 %v5737_v44, %s7068_s26  ;;  %v3140_v46 = vpop.permute.xlu1 %3139  ;;  %3998 = vmatprep.subr.bf16.mxu1 %v3132_v49 }
 0x441   : > { %v3143_v13 = vsel %vm7071_vm0, %v3136_v3, %v3140_v46  ;;  %v3145_v35 = vsel %vm7072_vm1, %v3140_v46, %v3136_v3  ;;  %3999 = vmatpush1.bf16.msra.mxu1 %v3131_v29  ;;  %v3252_v3 = vrot.slane %v4256_v52, %v4638_v7  ;;  %v4389_v29 = vld [vmem:[%s6875_s4 + $0x8] ss:$28 sps:$4 sm:$0xff]   ;;  %vm7089_vm0 = vmmov %vm7086_vm12 }
 0x442   : > { %v3142_v8 = vpop.permute.xlu0 %3141  ;;  %3615 = vrot.lane.b32.xlu1 %v5642_v37, %s7073_s23  ;;  %v3159_v63 = vmul.f32 %v3152_v23, %v3143_v13  ;;  %v3160_v31 = vmul.f32 %v3156_v19, %v3145_v35  ;;  %vm7090_vm1 = vmmov %vm7089_vm0 }
 0x443   : > { %v3144_v58 = vsel %vm7074_vm2, %v3138_v62, %v3142_v8  ;;  %v3146_v53 = vsel %vm7075_vm3, %v3142_v8, %v3138_v62  ;;  %vm7091_vm2 = vcmp.lt.s32.totalorder %v4636_v6, 110 }
 0x444   : > { %v3161_v14 = vmul.f32 %v3152_v23, %v3144_v58  ;;  %v3162_v34 = vmul.f32 %v3156_v19, %v3146_v53  ;;  %3617 = vrot.lane.b32.xlu0 %v5648_v42, %s7073_s23  ;;  %v3168_v20 = vpop.permute.xlu1 %3167  ;;  %v4394_v19 = vld [vmem:[%s6875_s4 + $0x14] ss:$28 sps:$4 sm:$0xff]   ;;  %vm7092_vm3 = vmmov %vm7091_vm2 }
 0x446   : > { %v3163_v30 = vpack.c.bf16 %v3161_v14, %v3159_v63  ;;  %v3170_v50 = vpop.permute.xlu0 %3169  ;;  %3619 = vrot.lane.b32.xlu1 %v5733_v43, %s7073_s23  ;;  %v3164_v47 = vpack.c.bf16 %v3162_v34, %v3160_v31  ;;  %v4257_v31 = vld [vmem:[%s6872_s1 + $0x41] ss:$8 sm:$0x3] }
 0x447   : > { %v3280_v32 = vrot.slane %v4257_v31, %v4647_v9 }
 0x448   : > { %3621 = vrot.lane.b32.xlu0 %v5737_v44, %s7073_s23  ;;  %v3172_v24 = vpop.permute.xlu1 %3171  ;;  %4000 = vmatprep.subr.bf16.mxu1 %v3164_v47 }
 0x449   : > { %v3175_v18 = vsel %vm7076_vm4, %v3168_v20, %v3172_v24  ;;  %v3177_v4 = vsel %vm7077_vm5, %v3172_v24, %v3168_v20  ;;  %4001 = vmatpush1.bf16.msra.mxu1 %v3163_v30  ;;  %v3284_v30 = vrot.slane %v4257_v31, %v4638_v7  ;;  %vm7094_vm4 = vmmov %vm7091_vm2 }
 0x44a   : > { %v3174_v54 = vpop.permute.xlu0 %3173  ;;  %3647 = vrot.lane.b32.xlu1 %v5642_v37, %s7078_s28  ;;  %v3191_v33 = vmul.f32 %v3184_v21, %v3175_v18  ;;  %v3192_v40 = vmul.f32 %v3188_v59, %v3177_v4  ;;  %vm7095_vm5 = vmmov %vm7091_vm2 }
 0x44b   : > { %v3176_v36 = vsel %vm7079_vm6, %v3170_v50, %v3174_v54  ;;  %v3178_v10 = vsel %vm7080_vm7, %v3174_v54, %v3170_v50  ;;  %vm7096_vm6 = vcmp.lt.s32.totalorder %v4636_v6, 109 }
 0x44c   : > { %v3193_v15 = vmul.f32 %v3184_v21, %v3176_v36  ;;  %v3194_v45 = vmul.f32 %v3188_v59, %v3178_v10  ;;  %3649 = vrot.lane.b32.xlu0 %v5648_v42, %s7078_s28  ;;  %v3200_v22 = vpop.permute.xlu1 %3199  ;;  %vm7097_vm7 = vmmov %vm7096_vm6 }
 0x44e   : > { %v3195_v0 = vpack.c.bf16 %v3193_v15, %v3191_v33  ;;  %v3202_v2 = vpop.permute.xlu0 %3201  ;;  %3651 = vrot.lane.b32.xlu1 %v5733_v43, %s7078_s28  ;;  %v3196_v17 = vpack.c.bf16 %v3194_v45, %v3192_v40  ;;  %v4258_v40 = vld [vmem:[%s6872_s1 + $0x42] ss:$8 sm:$0x3] }
 0x44f   : > { %v3316_v56 = vrot.slane %v4258_v40, %v4638_v7 }
 0x450   : > { %3653 = vrot.lane.b32.xlu0 %v5737_v44, %s7078_s28  ;;  %v3204_v55 = vpop.permute.xlu1 %3203  ;;  %4002 = vmatprep.subr.bf16.mxu1 %v3196_v17  ;;  %v3882_v17 = vld [vmem:[%s6876_s5 + $0x8] sm:$0xff] }
 0x451   : > { %v3207_v16 = vsel %vm7081_vm8, %v3200_v22, %v3204_v55  ;;  %v3209_v48 = vsel %vm7082_vm9, %v3204_v55, %v3200_v22  ;;  %4003 = vmatpush1.bf16.msra.mxu1 %v3195_v0  ;;  %v3881_v22 = vld [vmem:[%s6876_s5] sm:$0xff]  ;;  %vm7098_vm8 = vmmov %vm7096_vm6 }
 0x452   : > { %v3206_v41 = vpop.permute.xlu0 %3205  ;;  %3679 = vrot.lane.b32.xlu1 %v5642_v37, %s7083_s7  ;;  %v3223_v1 = vmul.f32 %v3216_v51, %v3207_v16  ;;  %v3224_v11 = vmul.f32 %v3220_v60, %v3209_v48  ;;  %vm7099_vm9 = vmmov %vm7096_vm6 }
 0x453   : > { %v3208_v38 = vsel %vm7084_vm10, %v3202_v2, %v3206_v41  ;;  %v3210_v5 = vsel %vm7085_vm11, %v3206_v41, %v3202_v2  ;;  %vm7100_vm10 = vcmp.lt.s32.totalorder %v4636_v6, 99 }
 0x454   : > { %v3225_v61 = vmul.f32 %v3216_v51, %v3208_v38  ;;  %v3226_v25 = vmul.f32 %v3220_v60, %v3210_v5  ;;  %3681 = vrot.lane.b32.xlu0 %v5648_v42, %s7083_s7  ;;  %v3232_v28 = vpop.permute.xlu1 %3231  ;;  %v4259_v5 = vld [vmem:[%s6872_s1 + $0x43] ss:$8 sm:$0x3]  ;;  %vm7101_vm11 = vmmov %vm7100_vm10 }
 0x456   : > { %v3227_v57 = vpack.c.bf16 %v3225_v61, %v3223_v1  ;;  %v3234_v26 = vpop.permute.xlu0 %3233  ;;  %3683 = vrot.lane.b32.xlu1 %v5733_v43, %s7083_s7  ;;  %v3228_v12 = vpack.c.bf16 %v3226_v25, %v3224_v11  ;;  %v3344_v25 = vrot.slane %v4259_v5, %v4647_v9 }
 0x458   : > { %3685 = vrot.lane.b32.xlu0 %v5737_v44, %s7083_s7  ;;  %v3236_v39 = vpop.permute.xlu1 %3235  ;;  %4004 = vmatprep.subr.bf16.mxu1 %v3228_v12 }
 0x459   : > { %v3239_v62 = vsel %vm7086_vm12, %v3232_v28, %v3236_v39  ;;  %v3241_v49 = vsel %vm7087_vm13, %v3236_v39, %v3232_v28  ;;  %4005 = vmatpush1.bf16.msra.mxu1 %v3227_v57  ;;  %v3348_v28 = vrot.slane %v4259_v5, %v4638_v7  ;;  %vm7102_vm12 = vmmov %vm7100_vm10 }
 0x45a   : > { %v3238_v23 = vpop.permute.xlu0 %3237  ;;  %3711 = vrot.lane.b32.xlu1 %v5642_v37, %s7088_s12  ;;  %v3255_v46 = vmul.f32 %v3248_v27, %v3239_v62  ;;  %v3256_v8 = vmul.f32 %v3252_v3, %v3241_v49  ;;  %vm7103_vm13 = vmmov %vm7100_vm10 }
 0x45b   : > { %v3240_v13 = vsel %vm7089_vm0, %v3234_v26, %v3238_v23  ;;  %v3242_v35 = vsel %vm7090_vm1, %v3238_v23, %v3234_v26  ;;  %vm7104_vm0 = vcmp.lt.s32.totalorder %v4636_v6, 98 }
 0x45c   : > { %v3257_v58 = vmul.f32 %v3248_v27, %v3240_v13  ;;  %v3258_v53 = vmul.f32 %v3252_v3, %v3242_v35  ;;  %3713 = vrot.lane.b32.xlu0 %v5648_v42, %s7088_s12  ;;  %v3264_v63 = vpop.permute.xlu1 %3263  ;;  %4007 = vmatmul.mubr.bf16.vlgmr.msra.gmra.mrb[0].mxu1 %v4389_v29  ;;  %vm7105_vm1 = vmmov %vm7104_vm0 }
 0x45d   : > { %4049 = vmatprep.mubr.bf16.mxu1 %v4394_v19  ;;  %v4260_v19 = vld [vmem:[%s6872_s1 + $0x44] ss:$8 sm:$0x3] }
 0x45e   : > { %v3259_v14 = vpack.c.bf16 %v3257_v58, %v3255_v46  ;;  %v3266_v34 = vpop.permute.xlu0 %3265  ;;  %3715 = vrot.lane.b32.xlu1 %v5733_v43, %s7088_s12  ;;  %v3260_v20 = vpack.c.bf16 %v3258_v53, %v3256_v8  ;;  %v3376_v8 = vrot.slane %v4260_v19, %v4647_v9  ;;  %v3380_v58 = vrot.slane %v4260_v19, %v4638_v7 }
 0x460   : > { %3717 = vrot.lane.b32.xlu0 %v5737_v44, %s7088_s12  ;;  %v3268_v50 = vpop.permute.xlu1 %3267  ;;  %4017 = vmatprep.subr.bf16.mxu1 %v3260_v20 }
 0x461   : > { %v3271_v47 = vsel %vm7091_vm2, %v3264_v63, %v3268_v50  ;;  %v3273_v21 = vsel %vm7092_vm3, %v3268_v50, %v3264_v63  ;;  %4018 = vmatpush1.bf16.msra.mxu1 %v3259_v14  ;;  %vm7106_vm2 = vmmov %vm7104_vm0 }
 0x462   : > { %v3270_v59 = vpop.permute.xlu0 %3269  ;;  %3743 = vrot.lane.b32.xlu1 %v5642_v37, %s7093_s17  ;;  %v3287_v4 = vmul.f32 %v3280_v32, %v3271_v47  ;;  %v3288_v54 = vmul.f32 %v3284_v30, %v3273_v21  ;;  %vm7107_vm3 = vmmov %vm7104_vm0 }
 0x463   : > { %v3272_v24 = vsel %vm7094_vm4, %v3266_v34, %v3270_v59  ;;  %v3274_v18 = vsel %vm7095_vm5, %v3270_v59, %v3266_v34  ;;  %v4261_v59 = vld [vmem:[%s6872_s1 + $0x45] ss:$8 sm:$0x3]  ;;  %vm7108_vm4 = vcmp.lt.s32.totalorder %v4636_v6, 97 }
 0x464   : > { %v3289_v36 = vmul.f32 %v3280_v32, %v3272_v24  ;;  %v3290_v10 = vmul.f32 %v3284_v30, %v3274_v18  ;;  %3745 = vrot.lane.b32.xlu0 %v5648_v42, %s7093_s17  ;;  %v3296_v33 = vpop.permute.xlu1 %3295  ;;  %v3312_v42 = vrot.slane %v4258_v40, %v4647_v9  ;;  %vm7109_vm5 = vmmov %vm7108_vm4 }
 0x466   : > { %v3291_v15 = vpack.c.bf16 %v3289_v36, %v3287_v4  ;;  %v3298_v37 = vpop.permute.xlu0 %3297  ;;  %3747 = vrot.lane.b32.xlu1 %v5733_v43, %s7093_s17  ;;  %v3292_v45 = vpack.c.bf16 %v3290_v10, %v3288_v54  ;;  %v3408_v54 = vrot.slane %v4261_v59, %v4647_v9  ;;  %v3412_v36 = vrot.slane %v4261_v59, %v4638_v7 }
 0x468   : > { %3749 = vrot.lane.b32.xlu0 %v5737_v44, %s7093_s17  ;;  %v3300_v0 = vpop.permute.xlu1 %3299  ;;  %4019 = vmatprep.subr.bf16.mxu1 %v3292_v45 }
 0x469   : > { %v3303_v2 = vsel %vm7096_vm6, %v3296_v33, %v3300_v0  ;;  %v3305_v43 = vsel %vm7097_vm7, %v3300_v0, %v3296_v33  ;;  %4020 = vmatpush1.bf16.msra.mxu1 %v3291_v15  ;;  %vm7110_vm6 = vmmov %vm7108_vm4 }
 0x46a   : > { %v3302_v51 = vpop.permute.xlu0 %3301  ;;  %3885 = vperm.xlu1 %4375, %v3881_v22   ;;  %v3319_v55 = vmul.f32 %v3312_v42, %v3303_v2  ;;  %v3320_v16 = vmul.f32 %v3316_v56, %v3305_v43  ;;  %vm7111_vm7 = vmmov %vm7108_vm4  ;;  %v4262_v43 = vld [vmem:[%s6872_s1 + $0x46] ss:$8 sm:$0x3] }
 0x46b   : > { %v3304_v44 = vsel %vm7098_vm8, %v3298_v37, %v3302_v51  ;;  %v3306_v60 = vsel %vm7099_vm9, %v3302_v51, %v3298_v37  ;;  %vm7112_vm8 = vcmp.lt.s32.totalorder %v4636_v6, 96 }
 0x46c   : > { %v3321_v48 = vmul.f32 %v3312_v42, %v3304_v44  ;;  %v3322_v41 = vmul.f32 %v3316_v56, %v3306_v60  ;;  %3890 = vperm.xlu0 %4374, %v3882_v17   ;;  %v3328_v38 = vpop.permute.xlu1 %3327  ;;  %v3440_v60 = vrot.slane %v4262_v43, %v4647_v9  ;;  %vm7113_vm9 = vmmov %vm7112_vm8 }
 0x46e   : > { %v3323_v1 = vpack.c.bf16 %v3321_v48, %v3319_v55  ;;  %v3330_v11 = vpop.permute.xlu0 %3329  ;;  %v3324_v61 = vpack.c.bf16 %v3322_v41, %v3320_v16  ;;  %v3444_v55 = vrot.slane %v4262_v43, %v4638_v7 }
 0x470   : > { %v3332_v52 = vpop.permute.xlu1 %3331  ;;  %4021 = vmatprep.subr.bf16.mxu1 %v3324_v61 }
 0x471   : > { %v3335_v57 = vsel %vm7100_vm10, %v3328_v38, %v3332_v52  ;;  %v3337_v26 = vsel %vm7101_vm11, %v3332_v52, %v3328_v38  ;;  %4022 = vmatpush1.bf16.msra.mxu1 %v3323_v1  ;;  %vm7114_vm10 = vmmov %vm7112_vm8 }
 0x472   : > { %v3334_v12 = vpop.permute.xlu0 %3333  ;;  %v3351_v39 = vmul.f32 %v3344_v25, %v3335_v57  ;;  %v3352_v29 = vmul.f32 %v3348_v28, %v3337_v26  ;;  %vm7115_vm11 = vmmov %vm7112_vm8  ;;  %v4263_v57 = vld [vmem:[%s6872_s1 + $0x47] ss:$8 sm:$0x3] }
 0x473   : > { %v3336_v27 = vsel %vm7102_vm12, %v3330_v11, %v3334_v12  ;;  %v3338_v3 = vsel %vm7103_vm13, %v3334_v12, %v3330_v11  ;;  %vm7116_vm12 = vcmp.lt.s32.totalorder %v4636_v6, 95 }
 0x474   : > { %v3353_v62 = vmul.f32 %v3344_v25, %v3336_v27  ;;  %v3354_v49 = vmul.f32 %v3348_v28, %v3338_v3  ;;  %v3360_v23 = vpop.permute.xlu1 %3359  ;;  %v3472_v3 = vrot.slane %v4263_v57, %v4647_v9  ;;  %vm7117_vm13 = vmmov %vm7116_vm12 }
 0x476   : > { %v3355_v46 = vpack.c.bf16 %v3353_v62, %v3351_v39  ;;  %v3362_v13 = vpop.permute.xlu0 %3361  ;;  %v3356_v35 = vpack.c.bf16 %v3354_v49, %v3352_v29  ;;  %v3476_v39 = vrot.slane %v4263_v57, %v4638_v7 }
 0x478   : > { %v3364_v53 = vpop.permute.xlu1 %3363  ;;  %4023 = vmatprep.subr.bf16.mxu1 %v3356_v35 }
 0x479   : > { %v3367_v63 = vsel %vm7104_vm0, %v3360_v23, %v3364_v53  ;;  %v3369_v31 = vsel %vm7105_vm1, %v3364_v53, %v3360_v23  ;;  %4024 = vmatpush1.bf16.msra.mxu1 %v3355_v46  ;;  %vm7118_vm0 = vmmov %vm7116_vm12 }
 0x47a   : > { %v3366_v14 = vpop.permute.xlu0 %3365  ;;  %v3383_v32 = vmul.f32 %v3376_v8, %v3367_v63  ;;  %v3384_v30 = vmul.f32 %v3380_v58, %v3369_v31  ;;  %vm7119_vm1 = vmmov %vm7118_vm0  ;;  %v4264_v63 = vld [vmem:[%s6872_s1 + $0x50] ss:$8 sm:$0x3] }
 0x47b   : > { %v3368_v34 = vsel %vm7106_vm2, %v3362_v13, %v3366_v14  ;;  %v3370_v20 = vsel %vm7107_vm3, %v3366_v14, %v3362_v13  ;;  %vm7120_vm2 = vcmp.lt.s32.totalorder %v4636_v6, 94 }
 0x47c   : > { %v3385_v50 = vmul.f32 %v3376_v8, %v3368_v34  ;;  %v3386_v47 = vmul.f32 %v3380_v58, %v3370_v20  ;;  %v3392_v21 = vpop.permute.xlu1 %3391  ;;  %v3504_v20 = vrot.slane %v4264_v63, %v4647_v9  ;;  %vm7121_vm3 = vmmov %vm7120_vm2 }
 0x47e   : > { %v3387_v24 = vpack.c.bf16 %v3385_v50, %v3383_v32  ;;  %v3394_v18 = vpop.permute.xlu0 %3393  ;;  %v3388_v4 = vpack.c.bf16 %v3386_v47, %v3384_v30  ;;  %v3508_v32 = vrot.slane %v4264_v63, %v4638_v7 }
 0x480   : > { %v3396_v10 = vpop.permute.xlu1 %3395  ;;  %4025 = vmatprep.subr.bf16.mxu1 %v3388_v4 }
 0x481   : > { %v3399_v33 = vsel %vm7108_vm4, %v3392_v21, %v3396_v10  ;;  %v3401_v40 = vsel %vm7109_vm5, %v3396_v10, %v3392_v21  ;;  %4026 = vmatpush1.bf16.msra.mxu1 %v3387_v24  ;;  %vm7122_vm4 = vmmov %vm7120_vm2 }
 0x482   : > { %v3398_v15 = vpop.permute.xlu0 %3397  ;;  %v3415_v22 = vmul.f32 %v3408_v54, %v3399_v33  ;;  %v3416_v42 = vmul.f32 %v3412_v36, %v3401_v40  ;;  %vm7123_vm5 = vmmov %vm7120_vm2  ;;  %v4265_v33 = vld [vmem:[%s6872_s1 + $0x51] ss:$8 sm:$0x3] }
 0x483   : > { %v3400_v37 = vsel %vm7110_vm6, %v3394_v18, %v3398_v15  ;;  %v3402_v45 = vsel %vm7111_vm7, %v3398_v15, %v3394_v18  ;;  %vm7124_vm6 = vcmp.lt.s32.totalorder %v4636_v6, 93 }
 0x484   : > { %v3417_v56 = vmul.f32 %v3408_v54, %v3400_v37  ;;  %v3418_v0 = vmul.f32 %v3412_v36, %v3402_v45  ;;  %v3424_v2 = vpop.permute.xlu1 %3423  ;;  %v3536_v45 = vrot.slane %v4265_v33, %v4647_v9  ;;  %vm7125_vm7 = vmmov %vm7124_vm6 }
 0x486   : > { %v3419_v17 = vpack.c.bf16 %v3417_v56, %v3415_v22  ;;  %v3426_v51 = vpop.permute.xlu0 %3425  ;;  %v3420_v44 = vpack.c.bf16 %v3418_v0, %v3416_v42  ;;  %v3540_v22 = vrot.slane %v4265_v33, %v4638_v7 }
 0x488   : > { %v3428_v16 = vpop.permute.xlu1 %3427  ;;  %4027 = vmatprep.subr.bf16.mxu1 %v3420_v44 }
 0x489   : > { %v3431_v48 = vsel %vm7112_vm8, %v3424_v2, %v3428_v16  ;;  %v3433_v41 = vsel %vm7113_vm9, %v3428_v16, %v3424_v2  ;;  %4028 = vmatpush1.bf16.msra.mxu1 %v3419_v17  ;;  %vm7126_vm8 = vmmov %vm7124_vm6 }
 0x48a   : > { %v3430_v38 = vpop.permute.xlu0 %3429  ;;  %v3447_v11 = vmul.f32 %v3440_v60, %v3431_v48  ;;  %v3448_v61 = vmul.f32 %v3444_v55, %v3433_v41  ;;  %vm7127_vm9 = vmmov %vm7124_vm6  ;;  %v4266_v48 = vld [vmem:[%s6872_s1 + $0x52] ss:$8 sm:$0x3] }
 0x48b   : > { %v3432_v5 = vsel %vm7114_vm10, %v3426_v51, %v3430_v38  ;;  %v3434_v1 = vsel %vm7115_vm11, %v3430_v38, %v3426_v51  ;;  %vm7128_vm10 = vcmp.lt.s32.totalorder %v4636_v6, 83 }
 0x48c   : > { %v3449_v25 = vmul.f32 %v3440_v60, %v3432_v5  ;;  %v3450_v28 = vmul.f32 %v3444_v55, %v3434_v1  ;;  %v3456_v52 = vpop.permute.xlu1 %3455  ;;  %v3568_v1 = vrot.slane %v4266_v48, %v4647_v9  ;;  %vm7129_vm11 = vmmov %vm7128_vm10 }
 0x48e   : > { %v3451_v26 = vpack.c.bf16 %v3449_v25, %v3447_v11  ;;  %v3458_v12 = vpop.permute.xlu0 %3457  ;;  %v3452_v27 = vpack.c.bf16 %v3450_v28, %v3448_v61  ;;  %v3572_v11 = vrot.slane %v4266_v48, %v4638_v7 }
 0x490   : > { %v3460_v29 = vpop.permute.xlu1 %3459  ;;  %4029 = vmatprep.subr.bf16.mxu1 %v3452_v27 }
 0x491   : > { %v3463_v62 = vsel %vm7116_vm12, %v3456_v52, %v3460_v29  ;;  %v3465_v49 = vsel %vm7117_vm13, %v3460_v29, %v3456_v52  ;;  %4030 = vmatpush1.bf16.msra.mxu1 %v3451_v26  ;;  %vm7130_vm12 = vmmov %vm7128_vm10 }
 0x492   : > { %v3462_v23 = vpop.permute.xlu0 %3461  ;;  %v3479_v13 = vmul.f32 %v3472_v3, %v3463_v62  ;;  %v3480_v35 = vmul.f32 %v3476_v39, %v3465_v49  ;;  %vm7131_vm13 = vmmov %vm7128_vm10  ;;  %v4267_v62 = vld [vmem:[%s6872_s1 + $0x53] ss:$8 sm:$0x3] }
 0x493   : > { %v3464_v19 = vsel %vm7118_vm0, %v3458_v12, %v3462_v23  ;;  %v3466_v46 = vsel %vm7119_vm1, %v3462_v23, %v3458_v12  ;;  %vm7132_vm0 = vcmp.lt.s32.totalorder %v4636_v6, 82 }
 0x494   : > { %v3481_v8 = vmul.f32 %v3472_v3, %v3464_v19  ;;  %v3482_v58 = vmul.f32 %v3476_v39, %v3466_v46  ;;  %v3488_v53 = vpop.permute.xlu1 %3487  ;;  %v3600_v46 = vrot.slane %v4267_v62, %v4647_v9  ;;  %vm7133_vm1 = vmmov %vm7132_vm0 }
 0x496   : > { %v3483_v31 = vpack.c.bf16 %v3481_v8, %v3479_v13  ;;  %v3490_v14 = vpop.permute.xlu0 %3489  ;;  %v3484_v34 = vpack.c.bf16 %v3482_v58, %v3480_v35  ;;  %v3604_v13 = vrot.slane %v4267_v62, %v4638_v7 }
 0x498   : > { %v3492_v30 = vpop.permute.xlu1 %3491  ;;  %4031 = vmatprep.subr.bf16.mxu1 %v3484_v34 }
 0x499   : > { %v3495_v50 = vsel %vm7120_vm2, %v3488_v53, %v3492_v30  ;;  %v3497_v47 = vsel %vm7121_vm3, %v3492_v30, %v3488_v53  ;;  %4032 = vmatpush1.bf16.msra.mxu1 %v3483_v31  ;;  %vm7134_vm2 = vmmov %vm7132_vm0 }
 0x49a   : > { %v3494_v21 = vpop.permute.xlu0 %3493  ;;  %v3511_v18 = vmul.f32 %v3504_v20, %v3495_v50  ;;  %v3512_v4 = vmul.f32 %v3508_v32, %v3497_v47  ;;  %vm7135_vm3 = vmmov %vm7132_vm0  ;;  %v4268_v50 = vld [vmem:[%s6872_s1 + $0x54] ss:$8 sm:$0x3] }
 0x49b   : > { %v3496_v59 = vsel %vm7122_vm4, %v3490_v14, %v3494_v21  ;;  %v3498_v24 = vsel %vm7123_vm5, %v3494_v21, %v3490_v14  ;;  %vm7136_vm4 = vcmp.lt.s32.totalorder %v4636_v6, 81 }
 0x49c   : > { %v3513_v54 = vmul.f32 %v3504_v20, %v3496_v59  ;;  %v3514_v36 = vmul.f32 %v3508_v32, %v3498_v24  ;;  %v3520_v10 = vpop.permute.xlu1 %3519  ;;  %v3632_v24 = vrot.slane %v4268_v50, %v4647_v9  ;;  %vm7137_vm5 = vmmov %vm7136_vm4 }
 0x49e   : > { %v3515_v40 = vpack.c.bf16 %v3513_v54, %v3511_v18  ;;  %v3522_v15 = vpop.permute.xlu0 %3521  ;;  %v3516_v37 = vpack.c.bf16 %v3514_v36, %v3512_v4  ;;  %v3636_v18 = vrot.slane %v4268_v50, %v4638_v7 }
 0x4a0   : > { %v3524_v42 = vpop.permute.xlu1 %3523  ;;  %4033 = vmatprep.subr.bf16.mxu1 %v3516_v37 }
 0x4a1   : > { %v3527_v56 = vsel %vm7124_vm6, %v3520_v10, %v3524_v42  ;;  %v3529_v0 = vsel %vm7125_vm7, %v3524_v42, %v3520_v10  ;;  %4034 = vmatpush1.bf16.msra.mxu1 %v3515_v40  ;;  %vm7138_vm6 = vmmov %vm7136_vm4 }
 0x4a2   : > { %v3526_v2 = vpop.permute.xlu0 %3525  ;;  %v3543_v51 = vmul.f32 %v3536_v45, %v3527_v56  ;;  %v3544_v44 = vmul.f32 %v3540_v22, %v3529_v0  ;;  %vm7139_vm7 = vmmov %vm7136_vm4  ;;  %v4269_v56 = vld [vmem:[%s6872_s1 + $0x55] ss:$8 sm:$0x3] }
 0x4a3   : > { %v3528_v43 = vsel %vm7126_vm8, %v3522_v15, %v3526_v2  ;;  %v3530_v17 = vsel %vm7127_vm9, %v3526_v2, %v3522_v15  ;;  %vm7140_vm8 = vcmp.lt.s32.totalorder %v4636_v6, 80 }
 0x4a4   : > { %v3545_v60 = vmul.f32 %v3536_v45, %v3528_v43  ;;  %v3546_v55 = vmul.f32 %v3540_v22, %v3530_v17  ;;  %v3552_v16 = vpop.permute.xlu1 %3551  ;;  %v3664_v17 = vrot.slane %v4269_v56, %v4647_v9  ;;  %vm7141_vm9 = vmmov %vm7140_vm8 }
 0x4a6   : > { %v3547_v41 = vpack.c.bf16 %v3545_v60, %v3543_v51  ;;  %v3554_v38 = vpop.permute.xlu0 %3553  ;;  %v3548_v5 = vpack.c.bf16 %v3546_v55, %v3544_v44  ;;  %v3668_v51 = vrot.slane %v4269_v56, %v4638_v7 }
 0x4a8   : > { %v3556_v61 = vpop.permute.xlu1 %3555  ;;  %4035 = vmatprep.subr.bf16.mxu1 %v3548_v5 }
 0x4a9   : > { %v3559_v25 = vsel %vm7128_vm10, %v3552_v16, %v3556_v61  ;;  %v3561_v28 = vsel %vm7129_vm11, %v3556_v61, %v3552_v16  ;;  %4036 = vmatpush1.bf16.msra.mxu1 %v3547_v41  ;;  %vm7142_vm10 = vmmov %vm7140_vm8 }
 0x4aa   : > { %v3558_v52 = vpop.permute.xlu0 %3557  ;;  %v3575_v12 = vmul.f32 %v3568_v1, %v3559_v25  ;;  %v3576_v27 = vmul.f32 %v3572_v11, %v3561_v28  ;;  %vm7143_vm11 = vmmov %vm7140_vm8  ;;  %v4270_v25 = vld [vmem:[%s6872_s1 + $0x56] ss:$8 sm:$0x3] }
 0x4ab   : > { %v3560_v57 = vsel %vm7130_vm12, %v3554_v38, %v3558_v52  ;;  %v3562_v26 = vsel %vm7131_vm13, %v3558_v52, %v3554_v38  ;;  %vm7144_vm12 = vcmp.lt.s32.totalorder %v4636_v6, 79 }
 0x4ac   : > { %v3577_v3 = vmul.f32 %v3568_v1, %v3560_v57  ;;  %v3578_v39 = vmul.f32 %v3572_v11, %v3562_v26  ;;  %v3584_v29 = vpop.permute.xlu1 %3583  ;;  %v3696_v26 = vrot.slane %v4270_v25, %v4647_v9  ;;  %vm7145_vm13 = vmmov %vm7144_vm12 }
 0x4ae   : > { %v3579_v49 = vpack.c.bf16 %v3577_v3, %v3575_v12  ;;  %v3586_v23 = vpop.permute.xlu0 %3585  ;;  %v3580_v19 = vpack.c.bf16 %v3578_v39, %v3576_v27  ;;  %v3700_v12 = vrot.slane %v4270_v25, %v4638_v7 }
 0x4b0   : > { %v3588_v35 = vpop.permute.xlu1 %3587  ;;  %4037 = vmatprep.subr.bf16.mxu1 %v3580_v19 }
 0x4b1   : > { %v3591_v8 = vsel %vm7132_vm0, %v3584_v29, %v3588_v35  ;;  %v3593_v58 = vsel %vm7133_vm1, %v3588_v35, %v3584_v29  ;;  %4038 = vmatpush1.bf16.msra.mxu1 %v3579_v49  ;;  %vm7146_vm0 = vmmov %vm7144_vm12 }
 0x4b2   : > { %v3590_v53 = vpop.permute.xlu0 %3589  ;;  %v3607_v14 = vmul.f32 %v3600_v46, %v3591_v8  ;;  %v3608_v34 = vmul.f32 %v3604_v13, %v3593_v58  ;;  %vm7147_vm1 = vmmov %vm7146_vm0  ;;  %v4271_v8 = vld [vmem:[%s6872_s1 + $0x57] ss:$8 sm:$0x3] }
 0x4b3   : > { %v3592_v63 = vsel %vm7134_vm2, %v3586_v23, %v3590_v53  ;;  %v3594_v31 = vsel %vm7135_vm3, %v3590_v53, %v3586_v23  ;;  %vm7148_vm2 = vcmp.lt.s32.totalorder %v4636_v6, 78  ;;  %v4395_v6 = vld [vmem:[%s6875_s4 + $0x18] ss:$28 sps:$4 sm:$0xff]  }
 0x4b4   : > { %v3609_v20 = vmul.f32 %v3600_v46, %v3592_v63  ;;  %v3610_v32 = vmul.f32 %v3604_v13, %v3594_v31  ;;  %v3616_v30 = vpop.permute.xlu1 %3615  ;;  %v3728_v31 = vrot.slane %v4271_v8, %v4647_v9  ;;  %vm7149_vm3 = vmmov %vm7148_vm2 }
 0x4b6   : > { %v3611_v47 = vpack.c.bf16 %v3609_v20, %v3607_v14  ;;  %v3618_v21 = vpop.permute.xlu0 %3617  ;;  %v3612_v59 = vpack.c.bf16 %v3610_v32, %v3608_v34  ;;  %v3732_v14 = vrot.slane %v4271_v8, %v4638_v7 }
 0x4b8   : > { %v3620_v4 = vpop.permute.xlu1 %3619  ;;  %4039 = vmatprep.subr.bf16.mxu1 %v3612_v59 }
 0x4b9   : > { %v3623_v54 = vsel %vm7136_vm4, %v3616_v30, %v3620_v4  ;;  %v3625_v36 = vsel %vm7137_vm5, %v3620_v4, %v3616_v30  ;;  %4040 = vmatpush1.bf16.msra.mxu1 %v3611_v47  ;;  %vm7150_vm4 = vmmov %vm7148_vm2 }
 0x4ba   : > { %v3622_v10 = vpop.permute.xlu0 %3621  ;;  %v3639_v15 = vmul.f32 %v3632_v24, %v3623_v54  ;;  %v3640_v37 = vmul.f32 %v3636_v18, %v3625_v36  ;;  %vm7151_vm5 = vmmov %vm7148_vm2  ;;  %v4272_v54 = vld [vmem:[%s6872_s1 + $0x60] ss:$8 sm:$0x3] }
 0x4bb   : > { %v3624_v33 = vsel %vm7138_vm6, %v3618_v21, %v3622_v10  ;;  %v3626_v40 = vsel %vm7139_vm7, %v3622_v10, %v3618_v21 }
 0x4bc   : > { %v3641_v45 = vmul.f32 %v3632_v24, %v3624_v33  ;;  %v3642_v22 = vmul.f32 %v3636_v18, %v3626_v40  ;;  %v3648_v42 = vpop.permute.xlu1 %3647  ;;  %v3760_v40 = vrot.slane %v4272_v54, %v4647_v9 }
 0x4be   : > { %v3643_v0 = vpack.c.bf16 %v3641_v45, %v3639_v15  ;;  %v3650_v2 = vpop.permute.xlu0 %3649  ;;  %v3644_v43 = vpack.c.bf16 %v3642_v22, %v3640_v37  ;;  %v3764_v15 = vrot.slane %v4272_v54, %v4638_v7  ;;  %v4392_v45 = vld [vmem:[%s6875_s4 + $0x10] ss:$28 sps:$4 sm:$0xff]  }
 0x4c0   : > { %v3652_v44 = vpop.permute.xlu1 %3651  ;;  %4041 = vmatprep.subr.bf16.mxu1 %v3644_v43 }
 0x4c1   : > { %v3655_v60 = vsel %vm7140_vm8, %v3648_v42, %v3652_v44  ;;  %v3657_v55 = vsel %vm7141_vm9, %v3652_v44, %v3648_v42  ;;  %4042 = vmatpush1.bf16.msra.mxu1 %v3643_v0 }
 0x4c2   : > { %v3654_v16 = vpop.permute.xlu0 %3653  ;;  %v3671_v38 = vmul.f32 %v3664_v17, %v3655_v60  ;;  %v3672_v5 = vmul.f32 %v3668_v51, %v3657_v55 }
 0x4c3   : > { %v3656_v48 = vsel %vm7142_vm10, %v3650_v2, %v3654_v16  ;;  %v3658_v41 = vsel %vm7143_vm11, %v3654_v16, %v3650_v2 }
 0x4c4   : > { %v3673_v1 = vmul.f32 %v3664_v17, %v3656_v48  ;;  %v3674_v11 = vmul.f32 %v3668_v51, %v3658_v41  ;;  %v3680_v61 = vpop.permute.xlu1 %3679  ;;  %v7152_v51 = vmov 0  }
 0x4c6   : > { %v3675_v28 = vpack.c.bf16 %v3673_v1, %v3671_v38  ;;  %v3682_v52 = vpop.permute.xlu0 %3681  ;;  %v3676_v57 = vpack.c.bf16 %v3674_v11, %v3672_v5 }
 0x4c8   : > { %v3684_v27 = vpop.permute.xlu1 %3683  ;;  %4043 = vmatprep.subr.bf16.mxu1 %v3676_v57 }
 0x4c9   : > { %v3687_v3 = vsel %vm7144_vm12, %v3680_v61, %v3684_v27  ;;  %v3689_v39 = vsel %vm7145_vm13, %v3684_v27, %v3680_v61  ;;  %4044 = vmatpush1.bf16.msra.mxu1 %v3675_v28 }
 0x4ca   : > { %v3686_v29 = vpop.permute.xlu0 %3685  ;;  %v3703_v23 = vmul.f32 %v3696_v26, %v3687_v3  ;;  %v3704_v19 = vmul.f32 %v3700_v12, %v3689_v39 }
 0x4cb   : > { %v3688_v62 = vsel %vm7146_vm0, %v3682_v52, %v3686_v29  ;;  %v3690_v49 = vsel %vm7147_vm1, %v3686_v29, %v3682_v52 }
 0x4cc   : > { %v3705_v46 = vmul.f32 %v3696_v26, %v3688_v62  ;;  %v3706_v13 = vmul.f32 %v3700_v12, %v3690_v49  ;;  %v3712_v35 = vpop.permute.xlu1 %3711 }
 0x4ce   : > { %v3707_v58 = vpack.c.bf16 %v3705_v46, %v3703_v23  ;;  %v3714_v53 = vpop.permute.xlu0 %3713  ;;  %v3708_v63 = vpack.c.bf16 %v3706_v13, %v3704_v19 }
 0x4d0   : > { %v3716_v34 = vpop.permute.xlu1 %3715  ;;  %4045 = vmatprep.subr.bf16.mxu1 %v3708_v63 }
 0x4d1   : > { %v3719_v20 = vsel %vm7148_vm2, %v3712_v35, %v3716_v34  ;;  %v3721_v32 = vsel %vm7149_vm3, %v3716_v34, %v3712_v35  ;;  %4046 = vmatpush1.bf16.msra.mxu1 %v3707_v58 }
 0x4d2   : > { %v3718_v30 = vpop.permute.xlu0 %3717  ;;  %v3735_v21 = vmul.f32 %v3728_v31, %v3719_v20  ;;  %v3736_v59 = vmul.f32 %v3732_v14, %v3721_v32 }
 0x4d3   : > { %v3720_v50 = vsel %vm7150_vm4, %v3714_v53, %v3718_v30  ;;  %v3722_v47 = vsel %vm7151_vm5, %v3718_v30, %v3714_v53 }
 0x4d4   : > { %v3737_v24 = vmul.f32 %v3728_v31, %v3720_v50  ;;  %v3738_v18 = vmul.f32 %v3732_v14, %v3722_v47  ;;  %v3744_v4 = vpop.permute.xlu1 %3743 }
 0x4d6   : > { %v3739_v36 = vpack.c.bf16 %v3737_v24, %v3735_v21  ;;  %v3746_v10 = vpop.permute.xlu0 %3745  ;;  %v3740_v33 = vpack.c.bf16 %v3738_v18, %v3736_v59 }
 0x4d8   : > { %v3748_v37 = vpop.permute.xlu1 %3747  ;;  %4047 = vmatprep.subr.bf16.mxu1 %v3740_v33 }
 0x4d9   : > { %v3751_v22 = vsel %vm1868_vm15, %v3744_v4, %v3748_v37  ;;  %v3753_v42 = vsel %vm1868_vm15, %v3748_v37, %v3744_v4  ;;  %4048 = vmatpush1.bf16.msra.mxu1 %v3739_v36 }
 0x4da   : > { %v3750_v56 = vpop.permute.xlu0 %3749  ;;  %v3767_v9 = vmul.f32 %v3760_v40, %v3751_v22  ;;  %v3768_v2 = vmul.f32 %v3764_v15, %v3753_v42 }
 0x4db   : > { %v3752_v0 = vsel %vm1868_vm15, %v3746_v10, %v3750_v56  ;;  %v3754_v7 = vsel %vm1868_vm15, %v3750_v56, %v3746_v10 }
 0x4dc   : > { %v3769_v43 = vmul.f32 %v3760_v40, %v3752_v0  ;;  %v3770_v17 = vmul.f32 %v3764_v15, %v3754_v7  ;;  %4050 = vmatmul.mubr.bf16.vlgmr.msra.gmra.mrb[0].mxu1 %v4392_v45 }
 0x4dd   : > { %4092 = vmatprep.mubr.bf16.mxu1 %v7152_v51 }
 0x4de   : > { %v3771_v44 = vpack.c.bf16 %v3769_v43, %v3767_v9  ;;  %v3772_v60 = vpack.c.bf16 %v3770_v17, %v3768_v2 }
 0x4e0   : > { %4060 = vmatprep.subr.bf16.mxu1 %v3772_v60 }
 0x4e1   : > { %4061 = vmatpush1.bf16.msra.mxu1 %v3771_v44 }
 0x4e8   : > { %4280 = vmatmul.mubr.msk.bf16.vlgmr.msra.gmra.mrb[0].mxu1 %vm2047_vm14, %v4395_v6 }
 0x4e9   : > { %v3886_v55 = vpop.permute.xlu1 %3885 }
 0x4eb   : > { %v3891_v38 = vpop.permute.xlu0 %3890 }
 0x5bb   : > { %v4094_v16 = vpop.f32.mrb[0].mxu1 }
 0x5bc   : > { %v4289_v48 = vadd.f32 %v4094_v16, %v3886_v55  ;;  %v4096_v41 = vpop.f32.mrb[1].mxu1 }
 0x5bd   : > { %v4290_v5 = vadd.f32 %v4096_v41, %v3886_v55  ;;  %v4098_v1 = vpop.f32.mrb[2].mxu1 }
 0x5be   : > { %4103 = vst [vmem:[%s5637_s20 + $0x20] sm:$0xff] %v4289_v48  ;;  %v4291_v11 = vadd.f32 %v4098_v1, %v3891_v38  ;;  %v4100_v61 = vpop.f32.mrb[3].mxu1 }
 0x5bf   : > { %4104 = vst [vmem:[%s5637_s20 + $0x28] sm:$0xff] %v4290_v5  ;;  %v4292_v25 = vadd.f32 %v4100_v61, %v3891_v38 }
 0x5c0   : > { %4105 = vst [vmem:[%s5637_s20 + $0x30] sm:$0xff] %v4291_v11 }
 0x5c1   : > { %4106 = vst [vmem:[%s5637_s20 + $0x38] sm:$0xff] %v4292_v25 }
 0x5c2 PF: > { %s16_s21 = sadd.s32 1, %s4410_s21  }
 0x5c3   : > { %p13_p4 = scmp.ge.s32.totalorder %s16_s21, 4  }
 0x5c5   :  { %15 = sbr.rel (!%p13_p4) target bundleno = 1 (0x1), region = 121 }

</bundles_post_ra>
